<compile_context>
chip_gen: v5e
topology: v5e:2x2
jax: 0.10.0
libtpu: 0.0.40
codegen_flags: <defaults>
</compile_context>

<pallas_src>
import functools

import jax
import jax.numpy as jnp
from jax import lax
from jax.experimental import pallas as pl
from jax.experimental.pallas import tpu as pltpu


def _round_up(v, m):
    return -(-v // m) * m


def _coupling_kernel(
    x0m_hbm, y1_ref,
    w_pre_ref, b_pre_ref,
    in_wt_ref, in_ws_ref, in_bt_ref, in_bs_ref,
    rsw_res_ref, rsw_skip_ref, rsb_res_ref, rsb_skip_ref,
    w_post_ref, b_post_ref,
    out_ref,
    x0m_buf, xw_pad, dma_sem,
    *, n_layers, kernel_size, dilation_rate, hidden, half_channels, c_pack,
    tile_t, halo, shift_pad, time_total, reverse,
):
    f32 = jnp.float32
    win = tile_t + 2 * halo
    Cp = c_pack
    b = pl.program_id(0)
    t = pl.program_id(1)
    n_t = pl.num_programs(1)

    # ---- double-buffered halo DMA --------------------------------------
    # rows [b*time_total + t*tile_t, ... + win) of the flattened x0|mask stream
    slot = t % 2
    row0 = pl.multiple_of(b * time_total + t * tile_t, 8)

    @pl.when(t == 0)                                   # prime the first tile
    def _prime():
        pltpu.make_async_copy(x0m_hbm.at[pl.ds(row0, win), :],
                              x0m_buf.at[0], dma_sem.at[0]).start()

    @pl.when(t + 1 < n_t)                              # prefetch the next tile
    def _prefetch():
        row_n = pl.multiple_of(row0 + tile_t, 8)
        pltpu.make_async_copy(x0m_hbm.at[pl.ds(row_n, win), :],
                              x0m_buf.at[1 - slot], dma_sem.at[1 - slot]).start()

    pltpu.make_async_copy(x0m_hbm.at[pl.ds(row0, win), :],
                          x0m_buf.at[slot], dma_sem.at[slot]).wait()

    x0m = x0m_buf[slot]                                # (win, Cm) f32
    mask_w = x0m[:, half_channels:half_channels + 1]   # (win, 1)
    mask_h = jnp.broadcast_to(mask_w, (win, hidden))   # hoisted broadcast

    # pre: Linear(half_channels -> hidden).  Mask/pad columns of x0m hit the
    # zero-padded rows of w_pre, so the full buffer feeds the MXU directly.
    h = (jnp.dot(x0m, w_pre_ref[...], preferred_element_type=f32)
         + b_pre_ref[...]) * mask_h                    # (win, H)

    # WN gated dilated-conv stack (gin_channels == 0 -> no conditioning).
    # xw_pad keeps the residual stream with `shift_pad` zero rows on both
    # sides so every conv tap is an in-bounds static slice.
    if shift_pad > 0:
        zpad = jnp.zeros((shift_pad, hidden), f32)
        xw_pad[0:shift_pad, :] = zpad
        xw_pad[shift_pad + win:, :] = zpad
    xw = h
    xw_pad[shift_pad:shift_pad + win, :] = xw

    out_acc = jnp.zeros((win, hidden), f32)
    for i in range(n_layers):
        dilation = dilation_rate ** i
        taps = []
        for j in range(kernel_size):
            off = (j - kernel_size // 2) * dilation
            taps.append(xw_pad[shift_pad + off: shift_pad + off + win, :])
        x_taps = jnp.concatenate(taps, axis=1)         # (win, k*H)
        # gated unit, weights pre-split by output half -> no mid-column slice
        pre_t = (jnp.dot(x_taps, in_wt_ref[i], preferred_element_type=f32)
                 + in_bt_ref[i])
        pre_s = (jnp.dot(x_taps, in_ws_ref[i], preferred_element_type=f32)
                 + in_bs_ref[i])
        acts = jnp.tanh(pre_t) * jax.nn.sigmoid(pre_s)  # (win, H)
        if i < n_layers - 1:
            res = (jnp.dot(acts, rsw_res_ref[i], preferred_element_type=f32)
                   + rsb_res_ref[i])
            xw = (xw + res) * mask_h
            xw_pad[shift_pad:shift_pad + win, :] = xw
        skip = (jnp.dot(acts, rsw_skip_ref[i], preferred_element_type=f32)
                + rsb_skip_ref[i])
        out_acc = out_acc + skip

    # Only the central tile rows are exact; the halo absorbs the conv fringe.
    h_enc = (out_acc * mask_h)[halo:halo + tile_t, :]  # (tT, H)
    mask_c = mask_w[halo:halo + tile_t, :]             # (tT, 1)
    mask_cp = jnp.broadcast_to(mask_c, (tile_t, Cp))

    # post: Linear(hidden -> 2*half_channels), column-padded to 2*Cp.
    stats = (jnp.dot(h_enc, w_post_ref[...], preferred_element_type=f32)
             + b_post_ref[...])                        # (tT, 2*Cp)
    m_flow = stats[:, :Cp] * mask_cp
    logs_flow = stats[:, Cp:] * mask_cp

    # lane-aligned (128-multiple) column groups: x1 | m1 | logs1
    x1 = y1_ref[0, :, 0:Cp]
    m1 = y1_ref[0, :, Cp:2 * Cp]
    logs1 = y1_ref[0, :, 2 * Cp:3 * Cp]
    if reverse:
        em = jnp.exp(-logs_flow) * mask_cp             # single exp, reused
        out_ref[0, :, 0:Cp] = (x1 - m_flow) * em
        out_ref[0, :, Cp:2 * Cp] = (m1 - m_flow) * em
        out_ref[0, :, 2 * Cp:3 * Cp] = logs1 - logs_flow
    else:
        em = jnp.exp(logs_flow) * mask_cp              # single exp, reused
        out_ref[0, :, 0:Cp] = m_flow + x1 * em
        out_ref[0, :, Cp:2 * Cp] = m_flow + m1 * em
        out_ref[0, :, 2 * Cp:3 * Cp] = logs1 + logs_flow


def residual_coupling_forward(x, m, logs, x_mask, params, *,
                              kernel_size, dilation_rate, n_layers,
                              reverse=False, tile_t=1024):
    """x, m, logs: (B, C, T); x_mask: (B, 1, T) — PyTorch NCT convention."""
    B, C, T = x.shape
    Ch = C // 2
    H = params["w_pre"].shape[1]
    k = kernel_size
    f32 = jnp.float32

    def to_btc(a):
        return jnp.transpose(a, (0, 2, 1))

    x_b, m_b, logs_b = to_btc(x), to_btc(m), to_btc(logs)
    mask_b = to_btc(x_mask)                                   # (B, T, 1)
    x0, x1 = x_b[..., :Ch], x_b[..., Ch:]
    m0, m1 = m_b[..., :Ch], m_b[..., Ch:]
    logs0, logs1 = logs_b[..., :Ch], logs_b[..., Ch:]

    # --- time tiling with a receptive-field halo ---
    rf = (k // 2) * sum(dilation_rate ** i for i in range(n_layers))
    halo = _round_up(rf, 8) if rf > 0 else 0
    tT = max(8, min(_round_up(tile_t, 8), _round_up(T, 8)))
    nT = -(-T // tT)
    T_pad = nT * tT
    time_total = T_pad + 2 * halo
    win = tT + 2 * halo
    shift_raw = (k // 2) * (dilation_rate ** (n_layers - 1))
    shift_pad = _round_up(shift_raw, 8) if shift_raw > 0 else 0

    # --- lane-dense packing widths ---
    Cp = _round_up(Ch, 128)          # per-field lane width of y1 / output
    Cm = _round_up(Ch + 1, 128)      # x0|mask halo-DMA stream width

    # pack x0 with the mask (single halo-DMA stream), pad lanes/time, flatten.
    x0m = jnp.concatenate([x0, mask_b], axis=-1)              # (B, T, Ch+1)
    x0m = jnp.pad(x0m, ((0, 0), (halo, halo + T_pad - T), (0, Cm - (Ch + 1))))
    x0m_flat = x0m.reshape(B * time_total, Cm)

    # pack x1 | m1 | logs1 as 128-aligned column groups, pad time to T_pad.
    def padc(a):
        return jnp.pad(a, ((0, 0), (0, 0), (0, Cp - Ch)))
    y1 = jnp.concatenate([padc(x1), padc(m1), padc(logs1)], axis=-1)
    y1 = jnp.pad(y1, ((0, 0), (0, T_pad - T), (0, 0)))        # (B, T_pad, 3*Cp)

    # --- weights (f32; see header note on dtypes) ---
    # pre: pad input rows so the mask/pad columns of the DMA stream hit zeros.
    w_pre = jnp.pad(params["w_pre"].astype(f32), ((0, Cm - Ch), (0, 0)))
    b_pre = params["b_pre"].astype(f32)
    # conv taps fused along K; gated unit split by output half (tanh | sigmoid)
    in_w = params["in_w"].reshape(n_layers, k * H, 2 * H).astype(f32)
    in_wt, in_ws = in_w[:, :, :H], in_w[:, :, H:]
    in_b = params["in_b"].astype(f32)
    in_bt, in_bs = in_b[:, :, :H], in_b[:, :, H:]
    # res/skip split by output half (skip half used for the last layer)
    rs_w = params["rs_w"].astype(f32)
    rsw_res, rsw_skip = rs_w[:, :, :H], rs_w[:, :, H:]
    rs_b = params["rs_b"].astype(f32)
    rsb_res, rsb_skip = rs_b[:, :, :H], rs_b[:, :, H:]
    # post: pad each output half (m | logs) to Cp lanes.
    wp = params["w_post"].astype(f32)
    bp = params["b_post"].astype(f32)
    w_post = jnp.concatenate(
        [jnp.pad(wp[:, :Ch], ((0, 0), (0, Cp - Ch))),
         jnp.pad(wp[:, Ch:], ((0, 0), (0, Cp - Ch)))], axis=1)   # (H, 2*Cp)
    b_post = jnp.concatenate(
        [jnp.pad(bp[:, :Ch], ((0, 0), (0, Cp - Ch))),
         jnp.pad(bp[:, Ch:], ((0, 0), (0, Cp - Ch)))], axis=1)   # (1, 2*Cp)

    kern = functools.partial(
        _coupling_kernel, n_layers=n_layers, kernel_size=k,
        dilation_rate=dilation_rate, hidden=H, half_channels=Ch, c_pack=Cp,
        tile_t=tT, halo=halo, shift_pad=shift_pad, time_total=time_total,
        reverse=reverse)

    y_spec = pl.BlockSpec((1, tT, 3 * Cp), lambda b, t: (b, t, 0))

    def w_spec(shape):
        nd = len(shape)
        return pl.BlockSpec(shape, lambda b, t, nd=nd: (0,) * nd)

    out = pl.pallas_call(
        kern,
        out_shape=jax.ShapeDtypeStruct((B, T_pad, 3 * Cp), jnp.float32),
        grid_spec=pltpu.PrefetchScalarGridSpec(
            num_scalar_prefetch=0,
            grid=(B, nT),
            in_specs=[pl.BlockSpec(memory_space=pl.ANY),   # x0|mask halo stream
                      y_spec,
                      w_spec(w_pre.shape), w_spec(b_pre.shape),
                      w_spec(in_wt.shape), w_spec(in_ws.shape),
                      w_spec(in_bt.shape), w_spec(in_bs.shape),
                      w_spec(rsw_res.shape), w_spec(rsw_skip.shape),
                      w_spec(rsb_res.shape), w_spec(rsb_skip.shape),
                      w_spec(w_post.shape), w_spec(b_post.shape)],
            out_specs=y_spec,
            scratch_shapes=[pltpu.VMEM((2, win, Cm), jnp.float32),   # DMA dbuf
                            pltpu.VMEM((win + 2 * shift_pad, H), jnp.float32),
                            pltpu.SemaphoreType.DMA((2,))],
        ),
        compiler_params=pltpu.CompilerParams(
            # time axis must run sequentially per core (cross-step DMA prefetch)
            dimension_semantics=("parallel", "arbitrary"),
            vmem_limit_bytes=48 * 1024 * 1024),
    )(x0m_flat, y1, w_pre, b_pre, in_wt, in_ws, in_bt, in_bs,
      rsw_res, rsw_skip, rsb_res, rsb_skip, w_post, b_post)

    out = out[:, :T, :]
    x1n = out[..., 0:Ch]
    m1n = out[..., Cp:Cp + Ch]
    logs1n = out[..., 2 * Cp:2 * Cp + Ch]
    x_out = jnp.concatenate([x0, x1n], axis=-1)
    m_out = jnp.concatenate([m0, m1n], axis=-1)
    logs_out = jnp.concatenate([logs0, logs1n], axis=-1)
    return (jnp.transpose(x_out, (0, 2, 1)),
            jnp.transpose(m_out, (0, 2, 1)),
            jnp.transpose(logs_out, (0, 2, 1)))


def init_params(key, channels, hidden, kernel_size, n_layers):
    Ch = channels // 2
    ks = jax.random.split(key, 8)
    s = 0.1
    w_pre = s * jax.random.normal(ks[0], (Ch, hidden), jnp.float32)
    b_pre = s * jax.random.normal(ks[1], (1, hidden), jnp.float32)
    in_w = s * jax.random.normal(ks[2], (n_layers, kernel_size, hidden, 2 * hidden),
                                 jnp.float32)
    in_b = s * jax.random.normal(ks[3], (n_layers, 1, 2 * hidden), jnp.float32)
    # res_skip layers: res half = columns [:hidden], skip half = [hidden:].
    # The last WN layer only uses its skip half; its res half is zeroed here.
    # NOTE: pretrained VITS checkpoints store the final res_skip layer with
    # only `hidden` output channels — a weight-import path must place them in
    # the skip half ([hidden:]) of rs_w[-1] / rs_b[-1].
    rs_w = s * jax.random.normal(ks[4], (n_layers, hidden, 2 * hidden), jnp.float32)
    rs_b = s * jax.random.normal(ks[5], (n_layers, 1, 2 * hidden), jnp.float32)
    rs_w = rs_w.at[-1, :, :hidden].set(0.0)
    rs_b = rs_b.at[-1, :, :hidden].set(0.0)
    # NOTE: the PyTorch module zero-inits `post` (identity flow at init); small
    # random values are used here so the full hot path affects the outputs.
    w_post = 0.01 * jax.random.normal(ks[6], (hidden, 2 * Ch), jnp.float32)
    b_post = 0.01 * jax.random.normal(ks[7], (1, 2 * Ch), jnp.float32)
    return dict(w_pre=w_pre, b_pre=b_pre, in_w=in_w, in_b=in_b,
                rs_w=rs_w, rs_b=rs_b, w_post=w_post, b_post=b_post)


def reference_forward(x, m, logs, x_mask, params, *, kernel_size, dilation_rate,
                      n_layers, hidden, reverse=False):
    """Pure-JAX reference in the PyTorch NCT convention (f32 everywhere)."""
    B, C, T = x.shape
    Ch = C // 2
    hi = "highest"
    x0, x1 = x[:, :Ch], x[:, Ch:]
    m0, m1 = m[:, :Ch], m[:, Ch:]
    l0, l1 = logs[:, :Ch], logs[:, Ch:]

    h = (jnp.einsum('bct,ch->bht', x0, params['w_pre'], precision=hi)
         + params['b_pre'][0][None, :, None]) * x_mask
    out = jnp.zeros_like(h)
    xw = h
    for i in range(n_layers):
        d = dilation_rate ** i
        pad = (kernel_size * d - d) // 2
        w = jnp.transpose(params['in_w'][i], (2, 1, 0))       # (2H, H, k) OIW
        x_in = lax.conv_general_dilated(
            xw, w, window_strides=(1,), padding=[(pad, pad)],
            rhs_dilation=(d,), dimension_numbers=('NCH', 'OIH', 'NCH'),
            precision=hi)
        x_in = x_in + params['in_b'][i, 0][None, :, None]
        acts = jnp.tanh(x_in[:, :hidden]) * jax.nn.sigmoid(x_in[:, hidden:])
        rs = (jnp.einsum('bht,hr->brt', acts, params['rs_w'][i], precision=hi)
              + params['rs_b'][i, 0][None, :, None])
        if i < n_layers - 1:
            xw = (xw + rs[:, :hidden]) * x_mask
        out = out + rs[:, hidden:]
    h_enc = out * x_mask
    stats = (jnp.einsum('bht,hs->bst', h_enc, params['w_post'], precision=hi)
             + params['b_post'][0][None, :, None]) * x_mask
    m_flow, logs_flow = stats[:, :Ch], stats[:, Ch:]
    if reverse:
        e = jnp.exp(-logs_flow)
        x1n = (x1 - m_flow) * e * x_mask
        m1n = (m1 - m_flow) * e * x_mask
        l1n = l1 - logs_flow
    else:
        e = jnp.exp(logs_flow)
        x1n = m_flow + x1 * e * x_mask
        m1n = m_flow + m1 * e * x_mask
        l1n = l1 + logs_flow
    return (jnp.concatenate([x0, x1n], 1),
            jnp.concatenate([m0, m1n], 1),
            jnp.concatenate([l0, l1n], 1))


if __name__ == "__main__":
    B, channels, T = 2, 8, 16
    hidden, kernel_size, dilation_rate, n_layers = 32, 5, 2, 3

    key = jax.random.PRNGKey(0)
    kx, km, kl, kp = jax.random.split(key, 4)
    x = jax.random.normal(kx, (B, channels, T), jnp.float32)
    m = jax.random.normal(km, (B, channels, T), jnp.float32)
    logs = 0.1 * jax.random.normal(kl, (B, channels, T), jnp.float32)
    lengths = jnp.array([T, 12])
    x_mask = (jnp.arange(T)[None, :] < lengths[:, None]).astype(jnp.float32)[:, None, :]

    params = init_params(kp, channels, hidden, kernel_size, n_layers)

    def check(out, ref, tag):
        for name, a, b in zip(("x", "m", "logs"), out, ref):
            assert a.shape == b.shape, (tag, name, a.shape, b.shape)
            err = float(jnp.max(jnp.abs(a - b)))
            assert err < 5e-3, (tag, name, err)

    # forward, single time tile
    out_fwd = residual_coupling_forward(
        x, m, logs, x_mask, params, kernel_size=kernel_size,
        dilation_rate=dilation_rate, n_layers=n_layers, reverse=False)
    out_fwd = jax.block_until_ready(out_fwd)
    ref_fwd = reference_forward(
        x, m, logs, x_mask, params, kernel_size=kernel_size,
        dilation_rate=dilation_rate, n_layers=n_layers, hidden=hidden,
        reverse=False)
    check(out_fwd, ref_fwd, "fwd")

    # forward, multiple time tiles (exercises the double-buffered halo DMA)
    out_tiled = residual_coupling_forward(
        x, m, logs, x_mask, params, kernel_size=kernel_size,
        dilation_rate=dilation_rate, n_layers=n_layers, reverse=False,
        tile_t=8)
    out_tiled = jax.block_until_ready(out_tiled)
    check(out_tiled, ref_fwd, "fwd_tiled")

    # reverse
    out_rev = residual_coupling_forward(
        x, m, logs, x_mask, params, kernel_size=kernel_size,
        dilation_rate=dilation_rate, n_layers=n_layers, reverse=True)
    out_rev = jax.block_until_ready(out_rev)
    ref_rev = reference_forward(
        x, m, logs, x_mask, params, kernel_size=kernel_size,
        dilation_rate=dilation_rate, n_layers=n_layers, hidden=hidden,
        reverse=True)
    check(out_rev, ref_rev, "rev")

    print("KERNEL_OK")
</pallas_src>

<mosaic_0001>
module attributes {stable_mosaic.version = 11 : i64} {
  func.func @_coupling_kernel(%arg0: i32, %arg1: i32, %arg2: memref<96x128xf32, #tpu.memory_space<any>>, %arg3: memref<1x16x384xf32, #tpu.memory_space<vmem>>, %arg4: memref<128x32xf32, #tpu.memory_space<vmem>>, %arg5: memref<1x32xf32, #tpu.memory_space<vmem>>, %arg6: memref<3x160x32xf32, #tpu.memory_space<vmem>>, %arg7: memref<3x160x32xf32, #tpu.memory_space<vmem>>, %arg8: memref<3x1x32xf32, #tpu.memory_space<vmem>>, %arg9: memref<3x1x32xf32, #tpu.memory_space<vmem>>, %arg10: memref<3x32x32xf32, #tpu.memory_space<vmem>>, %arg11: memref<3x32x32xf32, #tpu.memory_space<vmem>>, %arg12: memref<3x1x32xf32, #tpu.memory_space<vmem>>, %arg13: memref<3x1x32xf32, #tpu.memory_space<vmem>>, %arg14: memref<32x256xf32, #tpu.memory_space<vmem>>, %arg15: memref<1x256xf32, #tpu.memory_space<vmem>>, %arg16: memref<1x16x384xf32, #tpu.memory_space<vmem>>, %arg17: memref<2x48x128xf32, #tpu.memory_space<vmem>>, %arg18: memref<64x32xf32, #tpu.memory_space<vmem>>, %arg19: memref<2x!tpu.dma_semaphore, #tpu.memory_space<semaphore_mem>>) attributes {dimension_semantics = [#tpu.dimension_semantics<parallel>, #tpu.dimension_semantics<arbitrary>], iteration_bounds = array<i64: 2, 1>, scalar_prefetch = 0 : i64, scratch_operands = 3 : i64, tpu.core_type = #tpu.core_type<tc>, window_params = [{}, {transform_indices = @transform_1, window_bounds = array<i64: 1, 16, 384>}, {pipeline_mode = #tpu.pipeline_mode<synchronous>, transform_indices = @transform_2, window_bounds = array<i64: 128, 32>}, {pipeline_mode = #tpu.pipeline_mode<synchronous>, transform_indices = @transform_3, window_bounds = array<i64: 1, 32>}, {pipeline_mode = #tpu.pipeline_mode<synchronous>, transform_indices = @transform_4, window_bounds = array<i64: 3, 160, 32>}, {pipeline_mode = #tpu.pipeline_mode<synchronous>, transform_indices = @transform_5, window_bounds = array<i64: 3, 160, 32>}, {pipeline_mode = #tpu.pipeline_mode<synchronous>, transform_indices = @transform_6, window_bounds = array<i64: 3, 1, 32>}, {pipeline_mode = #tpu.pipeline_mode<synchronous>, transform_indices = @transform_7, window_bounds = array<i64: 3, 1, 32>}, {pipeline_mode = #tpu.pipeline_mode<synchronous>, transform_indices = @transform_8, window_bounds = array<i64: 3, 32, 32>}, {pipeline_mode = #tpu.pipeline_mode<synchronous>, transform_indices = @transform_9, window_bounds = array<i64: 3, 32, 32>}, {pipeline_mode = #tpu.pipeline_mode<synchronous>, transform_indices = @transform_10, window_bounds = array<i64: 3, 1, 32>}, {pipeline_mode = #tpu.pipeline_mode<synchronous>, transform_indices = @transform_11, window_bounds = array<i64: 3, 1, 32>}, {pipeline_mode = #tpu.pipeline_mode<synchronous>, transform_indices = @transform_12, window_bounds = array<i64: 32, 256>}, {pipeline_mode = #tpu.pipeline_mode<synchronous>, transform_indices = @transform_13, window_bounds = array<i64: 1, 256>}, {transform_indices = @transform_14, window_bounds = array<i64: 1, 16, 384>}]} {
    %c2_i32 = arith.constant 2 : i32
    %c0_i32 = arith.constant 0 : i32
    %0 = arith.cmpi eq, %c2_i32, %c0_i32 : i32
    %c1_i32 = arith.constant 1 : i32
    %1 = arith.select %0, %c1_i32, %c2_i32 : i32
    %2 = arith.remsi %arg1, %1 : i32
    %c0_i32_0 = arith.constant 0 : i32
    %3 = arith.cmpi ne, %2, %c0_i32_0 : i32
    %c0_i32_1 = arith.constant 0 : i32
    %4 = arith.cmpi slt, %2, %c0_i32_1 : i32
    %c0_i32_2 = arith.constant 0 : i32
    %5 = arith.cmpi slt, %1, %c0_i32_2 : i32
    %6 = arith.xori %4, %5 : i1
    %7 = arith.andi %6, %3 : i1
    %8 = arith.addi %2, %1 : i32
    %9 = arith.select %7, %8, %2 : i32
    %c48_i32 = arith.constant 48 : i32
    %10 = arith.muli %arg0, %c48_i32 : i32
    %c16_i32 = arith.constant 16 : i32
    %11 = arith.muli %arg1, %c16_i32 : i32
    %12 = arith.addi %10, %11 : i32
    %13 = tpu.assume_multiple %12, 8 : i32
    %c0_i32_3 = arith.constant 0 : i32
    %14 = arith.cmpi eq, %arg1, %c0_i32_3 : i32
    %15 = arith.extui %14 : i1 to i32
    %c0_i32_4 = arith.constant 0 : i32
    %16 = arith.cmpi ne, %15, %c0_i32_4 : i32
    scf.if %16 {
      %c0_i32_148 = arith.constant 0 : i32
      %c0_i32_149 = arith.constant 0 : i32
      %c0_i32_150 = arith.constant 0 : i32
      %204 = tpu.memref_slice %arg2[%13, %c0_i32_150] : memref<96x128xf32, #tpu.memory_space<any>> -> memref<48x128xf32, #tpu.memory_space<any>>
      %c0_i32_151 = arith.constant 0 : i32
      %c0_i32_152 = arith.constant 0 : i32
      %205 = tpu.memref_slice %arg17[%c0_i32_148, %c0_i32_151, %c0_i32_152] : memref<2x48x128xf32, #tpu.memory_space<vmem>> -> memref<1x48x128xf32, #tpu.memory_space<vmem>>
      %206 = tpu.memref_squeeze %205 : memref<1x48x128xf32, #tpu.memory_space<vmem>> -> memref<48x128xf32, #tpu.memory_space<vmem>>
      %207 = tpu.memref_slice %arg19[%c0_i32_149] : memref<2x!tpu.dma_semaphore, #tpu.memory_space<semaphore_mem>> -> memref<1x!tpu.dma_semaphore, #tpu.memory_space<semaphore_mem>>
      %208 = tpu.memref_squeeze %207 : memref<1x!tpu.dma_semaphore, #tpu.memory_space<semaphore_mem>> -> memref<!tpu.dma_semaphore, #tpu.memory_space<semaphore_mem>>
      tpu.enqueue_dma source(%204 : memref<48x128xf32, #tpu.memory_space<any>>) target(%206 : memref<48x128xf32, #tpu.memory_space<vmem>>) target_semaphore(%208 : memref<!tpu.dma_semaphore, #tpu.memory_space<semaphore_mem>>)
    } else {
    }
    %c1_i32_5 = arith.constant 1 : i32
    %17 = arith.addi %arg1, %c1_i32_5 : i32
    %c1_i32_6 = arith.constant 1 : i32
    %18 = arith.cmpi slt, %17, %c1_i32_6 : i32
    %19 = arith.extui %18 : i1 to i32
    %c0_i32_7 = arith.constant 0 : i32
    %20 = arith.cmpi ne, %19, %c0_i32_7 : i32
    scf.if %20 {
      %c16_i32_148 = arith.constant 16 : i32
      %204 = arith.addi %13, %c16_i32_148 : i32
      %205 = tpu.assume_multiple %204, 8 : i32
      %c1_i32_149 = arith.constant 1 : i32
      %206 = arith.subi %c1_i32_149, %9 : i32
      %c1_i32_150 = arith.constant 1 : i32
      %207 = arith.subi %c1_i32_150, %9 : i32
      %c0_i32_151 = arith.constant 0 : i32
      %208 = tpu.memref_slice %arg2[%205, %c0_i32_151] : memref<96x128xf32, #tpu.memory_space<any>> -> memref<48x128xf32, #tpu.memory_space<any>>
      %c0_i32_152 = arith.constant 0 : i32
      %c0_i32_153 = arith.constant 0 : i32
      %209 = tpu.memref_slice %arg17[%206, %c0_i32_152, %c0_i32_153] : memref<2x48x128xf32, #tpu.memory_space<vmem>> -> memref<1x48x128xf32, #tpu.memory_space<vmem>>
      %210 = tpu.memref_squeeze %209 : memref<1x48x128xf32, #tpu.memory_space<vmem>> -> memref<48x128xf32, #tpu.memory_space<vmem>>
      %211 = tpu.memref_slice %arg19[%207] : memref<2x!tpu.dma_semaphore, #tpu.memory_space<semaphore_mem>> -> memref<1x!tpu.dma_semaphore, #tpu.memory_space<semaphore_mem>>
      %212 = tpu.memref_squeeze %211 : memref<1x!tpu.dma_semaphore, #tpu.memory_space<semaphore_mem>> -> memref<!tpu.dma_semaphore, #tpu.memory_space<semaphore_mem>>
      tpu.enqueue_dma source(%208 : memref<48x128xf32, #tpu.memory_space<any>>) target(%210 : memref<48x128xf32, #tpu.memory_space<vmem>>) target_semaphore(%212 : memref<!tpu.dma_semaphore, #tpu.memory_space<semaphore_mem>>)
    } else {
    }
    %c0_i32_8 = arith.constant 0 : i32
    %21 = tpu.memref_slice %arg2[%13, %c0_i32_8] : memref<96x128xf32, #tpu.memory_space<any>> -> memref<48x128xf32, #tpu.memory_space<any>>
    %c0_i32_9 = arith.constant 0 : i32
    %c0_i32_10 = arith.constant 0 : i32
    %22 = tpu.memref_slice %arg17[%9, %c0_i32_9, %c0_i32_10] : memref<2x48x128xf32, #tpu.memory_space<vmem>> -> memref<1x48x128xf32, #tpu.memory_space<vmem>>
    %23 = tpu.memref_squeeze %22 : memref<1x48x128xf32, #tpu.memory_space<vmem>> -> memref<48x128xf32, #tpu.memory_space<vmem>>
    %24 = tpu.memref_slice %arg19[%9] : memref<2x!tpu.dma_semaphore, #tpu.memory_space<semaphore_mem>> -> memref<1x!tpu.dma_semaphore, #tpu.memory_space<semaphore_mem>>
    %25 = tpu.memref_squeeze %24 : memref<1x!tpu.dma_semaphore, #tpu.memory_space<semaphore_mem>> -> memref<!tpu.dma_semaphore, #tpu.memory_space<semaphore_mem>>
    tpu.wait_dma2 semaphore(%25 : memref<!tpu.dma_semaphore, #tpu.memory_space<semaphore_mem>>) src(%21 : memref<48x128xf32, #tpu.memory_space<any>>) dst(%23 : memref<48x128xf32, #tpu.memory_space<vmem>>)
    %26 = arith.index_cast %9 : i32 to index
    %c0 = arith.constant 0 : index
    %c0_11 = arith.constant 0 : index
    %27 = vector.load %arg17[%26, %c0, %c0_11] : memref<2x48x128xf32, #tpu.memory_space<vmem>>, vector<1x48x128xf32>
    %28 = vector.shape_cast %27 : vector<1x48x128xf32> to vector<48x128xf32>
    %29 = vector.extract_strided_slice %28 {offsets = [0, 4], sizes = [48, 1], strides = [1, 1]} : vector<48x128xf32> to vector<48x1xf32>
    %30 = vector.shape_cast %29 : vector<48x1xf32> to vector<48x1xf32>
    %31 = vector.broadcast %30 : vector<48x1xf32> to vector<48x32xf32>
    %c0_12 = arith.constant 0 : index
    %c0_13 = arith.constant 0 : index
    %32 = vector.load %arg4[%c0_12, %c0_13] : memref<128x32xf32, #tpu.memory_space<vmem>>, vector<128x32xf32>
    %cst = arith.constant dense<0.000000e+00> : vector<48x32xf32>
    %33 = tpu.matmul %28, %32, %cst {dimension_numbers = #tpu.dot_dimension_numbers<[1], [0], [0], [1], [0, 0, 1, 1], [], []>} : vector<48x128xf32>, vector<128x32xf32>, vector<48x32xf32> -> vector<48x32xf32>
    %c0_14 = arith.constant 0 : index
    %c0_15 = arith.constant 0 : index
    %34 = vector.load %arg5[%c0_14, %c0_15] : memref<1x32xf32, #tpu.memory_space<vmem>>, vector<1x32xf32>
    %35 = vector.broadcast %34 : vector<1x32xf32> to vector<48x32xf32>
    %36 = arith.addf %33, %35 : vector<48x32xf32>
    %37 = arith.mulf %36, %31 : vector<48x32xf32>
    %cst_16 = arith.constant 0.000000e+00 : f32
    %38 = vector.broadcast %cst_16 : f32 to vector<8x32xf32>
    %c0_17 = arith.constant 0 : index
    %c0_18 = arith.constant 0 : index
    %39 = vector.load %arg18[%c0_17, %c0_18] : memref<64x32xf32, #tpu.memory_space<vmem>>, vector<8x32xf32>
    tpu.vector_store %arg18[%c0_17, %c0_18], %38 {strides = array<i32>} : memref<64x32xf32, #tpu.memory_space<vmem>>, vector<8x32xf32>,
    %c56 = arith.constant 56 : index
    %c0_19 = arith.constant 0 : index
    %40 = vector.load %arg18[%c56, %c0_19] : memref<64x32xf32, #tpu.memory_space<vmem>>, vector<8x32xf32>
    tpu.vector_store %arg18[%c56, %c0_19], %38 {strides = array<i32>} : memref<64x32xf32, #tpu.memory_space<vmem>>, vector<8x32xf32>,
    %c8 = arith.constant 8 : index
    %c0_20 = arith.constant 0 : index
    %41 = vector.load %arg18[%c8, %c0_20] : memref<64x32xf32, #tpu.memory_space<vmem>>, vector<48x32xf32>
    tpu.vector_store %arg18[%c8, %c0_20], %37 {strides = array<i32>} : memref<64x32xf32, #tpu.memory_space<vmem>>, vector<48x32xf32>,
    %cst_21 = arith.constant 0.000000e+00 : f32
    %42 = vector.broadcast %cst_21 : f32 to vector<48x32xf32>
    %c6 = arith.constant 6 : index
    %c0_22 = arith.constant 0 : index
    %43 = vector.load %arg18[%c6, %c0_22] : memref<64x32xf32, #tpu.memory_space<vmem>>, vector<48x32xf32>
    %c7 = arith.constant 7 : index
    %c0_23 = arith.constant 0 : index
    %44 = vector.load %arg18[%c7, %c0_23] : memref<64x32xf32, #tpu.memory_space<vmem>>, vector<48x32xf32>
    %c8_24 = arith.constant 8 : index
    %c0_25 = arith.constant 0 : index
    %45 = vector.load %arg18[%c8_24, %c0_25] : memref<64x32xf32, #tpu.memory_space<vmem>>, vector<48x32xf32>
    %c9 = arith.constant 9 : index
    %c0_26 = arith.constant 0 : index
    %46 = vector.load %arg18[%c9, %c0_26] : memref<64x32xf32, #tpu.memory_space<vmem>>, vector<48x32xf32>
    %c10 = arith.constant 10 : index
    %c0_27 = arith.constant 0 : index
    %47 = vector.load %arg18[%c10, %c0_27] : memref<64x32xf32, #tpu.memory_space<vmem>>, vector<48x32xf32>
    %48 = tpu.concatenate %43, %44, %45, %46, %47 in 1 : vector<48x32xf32>, vector<48x32xf32>, vector<48x32xf32>, vector<48x32xf32>, vector<48x32xf32> -> vector<48x160xf32>
    %c0_28 = arith.constant 0 : index
    %c0_29 = arith.constant 0 : index
    %c0_30 = arith.constant 0 : index
    %49 = vector.load %arg6[%c0_28, %c0_29, %c0_30] : memref<3x160x32xf32, #tpu.memory_space<vmem>>, vector<1x160x32xf32>
    %50 = vector.shape_cast %49 : vector<1x160x32xf32> to vector<160x32xf32>
    %cst_31 = arith.constant dense<0.000000e+00> : vector<48x32xf32>
    %51 = tpu.matmul %48, %50, %cst_31 {dimension_numbers = #tpu.dot_dimension_numbers<[1], [0], [0], [1], [0, 0, 1, 1], [], []>} : vector<48x160xf32>, vector<160x32xf32>, vector<48x32xf32> -> vector<48x32xf32>
    %c0_32 = arith.constant 0 : index
    %c0_33 = arith.constant 0 : index
    %c0_34 = arith.constant 0 : index
    %52 = vector.load %arg8[%c0_32, %c0_33, %c0_34] : memref<3x1x32xf32, #tpu.memory_space<vmem>>, vector<1x1x32xf32>
    %53 = vector.shape_cast %52 : vector<1x1x32xf32> to vector<1x32xf32>
    %54 = vector.broadcast %53 : vector<1x32xf32> to vector<48x32xf32>
    %55 = arith.addf %51, %54 : vector<48x32xf32>
    %c0_35 = arith.constant 0 : index
    %c0_36 = arith.constant 0 : index
    %c0_37 = arith.constant 0 : index
    %56 = vector.load %arg7[%c0_35, %c0_36, %c0_37] : memref<3x160x32xf32, #tpu.memory_space<vmem>>, vector<1x160x32xf32>
    %57 = vector.shape_cast %56 : vector<1x160x32xf32> to vector<160x32xf32>
    %cst_38 = arith.constant dense<0.000000e+00> : vector<48x32xf32>
    %58 = tpu.matmul %48, %57, %cst_38 {dimension_numbers = #tpu.dot_dimension_numbers<[1], [0], [0], [1], [0, 0, 1, 1], [], []>} : vector<48x160xf32>, vector<160x32xf32>, vector<48x32xf32> -> vector<48x32xf32>
    %c0_39 = arith.constant 0 : index
    %c0_40 = arith.constant 0 : index
    %c0_41 = arith.constant 0 : index
    %59 = vector.load %arg9[%c0_39, %c0_40, %c0_41] : memref<3x1x32xf32, #tpu.memory_space<vmem>>, vector<1x1x32xf32>
    %60 = vector.shape_cast %59 : vector<1x1x32xf32> to vector<1x32xf32>
    %61 = vector.broadcast %60 : vector<1x32xf32> to vector<48x32xf32>
    %62 = arith.addf %58, %61 : vector<48x32xf32>
    %63 = math.tanh %55 : vector<48x32xf32>
    %64 = arith.negf %62 : vector<48x32xf32>
    %65 = math.exp %64 : vector<48x32xf32>
    %cst_42 = arith.constant 1.000000e+00 : f32
    %66 = vector.broadcast %cst_42 : f32 to vector<48x32xf32>
    %67 = arith.addf %66, %65 : vector<48x32xf32>
    %68 = arith.divf %66, %67 : vector<48x32xf32>
    %69 = arith.mulf %63, %68 : vector<48x32xf32>
    %c0_43 = arith.constant 0 : index
    %c0_44 = arith.constant 0 : index
    %c0_45 = arith.constant 0 : index
    %70 = vector.load %arg10[%c0_43, %c0_44, %c0_45] : memref<3x32x32xf32, #tpu.memory_space<vmem>>, vector<1x32x32xf32>
    %71 = vector.shape_cast %70 : vector<1x32x32xf32> to vector<32x32xf32>
    %cst_46 = arith.constant dense<0.000000e+00> : vector<48x32xf32>
    %72 = tpu.matmul %69, %71, %cst_46 {dimension_numbers = #tpu.dot_dimension_numbers<[1], [0], [0], [1], [0, 0, 1, 1], [], []>} : vector<48x32xf32>, vector<32x32xf32>, vector<48x32xf32> -> vector<48x32xf32>
    %c0_47 = arith.constant 0 : index
    %c0_48 = arith.constant 0 : index
    %c0_49 = arith.constant 0 : index
    %73 = vector.load %arg12[%c0_47, %c0_48, %c0_49] : memref<3x1x32xf32, #tpu.memory_space<vmem>>, vector<1x1x32xf32>
    %74 = vector.shape_cast %73 : vector<1x1x32xf32> to vector<1x32xf32>
    %75 = vector.broadcast %74 : vector<1x32xf32> to vector<48x32xf32>
    %76 = arith.addf %72, %75 : vector<48x32xf32>
    %77 = arith.addf %37, %76 : vector<48x32xf32>
    %78 = arith.mulf %77, %31 : vector<48x32xf32>
    %c8_50 = arith.constant 8 : index
    %c0_51 = arith.constant 0 : index
    %79 = vector.load %arg18[%c8_50, %c0_51] : memref<64x32xf32, #tpu.memory_space<vmem>>, vector<48x32xf32>
    tpu.vector_store %arg18[%c8_50, %c0_51], %78 {strides = array<i32>} : memref<64x32xf32, #tpu.memory_space<vmem>>, vector<48x32xf32>,
    %c0_52 = arith.constant 0 : index
    %c0_53 = arith.constant 0 : index
    %c0_54 = arith.constant 0 : index
    %80 = vector.load %arg11[%c0_52, %c0_53, %c0_54] : memref<3x32x32xf32, #tpu.memory_space<vmem>>, vector<1x32x32xf32>
    %81 = vector.shape_cast %80 : vector<1x32x32xf32> to vector<32x32xf32>
    %cst_55 = arith.constant dense<0.000000e+00> : vector<48x32xf32>
    %82 = tpu.matmul %69, %81, %cst_55 {dimension_numbers = #tpu.dot_dimension_numbers<[1], [0], [0], [1], [0, 0, 1, 1], [], []>} : vector<48x32xf32>, vector<32x32xf32>, vector<48x32xf32> -> vector<48x32xf32>
    %c0_56 = arith.constant 0 : index
    %c0_57 = arith.constant 0 : index
    %c0_58 = arith.constant 0 : index
    %83 = vector.load %arg13[%c0_56, %c0_57, %c0_58] : memref<3x1x32xf32, #tpu.memory_space<vmem>>, vector<1x1x32xf32>
    %84 = vector.shape_cast %83 : vector<1x1x32xf32> to vector<1x32xf32>
    %85 = vector.broadcast %84 : vector<1x32xf32> to vector<48x32xf32>
    %86 = arith.addf %82, %85 : vector<48x32xf32>
    %87 = arith.addf %42, %86 : vector<48x32xf32>
    %c4 = arith.constant 4 : index
    %c0_59 = arith.constant 0 : index
    %88 = vector.load %arg18[%c4, %c0_59] : memref<64x32xf32, #tpu.memory_space<vmem>>, vector<48x32xf32>
    %c6_60 = arith.constant 6 : index
    %c0_61 = arith.constant 0 : index
    %89 = vector.load %arg18[%c6_60, %c0_61] : memref<64x32xf32, #tpu.memory_space<vmem>>, vector<48x32xf32>
    %c8_62 = arith.constant 8 : index
    %c0_63 = arith.constant 0 : index
    %90 = vector.load %arg18[%c8_62, %c0_63] : memref<64x32xf32, #tpu.memory_space<vmem>>, vector<48x32xf32>
    %c10_64 = arith.constant 10 : index
    %c0_65 = arith.constant 0 : index
    %91 = vector.load %arg18[%c10_64, %c0_65] : memref<64x32xf32, #tpu.memory_space<vmem>>, vector<48x32xf32>
    %c12 = arith.constant 12 : index
    %c0_66 = arith.constant 0 : index
    %92 = vector.load %arg18[%c12, %c0_66] : memref<64x32xf32, #tpu.memory_space<vmem>>, vector<48x32xf32>
    %93 = tpu.concatenate %88, %89, %90, %91, %92 in 1 : vector<48x32xf32>, vector<48x32xf32>, vector<48x32xf32>, vector<48x32xf32>, vector<48x32xf32> -> vector<48x160xf32>
    %c1 = arith.constant 1 : index
    %c0_67 = arith.constant 0 : index
    %c0_68 = arith.constant 0 : index
    %94 = vector.load %arg6[%c1, %c0_67, %c0_68] : memref<3x160x32xf32, #tpu.memory_space<vmem>>, vector<1x160x32xf32>
    %95 = vector.shape_cast %94 : vector<1x160x32xf32> to vector<160x32xf32>
    %cst_69 = arith.constant dense<0.000000e+00> : vector<48x32xf32>
    %96 = tpu.matmul %93, %95, %cst_69 {dimension_numbers = #tpu.dot_dimension_numbers<[1], [0], [0], [1], [0, 0, 1, 1], [], []>} : vector<48x160xf32>, vector<160x32xf32>, vector<48x32xf32> -> vector<48x32xf32>
    %c1_70 = arith.constant 1 : index
    %c0_71 = arith.constant 0 : index
    %c0_72 = arith.constant 0 : index
    %97 = vector.load %arg8[%c1_70, %c0_71, %c0_72] : memref<3x1x32xf32, #tpu.memory_space<vmem>>, vector<1x1x32xf32>
    %98 = vector.shape_cast %97 : vector<1x1x32xf32> to vector<1x32xf32>
    %99 = vector.broadcast %98 : vector<1x32xf32> to vector<48x32xf32>
    %100 = arith.addf %96, %99 : vector<48x32xf32>
    %c1_73 = arith.constant 1 : index
    %c0_74 = arith.constant 0 : index
    %c0_75 = arith.constant 0 : index
    %101 = vector.load %arg7[%c1_73, %c0_74, %c0_75] : memref<3x160x32xf32, #tpu.memory_space<vmem>>, vector<1x160x32xf32>
    %102 = vector.shape_cast %101 : vector<1x160x32xf32> to vector<160x32xf32>
    %cst_76 = arith.constant dense<0.000000e+00> : vector<48x32xf32>
    %103 = tpu.matmul %93, %102, %cst_76 {dimension_numbers = #tpu.dot_dimension_numbers<[1], [0], [0], [1], [0, 0, 1, 1], [], []>} : vector<48x160xf32>, vector<160x32xf32>, vector<48x32xf32> -> vector<48x32xf32>
    %c1_77 = arith.constant 1 : index
    %c0_78 = arith.constant 0 : index
    %c0_79 = arith.constant 0 : index
    %104 = vector.load %arg9[%c1_77, %c0_78, %c0_79] : memref<3x1x32xf32, #tpu.memory_space<vmem>>, vector<1x1x32xf32>
    %105 = vector.shape_cast %104 : vector<1x1x32xf32> to vector<1x32xf32>
    %106 = vector.broadcast %105 : vector<1x32xf32> to vector<48x32xf32>
    %107 = arith.addf %103, %106 : vector<48x32xf32>
    %108 = math.tanh %100 : vector<48x32xf32>
    %109 = arith.negf %107 : vector<48x32xf32>
    %110 = math.exp %109 : vector<48x32xf32>
    %cst_80 = arith.constant 1.000000e+00 : f32
    %111 = vector.broadcast %cst_80 : f32 to vector<48x32xf32>
    %112 = arith.addf %111, %110 : vector<48x32xf32>
    %113 = arith.divf %111, %112 : vector<48x32xf32>
    %114 = arith.mulf %108, %113 : vector<48x32xf32>
    %c1_81 = arith.constant 1 : index
    %c0_82 = arith.constant 0 : index
    %c0_83 = arith.constant 0 : index
    %115 = vector.load %arg10[%c1_81, %c0_82, %c0_83] : memref<3x32x32xf32, #tpu.memory_space<vmem>>, vector<1x32x32xf32>
    %116 = vector.shape_cast %115 : vector<1x32x32xf32> to vector<32x32xf32>
    %cst_84 = arith.constant dense<0.000000e+00> : vector<48x32xf32>
    %117 = tpu.matmul %114, %116, %cst_84 {dimension_numbers = #tpu.dot_dimension_numbers<[1], [0], [0], [1], [0, 0, 1, 1], [], []>} : vector<48x32xf32>, vector<32x32xf32>, vector<48x32xf32> -> vector<48x32xf32>
    %c1_85 = arith.constant 1 : index
    %c0_86 = arith.constant 0 : index
    %c0_87 = arith.constant 0 : index
    %118 = vector.load %arg12[%c1_85, %c0_86, %c0_87] : memref<3x1x32xf32, #tpu.memory_space<vmem>>, vector<1x1x32xf32>
    %119 = vector.shape_cast %118 : vector<1x1x32xf32> to vector<1x32xf32>
    %120 = vector.broadcast %119 : vector<1x32xf32> to vector<48x32xf32>
    %121 = arith.addf %117, %120 : vector<48x32xf32>
    %122 = arith.addf %78, %121 : vector<48x32xf32>
    %123 = arith.mulf %122, %31 : vector<48x32xf32>
    %c8_88 = arith.constant 8 : index
    %c0_89 = arith.constant 0 : index
    %124 = vector.load %arg18[%c8_88, %c0_89] : memref<64x32xf32, #tpu.memory_space<vmem>>, vector<48x32xf32>
    tpu.vector_store %arg18[%c8_88, %c0_89], %123 {strides = array<i32>} : memref<64x32xf32, #tpu.memory_space<vmem>>, vector<48x32xf32>,
    %c1_90 = arith.constant 1 : index
    %c0_91 = arith.constant 0 : index
    %c0_92 = arith.constant 0 : index
    %125 = vector.load %arg11[%c1_90, %c0_91, %c0_92] : memref<3x32x32xf32, #tpu.memory_space<vmem>>, vector<1x32x32xf32>
    %126 = vector.shape_cast %125 : vector<1x32x32xf32> to vector<32x32xf32>
    %cst_93 = arith.constant dense<0.000000e+00> : vector<48x32xf32>
    %127 = tpu.matmul %114, %126, %cst_93 {dimension_numbers = #tpu.dot_dimension_numbers<[1], [0], [0], [1], [0, 0, 1, 1], [], []>} : vector<48x32xf32>, vector<32x32xf32>, vector<48x32xf32> -> vector<48x32xf32>
    %c1_94 = arith.constant 1 : index
    %c0_95 = arith.constant 0 : index
    %c0_96 = arith.constant 0 : index
    %128 = vector.load %arg13[%c1_94, %c0_95, %c0_96] : memref<3x1x32xf32, #tpu.memory_space<vmem>>, vector<1x1x32xf32>
    %129 = vector.shape_cast %128 : vector<1x1x32xf32> to vector<1x32xf32>
    %130 = vector.broadcast %129 : vector<1x32xf32> to vector<48x32xf32>
    %131 = arith.addf %127, %130 : vector<48x32xf32>
    %132 = arith.addf %87, %131 : vector<48x32xf32>
    %c0_97 = arith.constant 0 : index
    %c0_98 = arith.constant 0 : index
    %133 = vector.load %arg18[%c0_97, %c0_98] : memref<64x32xf32, #tpu.memory_space<vmem>>, vector<48x32xf32>
    %c4_99 = arith.constant 4 : index
    %c0_100 = arith.constant 0 : index
    %134 = vector.load %arg18[%c4_99, %c0_100] : memref<64x32xf32, #tpu.memory_space<vmem>>, vector<48x32xf32>
    %c8_101 = arith.constant 8 : index
    %c0_102 = arith.constant 0 : index
    %135 = vector.load %arg18[%c8_101, %c0_102] : memref<64x32xf32, #tpu.memory_space<vmem>>, vector<48x32xf32>
    %c12_103 = arith.constant 12 : index
    %c0_104 = arith.constant 0 : index
    %136 = vector.load %arg18[%c12_103, %c0_104] : memref<64x32xf32, #tpu.memory_space<vmem>>, vector<48x32xf32>
    %c16 = arith.constant 16 : index
    %c0_105 = arith.constant 0 : index
    %137 = vector.load %arg18[%c16, %c0_105] : memref<64x32xf32, #tpu.memory_space<vmem>>, vector<48x32xf32>
    %138 = tpu.concatenate %133, %134, %135, %136, %137 in 1 : vector<48x32xf32>, vector<48x32xf32>, vector<48x32xf32>, vector<48x32xf32>, vector<48x32xf32> -> vector<48x160xf32>
    %c2 = arith.constant 2 : index
    %c0_106 = arith.constant 0 : index
    %c0_107 = arith.constant 0 : index
    %139 = vector.load %arg6[%c2, %c0_106, %c0_107] : memref<3x160x32xf32, #tpu.memory_space<vmem>>, vector<1x160x32xf32>
    %140 = vector.shape_cast %139 : vector<1x160x32xf32> to vector<160x32xf32>
    %cst_108 = arith.constant dense<0.000000e+00> : vector<48x32xf32>
    %141 = tpu.matmul %138, %140, %cst_108 {dimension_numbers = #tpu.dot_dimension_numbers<[1], [0], [0], [1], [0, 0, 1, 1], [], []>} : vector<48x160xf32>, vector<160x32xf32>, vector<48x32xf32> -> vector<48x32xf32>
    %c2_109 = arith.constant 2 : index
    %c0_110 = arith.constant 0 : index
    %c0_111 = arith.constant 0 : index
    %142 = vector.load %arg8[%c2_109, %c0_110, %c0_111] : memref<3x1x32xf32, #tpu.memory_space<vmem>>, vector<1x1x32xf32>
    %143 = vector.shape_cast %142 : vector<1x1x32xf32> to vector<1x32xf32>
    %144 = vector.broadcast %143 : vector<1x32xf32> to vector<48x32xf32>
    %145 = arith.addf %141, %144 : vector<48x32xf32>
    %c2_112 = arith.constant 2 : index
    %c0_113 = arith.constant 0 : index
    %c0_114 = arith.constant 0 : index
    %146 = vector.load %arg7[%c2_112, %c0_113, %c0_114] : memref<3x160x32xf32, #tpu.memory_space<vmem>>, vector<1x160x32xf32>
    %147 = vector.shape_cast %146 : vector<1x160x32xf32> to vector<160x32xf32>
    %cst_115 = arith.constant dense<0.000000e+00> : vector<48x32xf32>
    %148 = tpu.matmul %138, %147, %cst_115 {dimension_numbers = #tpu.dot_dimension_numbers<[1], [0], [0], [1], [0, 0, 1, 1], [], []>} : vector<48x160xf32>, vector<160x32xf32>, vector<48x32xf32> -> vector<48x32xf32>
    %c2_116 = arith.constant 2 : index
    %c0_117 = arith.constant 0 : index
    %c0_118 = arith.constant 0 : index
    %149 = vector.load %arg9[%c2_116, %c0_117, %c0_118] : memref<3x1x32xf32, #tpu.memory_space<vmem>>, vector<1x1x32xf32>
    %150 = vector.shape_cast %149 : vector<1x1x32xf32> to vector<1x32xf32>
    %151 = vector.broadcast %150 : vector<1x32xf32> to vector<48x32xf32>
    %152 = arith.addf %148, %151 : vector<48x32xf32>
    %153 = math.tanh %145 : vector<48x32xf32>
    %154 = arith.negf %152 : vector<48x32xf32>
    %155 = math.exp %154 : vector<48x32xf32>
    %cst_119 = arith.constant 1.000000e+00 : f32
    %156 = vector.broadcast %cst_119 : f32 to vector<48x32xf32>
    %157 = arith.addf %156, %155 : vector<48x32xf32>
    %158 = arith.divf %156, %157 : vector<48x32xf32>
    %159 = arith.mulf %153, %158 : vector<48x32xf32>
    %c2_120 = arith.constant 2 : index
    %c0_121 = arith.constant 0 : index
    %c0_122 = arith.constant 0 : index
    %160 = vector.load %arg11[%c2_120, %c0_121, %c0_122] : memref<3x32x32xf32, #tpu.memory_space<vmem>>, vector<1x32x32xf32>
    %161 = vector.shape_cast %160 : vector<1x32x32xf32> to vector<32x32xf32>
    %cst_123 = arith.constant dense<0.000000e+00> : vector<48x32xf32>
    %162 = tpu.matmul %159, %161, %cst_123 {dimension_numbers = #tpu.dot_dimension_numbers<[1], [0], [0], [1], [0, 0, 1, 1], [], []>} : vector<48x32xf32>, vector<32x32xf32>, vector<48x32xf32> -> vector<48x32xf32>
    %c2_124 = arith.constant 2 : index
    %c0_125 = arith.constant 0 : index
    %c0_126 = arith.constant 0 : index
    %163 = vector.load %arg13[%c2_124, %c0_125, %c0_126] : memref<3x1x32xf32, #tpu.memory_space<vmem>>, vector<1x1x32xf32>
    %164 = vector.shape_cast %163 : vector<1x1x32xf32> to vector<1x32xf32>
    %165 = vector.broadcast %164 : vector<1x32xf32> to vector<48x32xf32>
    %166 = arith.addf %162, %165 : vector<48x32xf32>
    %167 = arith.addf %132, %166 : vector<48x32xf32>
    %168 = arith.mulf %167, %31 : vector<48x32xf32>
    %169 = vector.extract_strided_slice %168 {offsets = [16, 0], sizes = [16, 32], strides = [1, 1]} : vector<48x32xf32> to vector<16x32xf32>
    %170 = vector.extract_strided_slice %29 {offsets = [16, 0], sizes = [16, 1], strides = [1, 1]} : vector<48x1xf32> to vector<16x1xf32>
    %171 = vector.shape_cast %170 : vector<16x1xf32> to vector<16x1xf32>
    %172 = vector.broadcast %171 : vector<16x1xf32> to vector<16x128xf32>
    %c0_127 = arith.constant 0 : index
    %c0_128 = arith.constant 0 : index
    %173 = vector.load %arg14[%c0_127, %c0_128] : memref<32x256xf32, #tpu.memory_space<vmem>>, vector<32x256xf32>
    %cst_129 = arith.constant dense<0.000000e+00> : vector<16x256xf32>
    %174 = tpu.matmul %169, %173, %cst_129 {dimension_numbers = #tpu.dot_dimension_numbers<[1], [0], [0], [1], [0, 0, 1, 1], [], []>} : vector<16x32xf32>, vector<32x256xf32>, vector<16x256xf32> -> vector<16x256xf32>
    %c0_130 = arith.constant 0 : index
    %c0_131 = arith.constant 0 : index
    %175 = vector.load %arg15[%c0_130, %c0_131] : memref<1x256xf32, #tpu.memory_space<vmem>>, vector<1x256xf32>
    %176 = vector.broadcast %175 : vector<1x256xf32> to vector<16x256xf32>
    %177 = arith.addf %174, %176 : vector<16x256xf32>
    %178 = vector.extract_strided_slice %177 {offsets = [0, 0], sizes = [16, 128], strides = [1, 1]} : vector<16x256xf32> to vector<16x128xf32>
    %179 = arith.mulf %178, %172 : vector<16x128xf32>
    %180 = vector.extract_strided_slice %177 {offsets = [0, 128], sizes = [16, 128], strides = [1, 1]} : vector<16x256xf32> to vector<16x128xf32>
    %181 = arith.mulf %180, %172 : vector<16x128xf32>
    %c0_132 = arith.constant 0 : index
    %c0_133 = arith.constant 0 : index
    %c0_134 = arith.constant 0 : index
    %182 = vector.load %arg3[%c0_132, %c0_133, %c0_134] : memref<1x16x384xf32, #tpu.memory_space<vmem>>, vector<1x16x128xf32>
    %183 = vector.shape_cast %182 : vector<1x16x128xf32> to vector<16x128xf32>
    %c0_135 = arith.constant 0 : index
    %c0_136 = arith.constant 0 : index
    %c128 = arith.constant 128 : index
    %184 = vector.load %arg3[%c0_135, %c0_136, %c128] : memref<1x16x384xf32, #tpu.memory_space<vmem>>, vector<1x16x128xf32>
    %185 = vector.shape_cast %184 : vector<1x16x128xf32> to vector<16x128xf32>
    %c0_137 = arith.constant 0 : index
    %c0_138 = arith.constant 0 : index
    %c256 = arith.constant 256 : index
    %186 = vector.load %arg3[%c0_137, %c0_138, %c256] : memref<1x16x384xf32, #tpu.memory_space<vmem>>, vector<1x16x128xf32>
    %187 = vector.shape_cast %186 : vector<1x16x128xf32> to vector<16x128xf32>
    %188 = math.exp %181 : vector<16x128xf32>
    %189 = arith.mulf %188, %172 : vector<16x128xf32>
    %190 = arith.mulf %183, %189 : vector<16x128xf32>
    %191 = arith.addf %179, %190 : vector<16x128xf32>
    %c0_139 = arith.constant 0 : index
    %c0_140 = arith.constant 0 : index
    %c0_141 = arith.constant 0 : index
    %192 = vector.load %arg16[%c0_139, %c0_140, %c0_141] : memref<1x16x384xf32, #tpu.memory_space<vmem>>, vector<1x16x128xf32>
    %193 = vector.shape_cast %192 : vector<1x16x128xf32> to vector<16x128xf32>
    %194 = vector.shape_cast %191 : vector<16x128xf32> to vector<1x16x128xf32>
    tpu.vector_store %arg16[%c0_139, %c0_140, %c0_141], %194 {strides = array<i32>} : memref<1x16x384xf32, #tpu.memory_space<vmem>>, vector<1x16x128xf32>,
    %195 = arith.mulf %185, %189 : vector<16x128xf32>
    %196 = arith.addf %179, %195 : vector<16x128xf32>
    %c0_142 = arith.constant 0 : index
    %c0_143 = arith.constant 0 : index
    %c128_144 = arith.constant 128 : index
    %197 = vector.load %arg16[%c0_142, %c0_143, %c128_144] : memref<1x16x384xf32, #tpu.memory_space<vmem>>, vector<1x16x128xf32>
    %198 = vector.shape_cast %197 : vector<1x16x128xf32> to vector<16x128xf32>
    %199 = vector.shape_cast %196 : vector<16x128xf32> to vector<1x16x128xf32>
    tpu.vector_store %arg16[%c0_142, %c0_143, %c128_144], %199 {strides = array<i32>} : memref<1x16x384xf32, #tpu.memory_space<vmem>>, vector<1x16x128xf32>,
    %200 = arith.addf %187, %181 : vector<16x128xf32>
    %c0_145 = arith.constant 0 : index
    %c0_146 = arith.constant 0 : index
    %c256_147 = arith.constant 256 : index
    %201 = vector.load %arg16[%c0_145, %c0_146, %c256_147] : memref<1x16x384xf32, #tpu.memory_space<vmem>>, vector<1x16x128xf32>
    %202 = vector.shape_cast %201 : vector<1x16x128xf32> to vector<16x128xf32>
    %203 = vector.shape_cast %200 : vector<16x128xf32> to vector<1x16x128xf32>
    tpu.vector_store %arg16[%c0_145, %c0_146, %c256_147], %203 {strides = array<i32>} : memref<1x16x384xf32, #tpu.memory_space<vmem>>, vector<1x16x128xf32>,
    return
  }
  func.func @transform_1(%arg0: i32, %arg1: i32) -> (i32, i32, i32) {
    %c0_i32 = arith.constant 0 : i32
    %c0_i32_0 = arith.constant 0 : i32
    return %arg0, %arg1, %c0_i32 : i32, i32, i32
  }
  func.func @transform_2(%arg0: i32, %arg1: i32) -> (i32, i32) {
    %c0_i32 = arith.constant 0 : i32
    %c0_i32_0 = arith.constant 0 : i32
    %c0_i32_1 = arith.constant 0 : i32
    return %c0_i32, %c0_i32_0 : i32, i32
  }
  func.func @transform_3(%arg0: i32, %arg1: i32) -> (i32, i32) {
    %c0_i32 = arith.constant 0 : i32
    %c0_i32_0 = arith.constant 0 : i32
    %c0_i32_1 = arith.constant 0 : i32
    return %c0_i32, %c0_i32_0 : i32, i32
  }
  func.func @transform_4(%arg0: i32, %arg1: i32) -> (i32, i32, i32) {
    %c0_i32 = arith.constant 0 : i32
    %c0_i32_0 = arith.constant 0 : i32
    %c0_i32_1 = arith.constant 0 : i32
    %c0_i32_2 = arith.constant 0 : i32
    return %c0_i32, %c0_i32_0, %c0_i32_1 : i32, i32, i32
  }
  func.func @transform_5(%arg0: i32, %arg1: i32) -> (i32, i32, i32) {
    %c0_i32 = arith.constant 0 : i32
    %c0_i32_0 = arith.constant 0 : i32
    %c0_i32_1 = arith.constant 0 : i32
    %c0_i32_2 = arith.constant 0 : i32
    return %c0_i32, %c0_i32_0, %c0_i32_1 : i32, i32, i32
  }
  func.func @transform_6(%arg0: i32, %arg1: i32) -> (i32, i32, i32) {
    %c0_i32 = arith.constant 0 : i32
    %c0_i32_0 = arith.constant 0 : i32
    %c0_i32_1 = arith.constant 0 : i32
    %c0_i32_2 = arith.constant 0 : i32
    return %c0_i32, %c0_i32_0, %c0_i32_1 : i32, i32, i32
  }
  func.func @transform_7(%arg0: i32, %arg1: i32) -> (i32, i32, i32) {
    %c0_i32 = arith.constant 0 : i32
    %c0_i32_0 = arith.constant 0 : i32
    %c0_i32_1 = arith.constant 0 : i32
    %c0_i32_2 = arith.constant 0 : i32
    return %c0_i32, %c0_i32_0, %c0_i32_1 : i32, i32, i32
  }
  func.func @transform_8(%arg0: i32, %arg1: i32) -> (i32, i32, i32) {
    %c0_i32 = arith.constant 0 : i32
    %c0_i32_0 = arith.constant 0 : i32
    %c0_i32_1 = arith.constant 0 : i32
    %c0_i32_2 = arith.constant 0 : i32
    return %c0_i32, %c0_i32_0, %c0_i32_1 : i32, i32, i32
  }
  func.func @transform_9(%arg0: i32, %arg1: i32) -> (i32, i32, i32) {
    %c0_i32 = arith.constant 0 : i32
    %c0_i32_0 = arith.constant 0 : i32
    %c0_i32_1 = arith.constant 0 : i32
    %c0_i32_2 = arith.constant 0 : i32
    return %c0_i32, %c0_i32_0, %c0_i32_1 : i32, i32, i32
  }
  func.func @transform_10(%arg0: i32, %arg1: i32) -> (i32, i32, i32) {
    %c0_i32 = arith.constant 0 : i32
    %c0_i32_0 = arith.constant 0 : i32
    %c0_i32_1 = arith.constant 0 : i32
    %c0_i32_2 = arith.constant 0 : i32
    return %c0_i32, %c0_i32_0, %c0_i32_1 : i32, i32, i32
  }
  func.func @transform_11(%arg0: i32, %arg1: i32) -> (i32, i32, i32) {
    %c0_i32 = arith.constant 0 : i32
    %c0_i32_0 = arith.constant 0 : i32
    %c0_i32_1 = arith.constant 0 : i32
    %c0_i32_2 = arith.constant 0 : i32
    return %c0_i32, %c0_i32_0, %c0_i32_1 : i32, i32, i32
  }
  func.func @transform_12(%arg0: i32, %arg1: i32) -> (i32, i32) {
    %c0_i32 = arith.constant 0 : i32
    %c0_i32_0 = arith.constant 0 : i32
    %c0_i32_1 = arith.constant 0 : i32
    return %c0_i32, %c0_i32_0 : i32, i32
  }
  func.func @transform_13(%arg0: i32, %arg1: i32) -> (i32, i32) {
    %c0_i32 = arith.constant 0 : i32
    %c0_i32_0 = arith.constant 0 : i32
    %c0_i32_1 = arith.constant 0 : i32
    return %c0_i32, %c0_i32_0 : i32, i32
  }
  func.func @transform_14(%arg0: i32, %arg1: i32) -> (i32, i32, i32) {
    %c0_i32 = arith.constant 0 : i32
    %c0_i32_0 = arith.constant 0 : i32
    return %arg0, %arg1, %c0_i32 : i32, i32, i32
  }
}

</mosaic_0001>

<bundles_post_ra>
// kernel: tpu_custom_call.1
= control target key start
LH: loop header
LB: loop body
LE: loop exit
PB: predicated region body
PF: predicated region fallthrough
CT: control target
= control target key end

     0   :  { %s4292_s0 = inlined_call_operand.vmem [shape: f32[96,128], index: 0, kind: input, shape index: {}]   ;;  %s4293_s1 = inlined_call_operand.vmem [shape: f32[2,16,384], index: 1, kind: input, shape index: {}]   ;;  %s4294_s2 = inlined_call_operand.vmem [shape: f32[128,32], index: 2, kind: input, shape index: {}]   ;;  %s4295_s3 = inlined_call_operand.vmem [shape: f32[1,32], index: 3, kind: input, shape index: {}]   ;;  %s4296_s4 = inlined_call_operand.vmem [shape: f32[3,160,32], index: 4, kind: input, shape index: {}]   ;;  %s4297_s5 = inlined_call_operand.vmem [shape: f32[3,160,32], index: 5, kind: input, shape index: {}]   ;;  %s4298_s6 = inlined_call_operand.vmem [shape: f32[3,1,32], index: 6, kind: input, shape index: {}]   ;;  %s4299_s7 = inlined_call_operand.vmem [shape: f32[3,1,32], index: 7, kind: input, shape index: {}]   ;;  %s4300_s8 = inlined_call_operand.vmem [shape: f32[3,32,32], index: 8, kind: input, shape index: {}]   ;;  %s4301_s9 = inlined_call_operand.vmem [shape: f32[3,32,32], index: 9, kind: input, shape index: {}]   ;;  %s4302_s10 = inlined_call_operand.vmem [shape: f32[3,1,32], index: 10, kind: input, shape index: {}]   ;;  %s4303_s11 = inlined_call_operand.vmem [shape: f32[3,1,32], index: 11, kind: input, shape index: {}]   ;;  %s4304_s12 = inlined_call_operand.vmem [shape: f32[32,256], index: 12, kind: input, shape index: {}]   ;;  %s4305_s13 = inlined_call_operand.vmem [shape: f32[1,256], index: 13, kind: input, shape index: {}]   ;;  %s4306_s14 = inlined_call_operand.hbm [shape: f32[2,16,384], index: 14, kind: output, shape index: {}]  }
   0x1   :  { %4320 = sst [smem:[#allocation17_spill]] %s4292_s0 }
   0x2   :  { %4321 = sst [smem:[#allocation18_spill]] %s4293_s1 }
   0x3   :  { %4322 = sst [smem:[#allocation19_spill]] %s4294_s2 }
   0x4   :  { %19 = vsyncpa [#allocation6], 0 }
   0x5   :  { %21 = vsyncpa [#allocation6 + $0x1], 0  ;;  %s3146_s29 = smov 0   ;;  %s3148_s30 = smov 0  }
   0x6   :  { %s3150_s15 = smov 0   ;;  %s3152_s16 = smov 0  }
   0x7   :  { %s3154_s17 = smov 0   ;;  %s3156_s18 = smov 0  }
   0x8 LB: > { %4323 = sst [smem:[#allocation11_spill]] %s3042_s29  ;;  %s2551_s19 = sadd.s32 4294967295, %s3062_s18   ;;  %s3062_s18 = sphi %s3156_s18, %s27_s18   ;;  %s3058_s17 = sphi %s3154_s17, %s4344_s17   ;;  %s3054_s16 = sphi %s3152_s16, %s4343_s16   ;;  %s3050_s15 = sphi %s3150_s15, %s4342_s15   ;;  %s3046_s30 = sphi %s3148_s30, %s4346_s30   ;;  %s3042_s29 = sphi %s3146_s29, %s4345_s29  }
   0x9   : > { %4324 = sst [smem:[#allocation12_spill]] %s3050_s15  ;;  %s2552_s20 = sadd.s32 4294967294, %s3062_s18  }
   0xa   : > { %4325 = sst [smem:[#allocation13_spill]] %s3058_s17  ;;  %s39_s21 = sadd.s32 1, %s3058_s17 }
   0xb   : > { %s328_s22 = sadd.s32 1, %s3050_s15  ;;  %p41_p0 = scmp.ge.s32.totalorder %s39_s21, 2 }
   0xc   : > { %p338_p1 = scmp.ne.s32.totalorder %s3050_s15, %s3046_s30  ;;  %p339_p2 = scmp.eq.s32.totalorder %s2551_s19, 1 }
   0xd   : > { %p344_p3 = scmp.ne.s32.totalorder %s3046_s30, %s3042_s29  ;;  %s4348_s21 = smov (%p41_p0, %s39_s21), 0 }
   0xe   : > { %4326 = sst [smem:[#allocation14_spill]] %s4348_s21  ;;  %p3186_p4 = por %p339_p2, %p338_p1 }
   0xf   : > { %p345_p5 = scmp.eq.s32.totalorder %s2552_s20, 1  ;;  %s323_s24 = ssub.s32 %s3058_s17, %s4348_s21 }
  0x10   : > { %p2555_p6 = scmp.ge.s32.totalorder %s3062_s18, 1  ;;  %p326_p7 = scmp.eq.s32.totalorder %s323_s24, 0 }
  0x11   : > { %p3193_p8 = por %p345_p5, %p344_p3  ;;  %p413_p9 = scmp.lt.s32.totalorder %s3062_s18, 3 }
  0x12   : > { %s3199_s26 = scalar_select %p326_p7, %s3050_s15, %s328_s22  }
  0x13   : > { %s4328_s25 = scalar_select %p3193_p8, 1, 0 }
  0x14   : > { %4330 = sst [smem:[#allocation16_spill]] %s3199_s26  ;;  %p414_p10 = pnand %p2555_p6, %p413_p9 }
  0x15   : > { %4329 = sst [smem:[#allocation15_spill]] %s4328_s25  ;;  %s4311_s27 = sand.u32 (!%p414_p10), 1, %s3046_s30  }
  0x16   : > { %417 = sbr.rel (%p414_p10) target bundleno = 1690 (0x69a), region = 72  ;;  %p463_p11 = scmp.lt.s32.totalorder (!%p414_p10), %s3054_s16, 1 }
  0x17   : > { %s2765_s28 = smul.u32 (!%p414_p10), 48, %s4311_s27  ;;  %s4331_s0 = sld [smem:[#allocation17_spill]] (!%p414_p10) }
  0x18   : > { %s4313_s20 = smul.u32 (!%p414_p10), 48, %s3054_s16  ;;  %s4332_s1 = sld [smem:[#allocation18_spill]] (!%p414_p10) }
  0x19   : > { %s3217_s27 = scalar_lea.vmem (!%p414_p10), [#allocation5], %s2765_s28 }
  0x1b   : > { %s464_s19 = scalar_select %p463_p11, %s3054_s16, 1 }
  0x1d   : > { %s2766_s24 = smul.u32 48, %s464_s19  ;;  %s493_s22 = scalar_lea.vmem %s4331_s0, %s4313_s20 }
  0x1e   : > { %v504_v0 = vld [vmem:[%s493_s22] sm:$0xff]  ;;  %v506_v1 = vld [vmem:[%s493_s22 + $0x8] sm:$0xff]  ;;  %v508_v2 = vld [vmem:[%s493_s22 + $0x10] sm:$0xff] }
  0x1f   : > { %s3215_s25 = scalar_lea.vmem %s4332_s1, %s2766_s24  ;;  %v510_v3 = vld [vmem:[%s493_s22 + $0x18] sm:$0xff]  ;;  %v512_v4 = vld [vmem:[%s493_s22 + $0x20] sm:$0xff]  ;;  %v514_v5 = vld [vmem:[%s493_s22 + $0x28] sm:$0xff] }
  0x20   : > { %521 = vsyncadd [#allocation4], 768 }
  0x21   : > { %3034 = dma.done.wait [#allocation4], 768 }
  0x22   : > { %3035 = vsyncadd [#allocation4], 4294966528  ;;  %s4333_s2 = sld [smem:[#allocation19_spill]]  ;;  %v3064_v8 = vmov 4   ;;  %vm664_vm0 = vcmask 261120   ;;  %v3065_v23 = vmov 0.0  }
  0x23   : > { %2830 = vset.pattern.permute.xlu0 %v3064_v8  ;;  %2831 = vset.pattern.permute.xlu1 %v3064_v8  ;;  %665 = vst.msk [vmem:[#allocation3] sm:$0xff] %vm664_vm0, %v3065_v23  ;;  %v814_v24 = vld [vmem:[%s4296_s4 + $0x98] sm:$0xff]  ;;  %v813_v25 = vld [vmem:[%s4296_s4 + $0x90] sm:$0xff]  ;;  %v812_v26 = vld [vmem:[%s4296_s4 + $0x88] sm:$0xff]  ;;  %s4316_s20 = smov 96   ;;  %s4318_s15 = smov 64  }
  0x24   : > { %575 = vperm.xlu0 %2830, %v504_v0   ;;  %585 = vperm.xlu1 %2831, %v508_v2   ;;  %666 = vst.msk [vmem:[#allocation3 + $0x38] sm:$0xff] %vm664_vm0, %v3065_v23  ;;  %v811_v27 = vld [vmem:[%s4296_s4 + $0x80] sm:$0xff]  ;;  %s4314_s26 = smov 32   ;;  %v926_v55 = vld [vmem:[%s4297_s5 + $0x98] sm:$0xff]  ;;  %v925_v58 = vld [vmem:[%s4297_s5 + $0x90] sm:$0xff]  ;;  %vm781_vm1 = vcmask 523264  }
  0x25   : > { %2832 = vset.pattern.permute.xlu2 %v3064_v8  ;;  %884 = vmatpush.msra.mxu2 %v814_v24  ;;  %v3284_v28 = vld [vmem:[%s4295_s3] ss:$0 sm:$0xff]  ;;  %v924_v59 = vld [vmem:[%s4297_s5 + $0x88] sm:$0xff]  ;;  %v921_v23 = vld [vmem:[%s4297_s5 + $0x70] sm:$0xff]  ;;  %vm788_vm2 = vcmask 785408   ;;  %s4334_s22 = smov 64  }
  0x26   : > { %595 = vperm.xlu2 %2832, %v512_v4   ;;  %v923_v62 = vld [vmem:[%s4297_s5 + $0x80] sm:$0xff]  ;;  %v808_v24 = vld [vmem:[%s4296_s4 + $0x68] sm:$0xff]  ;;  %s4335_s19 = smov 96   ;;  %s4336_s17 = smov 32  }
  0x27   : > { %885 = vmatpush.msra.mxu2 %v813_v25  ;;  %v920_v25 = vld [vmem:[%s4297_s5 + $0x68] sm:$0xff]  ;;  %s3002_s28 = scalar_lea.hbm %s4306_s14, 96 }
  0x28   : > { %v618_v6 = vld [vmem:[%s4333_s2 + $0x78] sm:$0xff]  ;;  %v617_v7 = vld [vmem:[%s4333_s2 + $0x70] sm:$0xff]  ;;  %v616_v9 = vld [vmem:[%s4333_s2 + $0x68] sm:$0xff] }
  0x29   : > { %623 = vmatpush.msra.mxu0 %v618_v6  ;;  %v615_v10 = vld [vmem:[%s4333_s2 + $0x60] sm:$0xff]  ;;  %v614_v11 = vld [vmem:[%s4333_s2 + $0x58] sm:$0xff]  ;;  %v613_v12 = vld [vmem:[%s4333_s2 + $0x50] sm:$0xff]  ;;  %886 = vmatpush.msra.mxu2 %v812_v26 }
  0x2a   : > { %v612_v13 = vld [vmem:[%s4333_s2 + $0x48] sm:$0xff]  ;;  %v611_v14 = vld [vmem:[%s4333_s2 + $0x40] sm:$0xff]  ;;  %v610_v15 = vld [vmem:[%s4333_s2 + $0x38] sm:$0xff] }
  0x2b   : > { %624 = vmatpush.msra.mxu0 %v617_v7  ;;  %v609_v16 = vld [vmem:[%s4333_s2 + $0x30] sm:$0xff]  ;;  %v608_v17 = vld [vmem:[%s4333_s2 + $0x28] sm:$0xff]  ;;  %v607_v18 = vld [vmem:[%s4333_s2 + $0x20] sm:$0xff]  ;;  %887 = vmatpush.msra.mxu2 %v811_v27 }
  0x2c   : > { %580 = vperm.xlu0 %2830, %v506_v1   ;;  %590 = vperm.xlu1 %2831, %v510_v3   ;;  %v606_v19 = vld [vmem:[%s4333_s2 + $0x18] sm:$0xff]  ;;  %v605_v20 = vld [vmem:[%s4333_s2 + $0x10] sm:$0xff]  ;;  %v604_v21 = vld [vmem:[%s4333_s2 + $0x8] sm:$0xff] }
  0x2d   : > { %625 = vmatpush.msra.mxu0 %v616_v9  ;;  %v603_v22 = vld [vmem:[%s4333_s2] sm:$0xff]  ;;  %978 = vmatpush.msrb.mxu2 %v926_v55  ;;  %v909_v55 = vld [vmem:[%s4297_s5 + $0x10] sm:$0xff] }
  0x2e   : > { %600 = vperm.xlu2 %2832, %v514_v5   ;;  %v807_v26 = vld [vmem:[%s4296_s4 + $0x60] sm:$0xff] }
  0x2f   : > { %626 = vmatpush.msra.mxu0 %v615_v10  ;;  %979 = vmatpush.msrb.mxu2 %v925_v58  ;;  %v919_v27 = vld [vmem:[%s4297_s5 + $0x60] sm:$0xff]  ;;  %v908_v58 = vld [vmem:[%s4297_s5 + $0x8] sm:$0xff] }
  0x31   : > { %627 = vmatpush.msra.mxu0 %v614_v11  ;;  %980 = vmatpush.msrb.mxu2 %v924_v59  ;;  %v795_v59 = vld [vmem:[%s4296_s4] sm:$0xff] }
  0x33   : > { %628 = vmatpush.msra.mxu0 %v613_v12  ;;  %981 = vmatpush.msrb.mxu2 %v923_v62 }
  0x35   : > { %629 = vmatpush.msra.mxu0 %v612_v13 }
  0x37   : > { %630 = vmatpush.msra.mxu0 %v611_v14 }
  0x39   : > { %631 = vmatpush.msra.mxu0 %v610_v15 }
  0x3b   : > { %632 = vmatpush.msra.mxu0 %v609_v16 }
  0x3d   : > { %633 = vmatpush.msra.mxu0 %v608_v17 }
  0x3f   : > { %634 = vmatpush.msra.mxu0 %v607_v18 }
  0x41   : > { %635 = vmatpush.msra.mxu0 %v606_v19 }
  0x43   : > { %636 = vmatpush.msra.mxu0 %v605_v20  ;;  %v810_v20 = vld [vmem:[%s4296_s4 + $0x78] sm:$0xff] }
  0x44   : > { %837 = vmatpush.msra.mxu1 %v810_v20 }
  0x45   : > { %637 = vmatpush.msra.mxu0 %v604_v21  ;;  %v922_v21 = vld [vmem:[%s4297_s5 + $0x78] sm:$0xff] }
  0x46   : > { %931 = vmatpush.msra.mxu3 %v922_v21 }
  0x47   : > { %638 = vmatpush.msra.mxu0 %v603_v22  ;;  %v809_v22 = vld [vmem:[%s4296_s4 + $0x70] sm:$0xff] }
  0x48   : > { %639 = vmatmul.f32.vlgmr.msra.gmra.mxu0 %v504_v0  ;;  %838 = vmatpush.msra.mxu1 %v809_v22 }
  0x49   : > { %932 = vmatpush.msra.mxu3 %v921_v23 }
  0x4a   : > { %839 = vmatpush.msra.mxu1 %v808_v24 }
  0x4b   : > { %933 = vmatpush.msra.mxu3 %v920_v25 }
  0x4c   : > { %840 = vmatpush.msra.mxu1 %v807_v26 }
  0x4d   : > { %934 = vmatpush.msra.mxu3 %v919_v27 }
  0x50   : > { %642 = vmatmul.f32.gmra.mxu0 %v506_v1 }
  0x58   : > { %645 = vmatmul.f32.gmra.mxu0 %v508_v2 }
  0x60   : > { %648 = vmatmul.f32.gmra.mxu0 %v510_v3 }
  0x68   : > { %651 = vmatmul.f32.gmra.mxu0 %v512_v4 }
  0x70   : > { %654 = vmatmul.f32.gmra.mxu0 %v514_v5 }
  0x80   : > { %v3330_v56 = vpop.permute.xlu2 %595 }
  0x88   : > { %v3351_v6 = vpop.permute.xlu2 %600 }
  0x96   : > { %v3286_v29 = vpop.permute.xlu0 %575  ;;  %v3302_v37 = vpop.permute.xlu1 %585 }
  0x9e   : > { %v3295_v35 = vpop.permute.xlu0 %580  ;;  %v3318_v51 = vpop.permute.xlu1 %590 }
  0xc5   : > { %v640_v30 = vpop.f32.mrf.mxu0 }
  0xc6   : > { %v641_v31 = vadd.f32 %v3284_v28, %v640_v30  ;;  %v918_v30 = vld [vmem:[%s4297_s5 + $0x58] sm:$0xff] }
  0xc7   : > { %935 = vmatpush.msra.mxu3 %v918_v30 }
  0xc8   : > { %v3290_v32 = vmul.f32 %v641_v31, %v3286_v29  ;;  %v805_v31 = vld [vmem:[%s4296_s4 + $0x50] sm:$0xff] }
  0xca   : > { %667 = vst.msk [vmem:[#allocation3 + $0x8] sm:$0xff] %vm664_vm0, %v3290_v32 }
  0xcd   : > { %v643_v33 = vpop.f32.mrf.mxu0 }
  0xce   : > { %v644_v34 = vadd.f32 %v3284_v28, %v643_v33  ;;  %v917_v33 = vld [vmem:[%s4297_s5 + $0x50] sm:$0xff] }
  0xcf   : > { %936 = vmatpush.msra.mxu3 %v917_v33 }
  0xd0   : > { %v3298_v36 = vmul.f32 %v644_v34, %v3295_v35  ;;  %v804_v34 = vld [vmem:[%s4296_s4 + $0x48] sm:$0xff] }
  0xd1   : > { %v685_v41 = vld [vmem:[#allocation3 + $0x8] sm:$0xff] }
  0xd2   : > { %668 = vst.msk [vmem:[#allocation3 + $0x10] sm:$0xff] %vm664_vm0, %v3298_v36  ;;  %v679_v46 = vld [vmem:[#allocation3 + $0x7] sm:$0xff] }
  0xd5   : > { %v646_v38 = vpop.f32.mrf.mxu0 }
  0xd6   : > { %v647_v39 = vadd.f32 %v3284_v28, %v646_v38  ;;  %v916_v38 = vld [vmem:[%s4297_s5 + $0x48] sm:$0xff] }
  0xd7   : > { %937 = vmatpush.msra.mxu3 %v916_v38 }
  0xd8   : > { %v3306_v40 = vmul.f32 %v647_v39, %v3302_v37  ;;  %v803_v39 = vld [vmem:[%s4296_s4 + $0x40] sm:$0xff] }
  0xd9   : > { %v3308_v42 = vld [vmem:[#allocation3 + $0xa] sm:$0xff] }
  0xda   : > { %v691_v43 = vld [vmem:[#allocation3 + $0x9] sm:$0xff]  ;;  %669 = vst.msk [vmem:[#allocation3 + $0x18] sm:$0xff] %vm664_vm0, %v3306_v40  ;;  %2569 = vmatmul.msk.f32.vlgmr.msra.gmra.mxu2 %vm664_vm0, %v3308_v42 }
  0xdb   : > { %v686_v44 = vld [vmem:[#allocation3 + $0x10] sm:$0xff]  ;;  %757 = vrot.lane.b32.xlu2 %v691_v43, %s4316_s20  ;;  %v914_v43 = vld [vmem:[%s4297_s5 + $0x38] sm:$0xff] }
  0xdc   : > { %v2838_v45 = vpack.i.bf16 %v686_v44, %v685_v41  ;;  %v680_v47 = vld [vmem:[#allocation3 + $0xf] sm:$0xff]  ;;  %v915_v41 = vld [vmem:[%s4297_s5 + $0x40] sm:$0xff] }
  0xdd   : > { %v2833_v48 = vpack.i.bf16 %v680_v47, %v679_v46  ;;  %v649_v49 = vpop.f32.mrf.mxu0  ;;  %938 = vmatpush.msra.mxu3 %v915_v41  ;;  %v801_v44 = vld [vmem:[%s4296_s4 + $0x30] sm:$0xff]  ;;  %v800_v46 = vld [vmem:[%s4296_s4 + $0x28] sm:$0xff] }
  0xde   : > { %2839 = vrot.lane.b32.xlu1 %v2838_v45, %s4318_s15  ;;  %v650_v50 = vadd.f32 %v3284_v28, %v649_v49  ;;  %v913_v45 = vld [vmem:[%s4297_s5 + $0x30] sm:$0xff]  ;;  %v912_v47 = vld [vmem:[%s4297_s5 + $0x28] sm:$0xff]  ;;  %v911_v49 = vld [vmem:[%s4297_s5 + $0x20] sm:$0xff] }
  0xdf   : > { %2834 = vrot.lane.b32.xlu0 %v2833_v48, %s4314_s26  ;;  %939 = vmatpush.msra.mxu3 %v914_v43  ;;  %v799_v48 = vld [vmem:[%s4296_s4 + $0x20] sm:$0xff] }
  0xe0   : > { %v3321_v52 = vmul.f32 %v650_v50, %v3318_v51  ;;  %v798_v50 = vld [vmem:[%s4296_s4 + $0x18] sm:$0xff] }
  0xe1   : > { %v698_v53 = vld [vmem:[#allocation3 + $0x12] sm:$0xff]  ;;  %940 = vmatpush.msra.mxu3 %v913_v45 }
  0xe2   : > { %v687_v54 = vld [vmem:[#allocation3 + $0x18] sm:$0xff]  ;;  %670 = vst.msk [vmem:[#allocation3 + $0x20] sm:$0xff] %vm664_vm0, %v3321_v52  ;;  %2570 = vmatmul.msk.f32.gmra.mxu2 %vm664_vm0, %v698_v53 }
  0xe3   : > { %737 = vrot.lane.b32.xlu2 %v687_v54, %s4318_s15  ;;  %v692_v57 = vld [vmem:[#allocation3 + $0x11] sm:$0xff]  ;;  %941 = vmatpush.msra.mxu3 %v912_v47 }
  0xe4   : > { %v681_v1 = vld [vmem:[#allocation3 + $0x17] sm:$0xff] }
  0xe5   : > { %v652_v60 = vpop.f32.mrf.mxu0  ;;  %942 = vmatpush.msra.mxu3 %v911_v49  ;;  %v797_v54 = vld [vmem:[%s4296_s4 + $0x10] sm:$0xff] }
  0xe6   : > { %v653_v61 = vadd.f32 %v3284_v28, %v652_v60  ;;  %v907_v60 = vld [vmem:[%s4297_s5] sm:$0xff] }
  0xe7   : > { %759 = vrot.lane.b32.xlu0 %v692_v57, %s4316_s20  ;;  %v796_v57 = vld [vmem:[%s4296_s4 + $0x8] sm:$0xff] }
  0xe8   : > { %v3344_v63 = vmul.f32 %v653_v61, %v3330_v56 }
  0xe9   : > { %v699_v0 = vld [vmem:[#allocation3 + $0x1a] sm:$0xff] }
  0xea   : > { %v682_v2 = vld [vmem:[#allocation3 + $0x1f] sm:$0xff]  ;;  %671 = vst.msk [vmem:[#allocation3 + $0x28] sm:$0xff] %vm664_vm0, %v3344_v63  ;;  %2571 = vmatmul.msk.f32.gmra.mxu2 %vm664_vm0, %v699_v0 }
  0xeb   : > { %v2843_v3 = vpack.i.bf16 %v682_v2, %v681_v1  ;;  %v693_v4 = vld [vmem:[#allocation3 + $0x19] sm:$0xff]  ;;  %v673_v2 = vld [vmem:[#allocation3 + $0x6] sm:$0xff] }
  0xec   : > { %v688_v11 = vld [vmem:[#allocation3 + $0x20] sm:$0xff] }
  0xed   : > { %2844 = vrot.lane.b32.xlu1 %v2843_v3, %s4314_s26  ;;  %v655_v5 = vpop.f32.mrf.mxu0  ;;  %v676_v26 = vld [vmem:[#allocation3 + $0x1e] sm:$0xff] }
  0xee   : > { %v656_v7 = vadd.f32 %v3284_v28, %v655_v5  ;;  %v806_v28 = vld [vmem:[%s4296_s4 + $0x58] sm:$0xff] }
  0xef   : > { %761 = vrot.lane.b32.xlu0 %v693_v4, %s4316_s20  ;;  %841 = vmatpush.msra.mxu1 %v806_v28 }
  0xf0   : > { %v3355_v8 = vmul.f32 %v656_v7, %v3351_v6 }
  0xf1   : > { %v700_v9 = vld [vmem:[#allocation3 + $0x22] sm:$0xff]  ;;  %842 = vmatpush.msra.mxu1 %v805_v31 }
  0xf2   : > { %v694_v10 = vld [vmem:[#allocation3 + $0x21] sm:$0xff]  ;;  %672 = vst.msk [vmem:[#allocation3 + $0x30] sm:$0xff] %vm664_vm0, %v3355_v8  ;;  %2572 = vmatmul.msk.f32.gmra.mxu2 %vm664_vm0, %v700_v9 }
  0xf3   : > { %763 = vrot.lane.b32.xlu2 %v694_v10, %s4316_s20  ;;  %v683_v12 = vld [vmem:[#allocation3 + $0x27] sm:$0xff]  ;;  %843 = vmatpush.msra.mxu1 %v804_v34 }
  0xf4   : > { %v689_v15 = vld [vmem:[#allocation3 + $0x28] sm:$0xff] }
  0xf5   : > { %739 = vrot.lane.b32.xlu1 %v688_v11, %s4318_s15  ;;  %844 = vmatpush.msra.mxu1 %v803_v39  ;;  %v677_v38 = vld [vmem:[#allocation3 + $0x26] sm:$0xff] }
  0xf7   : > { %717 = vrot.lane.b32.xlu0 %v683_v12, %s4314_s26  ;;  %v674_v12 = vld [vmem:[#allocation3 + $0xe] sm:$0xff] }
  0xf9   : > { %v3363_v13 = vld [vmem:[#allocation3 + $0x2a] sm:$0xff]  ;;  %v3370_v17 = vld [vmem:[#allocation3 + $0x32] sm:$0xff] }
  0xfa   : > { %v695_v14 = vld [vmem:[#allocation3 + $0x29] sm:$0xff]  ;;  %2573 = vmatmul.msk.f32.gmra.mxu2 %vm664_vm0, %v3363_v13  ;;  %v696_v18 = vld [vmem:[#allocation3 + $0x31] sm:$0xff] }
  0xfb   : > { %765 = vrot.lane.b32.xlu2 %v695_v14, %s4316_s20  ;;  %v684_v16 = vld [vmem:[#allocation3 + $0x2f] sm:$0xff] }
  0xfc   : > { %v690_v19 = vld [vmem:[#allocation3 + $0x30] sm:$0xff] }
  0xfd   : > { %741 = vrot.lane.b32.xlu1 %v689_v15, %s4318_s15 }
  0xff   : > { %719 = vrot.lane.b32.xlu0 %v684_v16, %s4314_s26 }
 0x102   : > { %2574 = vmatmul.msk.f32.gmra.mxu2 %vm664_vm0, %v3370_v17 }
 0x103   : > { %767 = vrot.lane.b32.xlu2 %v696_v18, %s4316_s20  ;;  %v675_v18 = vld [vmem:[#allocation3 + $0x16] sm:$0xff] }
 0x105   : > { %743 = vrot.lane.b32.xlu1 %v690_v19, %s4318_s15 }
 0x10a   : > { %2575 = vmatmul.msk.f32.vlgmr.msrb.gmra.mxu2 %vm664_vm0, %v3308_v42  ;;  %v802_v42 = vld [vmem:[%s4296_s4 + $0x38] sm:$0xff] }
 0x10b   : > { %845 = vmatpush.msra.mxu1 %v802_v42 }
 0x10d   : > { %846 = vmatpush.msra.mxu1 %v801_v44 }
 0x10f   : > { %847 = vmatpush.msra.mxu1 %v800_v46  ;;  %v678_v46 = vld [vmem:[#allocation3 + $0x2e] sm:$0xff] }
 0x111   : > { %848 = vmatpush.msra.mxu1 %v799_v48 }
 0x112   : > { %2576 = vmatmul.msk.f32.gmra.mxu2 %vm664_vm0, %v698_v53  ;;  %v910_v53 = vld [vmem:[%s4297_s5 + $0x18] sm:$0xff] }
 0x113   : > { %849 = vmatpush.msra.mxu1 %v798_v50  ;;  %943 = vmatpush.msra.mxu3 %v910_v53 }
 0x115   : > { %850 = vmatpush.msra.mxu1 %v797_v54  ;;  %944 = vmatpush.msra.mxu3 %v909_v55  ;;  %v1130_v54 = vld [vmem:[%s4300_s8 + $0x18] sm:$0xff] }
 0x116   : > { %1165 = vmatpush.msrb.mxu0 %v1130_v54 }
 0x117   : > { %851 = vmatpush.msra.mxu1 %v796_v57  ;;  %945 = vmatpush.msra.mxu3 %v908_v58 }
 0x119   : > { %852 = vmatpush.msra.mxu1 %v795_v59  ;;  %946 = vmatpush.msra.mxu3 %v907_v60  ;;  %v1129_v59 = vld [vmem:[%s4300_s8 + $0x10] sm:$0xff] }
 0x11a   : > { %2577 = vmatmul.msk.f32.gmra.mxu2 %vm664_vm0, %v699_v0  ;;  %1166 = vmatpush.msrb.mxu0 %v1129_v59 }
 0x11b   : > { %2761 = vmatpush.msrb.mxu1 %v1130_v54 }
 0x11d   : > { %2762 = vmatpush.msrb.mxu1 %v1129_v59 }
 0x122   : > { %2578 = vmatmul.msk.f32.gmra.mxu2 %vm664_vm0, %v700_v9 }
 0x12a   : > { %2579 = vmatmul.msk.f32.gmra.mxu2 %vm664_vm0, %v3363_v13 }
 0x132   : > { %2580 = vmatmul.msk.f32.gmra.mxu2 %vm664_vm0, %v3370_v17 }
 0x135   : > { %v758_v4 = vpop.permute.xlu2 %757 }
 0x13d   : > { %v738_v19 = vpop.permute.xlu2 %737 }
 0x14d   : > { %v764_v28 = vpop.permute.xlu2 %763 }
 0x150   : > { %v2840_v61 = vpop.permute.xlu1 %2839 }
 0x151   : > { %v2841_v62 = vunpack.i.l.bf16 %v2840_v61  ;;  %v2835_v0 = vpop.permute.xlu0 %2834  ;;  %v2842_v10 = vunpack.i.h.bf16 %v2840_v61 }
 0x152   : > { %v2836_v1 = vunpack.i.l.bf16 %v2835_v0  ;;  %v2837_v7 = vunpack.i.h.bf16 %v2835_v0  ;;  %v1128_v0 = vld [vmem:[%s4300_s8 + $0x8] sm:$0xff] }
 0x153   : > { %1167 = vmatpush.msrb.mxu0 %v1128_v0  ;;  %2763 = vmatpush.msrb.mxu1 %v1128_v0 }
 0x154   : > { %v775_v3 = vsel %vm664_vm0, %v673_v2, %v2836_v1  ;;  %v776_v13 = vsel %vm664_vm0, %v674_v12, %v2837_v7  ;;  %v3521_v1 = vld [vmem:[%s4299_s7] ss:$0 sm:$0xff] }
 0x155   : > { %v782_v5 = vsel %vm781_vm1, %v775_v3, %v2841_v62  ;;  %v783_v14 = vsel %vm781_vm1, %v776_v13, %v2842_v10  ;;  %v766_v41 = vpop.permute.xlu2 %765  ;;  %v1127_v3 = vld [vmem:[%s4300_s8] sm:$0xff] }
 0x156   : > { %v789_v9 = vsel %vm788_vm2, %v782_v5, %v758_v4  ;;  %1168 = vmatpush.msrb.mxu0 %v1127_v3  ;;  %2764 = vmatpush.msrb.mxu1 %v1127_v3 }
 0x157   : > { %853 = vmatmul.f32.vlgmr.msra.gmra.mxu1 %v789_v9  ;;  %947 = vmatmul.f32.vlgmr.msra.gmra.mxu3 %v789_v9 }
 0x159   : > { %v760_v11 = vpop.permute.xlu0 %759 }
 0x15a   : > { %v790_v15 = vsel %vm788_vm2, %v783_v14, %v760_v11 }
 0x15d   : > { %v768_v49 = vpop.permute.xlu2 %767  ;;  %v889_v53 = vpop.f32.mrf.mxu2 }
 0x15f   : > { %856 = vmatmul.f32.gmra.mxu1 %v790_v15  ;;  %950 = vmatmul.f32.gmra.mxu3 %v790_v15  ;;  %v2845_v16 = vpop.permute.xlu1 %2844 }
 0x160   : > { %v2846_v17 = vunpack.i.l.bf16 %v2845_v16  ;;  %v2847_v24 = vunpack.i.h.bf16 %v2845_v16 }
 0x161   : > { %v762_v20 = vpop.permute.xlu0 %761 }
 0x162   : > { %v777_v21 = vsel %vm664_vm0, %v675_v18, %v2846_v17  ;;  %v778_v27 = vsel %vm664_vm0, %v676_v26, %v2847_v24  ;;  %v3531_v17 = vld [vmem:[%s4298_s6] ss:$0 sm:$0xff] }
 0x163   : > { %v784_v22 = vsel %vm781_vm1, %v777_v21, %v738_v19 }
 0x164   : > { %v791_v23 = vsel %vm788_vm2, %v784_v22, %v762_v20 }
 0x165   : > { %v3502_v55 = vpop.f32.mrf.mxu2 }
 0x167   : > { %859 = vmatmul.f32.gmra.mxu1 %v791_v23  ;;  %953 = vmatmul.f32.gmra.mxu3 %v791_v23  ;;  %v740_v25 = vpop.permute.xlu1 %739 }
 0x168   : > { %v785_v30 = vsel %vm781_vm1, %v778_v27, %v740_v25 }
 0x169   : > { %v718_v31 = vpop.permute.xlu0 %717  ;;  %v792_v33 = vsel %vm788_vm2, %v785_v30, %v764_v28 }
 0x16a   : > { %v779_v39 = vsel %vm664_vm0, %v677_v38, %v718_v31 }
 0x16d   : > { %v3504_v57 = vpop.f32.mrf.mxu2 }
 0x16f   : > { %862 = vmatmul.f32.gmra.mxu1 %v792_v33  ;;  %956 = vmatmul.f32.gmra.mxu3 %v792_v33  ;;  %v742_v34 = vpop.permute.xlu1 %741 }
 0x170   : > { %v786_v42 = vsel %vm781_vm1, %v779_v39, %v742_v34 }
 0x171   : > { %v793_v43 = vsel %vm788_vm2, %v786_v42, %v766_v41  ;;  %v720_v44 = vpop.permute.xlu0 %719 }
 0x172   : > { %v780_v47 = vsel %vm664_vm0, %v678_v46, %v720_v44 }
 0x175   : > { %v3506_v58 = vpop.f32.mrf.mxu2 }
 0x177   : > { %865 = vmatmul.f32.gmra.mxu1 %v793_v43  ;;  %959 = vmatmul.f32.gmra.mxu3 %v793_v43  ;;  %v744_v45 = vpop.permute.xlu1 %743 }
 0x178   : > { %v787_v48 = vsel %vm781_vm1, %v780_v47, %v744_v45 }
 0x179   : > { %v794_v50 = vsel %vm788_vm2, %v787_v48, %v768_v49 }
 0x17d   : > { %v3511_v60 = vpop.f32.mrf.mxu2 }
 0x17f   : > { %868 = vmatmul.f32.gmra.mxu1 %v794_v50  ;;  %962 = vmatmul.f32.gmra.mxu3 %v794_v50 }
 0x185   : > { %v3513_v61 = vpop.f32.mrf.mxu2 }
 0x18d   : > { %v983_v62 = vpop.f32.mrf.mxu2 }
 0x195   : > { %v986_v5 = vpop.f32.mrf.mxu2 }
 0x19d   : > { %v989_v14 = vpop.f32.mrf.mxu2 }
 0x1a5   : > { %v992_v27 = vpop.f32.mrf.mxu2 }
 0x1d4   : > { %v854_v9 = vpop.f32.mrf.mxu1 }
 0x1d5   : > { %v855_v22 = vadd.f32 %v3531_v17, %v854_v9 }
 0x1d7   : > { %v890_v28 = vadd.f32 %v889_v53, %v855_v22 }
 0x1da   : > { %v948_v2 = vpop.f32.mrf.mxu3 }
 0x1db   : > { %v949_v4 = vadd.f32 %v3521_v1, %v948_v2  ;;  %v995_v2 = vpop.f32.mrf.mxu2 }
 0x1dc   : > { %v857_v19 = vpop.f32.mrf.mxu1 }
 0x1dd   : > { %v984_v7 = vadd.f32 %v983_v62, %v949_v4  ;;  %v858_v41 = vadd.f32 %v3531_v17, %v857_v19 }
 0x1df   : > { %v2581_v10 = vmul.f32 -1.442695, %v984_v7  ;;  %v893_v50 = vadd.f32 %v3502_v55, %v858_v41 }
 0x1e1   : > { %2870 = vpow2.f32 %v2581_v10 }
 0x1e2   : > { %v951_v11 = vpop.f32.mrf.mxu3 }
 0x1e3   : > { %v952_v12 = vadd.f32 %v3521_v1, %v951_v11 }
 0x1e4   : > { %v860_v34 = vpop.f32.mrf.mxu1 }
 0x1e5   : > { %v987_v13 = vadd.f32 %v986_v5, %v952_v12  ;;  %v861_v55 = vadd.f32 %v3531_v17, %v860_v34 }
 0x1e7   : > { %v2871_v15 = vpop.eup %2870  ;;  %v2582_v16 = vmul.f32 -1.442695, %v987_v13 }
 0x1e8   : > { %v1025_v18 = vadd.f32 1.0, %v2871_v15 }
 0x1e9   : > { %2872 = vpow2.f32 %v2582_v16 }
 0x1ea   : > { %2874 = vrcp.f32 %v1025_v18  ;;  %v954_v20 = vpop.f32.mrf.mxu3  ;;  %v1042_v42 = vand.u32 2147483648, %v1025_v18  ;;  %v1040_v45 = vand.u32 2147483647, %v1025_v18  ;;  %vm1036_vm4 = vweird.f32 %v1025_v18 }
 0x1eb   : > { %v955_v21 = vadd.f32 %v3521_v1, %v954_v20  ;;  %v896_v20 = vadd.f32 %v3504_v57, %v861_v55  ;;  %v998_v57 = vpop.f32.mrf.mxu2 }
 0x1ec   : > { %v1043_v54 = vor.u32 1.1754944e-38, %v1042_v42  ;;  %vm1041_vm6 = vcmp.eq.f32.partialorder %v1040_v45, 8.507059e+37  ;;  %v863_v11 = vpop.f32.mrf.mxu1  ;;  %v1208_v42 = vld [vmem:[%s4301_s9 + $0x10] sm:$0xff] }
 0x1ed   : > { %v990_v23 = vadd.f32 %v989_v14, %v955_v21 }
 0x1ef   : > { %v2873_v24 = vpop.eup %2872  ;;  %v2583_v25 = vmul.f32 -1.442695, %v990_v23 }
 0x1f0   : > { %v2875_v26 = vpop.eup %2874  ;;  %v1026_v30 = vadd.f32 1.0, %v2873_v24 }
 0x1f1   : > { %v1032_v31 = vmul.f32 %v2875_v26, %v1025_v18  ;;  %2876 = vpow2.f32 %v2583_v25  ;;  %vm1037_vm3 = vweird.f32 %v2875_v26 }
 0x1f2   : > { %2878 = vrcp.f32 %v1026_v30  ;;  %v957_v33 = vpop.f32.mrf.mxu3  ;;  %vm1038_vm5 = vmor %vm1036_vm4, %vm1037_vm3  ;;  %v1057_v10 = vand.u32 2147483648, %v1026_v30  ;;  %v1055_v14 = vand.u32 2147483647, %v1026_v30  ;;  %vm1051_vm8 = vweird.f32 %v1026_v30 }
 0x1f3   : > { %v958_v38 = vadd.f32 %v3521_v1, %v957_v33  ;;  %v1033_v39 = vsub.f32 1.0, %v1032_v31  ;;  %2880 = vtanh.f32 %v890_v28  ;;  %v864_v33 = vadd.f32 %v3531_v17, %v863_v11 }
 0x1f4   : > { %v1058_v22 = vor.u32 1.1754944e-38, %v1057_v10  ;;  %vm1056_vm10 = vcmp.eq.f32.partialorder %v1055_v14, 8.507059e+37 }
 0x1f5   : > { %v993_v43 = vadd.f32 %v992_v27, %v958_v38  ;;  %v1034_v44 = vmul.f32 %v2875_v26, %v1033_v39 }
 0x1f7   : > { %v2877_v46 = vpop.eup %2876  ;;  %v2584_v47 = vmul.f32 -1.442695, %v993_v43  ;;  %v1035_v48 = vadd.f32 %v2875_v26, %v1034_v44  ;;  %v866_v44 = vpop.f32.mrf.mxu1 }
 0x1f8   : > { %v2879_v49 = vpop.eup %2878  ;;  %v3538_v53 = vadd.f32 1.0, %v2877_v46 }
 0x1f9   : > { %2882 = vpow2.f32 %v2584_v47  ;;  %v1039_v59 = vsel %vm1038_vm5, %v2875_v26, %v1035_v48  ;;  %v1047_v62 = vmul.f32 %v2879_v49, %v1026_v30  ;;  %v2881_v0 = vpop.eup %2880  ;;  %vm1052_vm7 = vweird.f32 %v2879_v49  ;;  %v1207_v47 = vld [vmem:[%s4301_s9 + $0x8] sm:$0xff] }
 0x1fa   : > { %2884 = vrcp.f32 %v3538_v53  ;;  %v960_v3 = vpop.f32.mrf.mxu3  ;;  %v1044_v4 = vsel %vm1041_vm6, %v1043_v54, %v1039_v59  ;;  %vm1053_vm9 = vmor %vm1051_vm8, %vm1052_vm7  ;;  %v1072_v34 = vand.u32 2147483648, %v3538_v53  ;;  %v1070_v41 = vand.u32 2147483647, %v3538_v53 }
 0x1fb   : > { %v961_v5 = vadd.f32 %v3521_v1, %v960_v3  ;;  %v3542_v7 = vmul.f32 %v2881_v0, %v1044_v4  ;;  %v1048_v9 = vsub.f32 1.0, %v1047_v62  ;;  %2886 = vtanh.f32 %v893_v50 }
 0x1fc   : > { %vm1066_vm12 = vweird.f32 %v3538_v53  ;;  %v1073_v54 = vor.u32 1.1754944e-38, %v1072_v34  ;;  %vm1071_vm14 = vcmp.eq.f32.partialorder %v1070_v41, 8.507059e+37  ;;  %v867_v4 = vadd.f32 %v3531_v17, %v866_v44 }
 0x1fd   : > { %v996_v12 = vadd.f32 %v995_v2, %v961_v5  ;;  %2587 = vmatmul.msk.f32.vlgmr.msrb.gmra.mxu0 %vm664_vm0, %v3542_v7  ;;  %v1049_v13 = vmul.f32 %v2879_v49, %v1048_v9 }
 0x1ff   : > { %v2883_v15 = vpop.eup %2882  ;;  %v2585_v16 = vmul.f32 -1.442695, %v996_v12  ;;  %v1050_v18 = vadd.f32 %v2879_v49, %v1049_v13  ;;  %v902_v13 = vadd.f32 %v3511_v60, %v867_v4 }
 0x200   : > { %v2885_v19 = vpop.eup %2884  ;;  %v3548_v21 = vadd.f32 1.0, %v2883_v15 }
 0x201   : > { %2888 = vpow2.f32 %v2585_v16  ;;  %v1054_v23 = vsel %vm1053_vm9, %v2879_v49, %v1050_v18  ;;  %v1062_v24 = vmul.f32 %v2885_v19, %v3538_v53  ;;  %v2887_v25 = vpop.eup %2886  ;;  %vm1067_vm11 = vweird.f32 %v2885_v19  ;;  %v1206_v53 = vld [vmem:[%s4301_s9] sm:$0xff]  ;;  %v869_v18 = vpop.f32.mrf.mxu1 }
 0x202   : > { %2890 = vrcp.f32 %v3548_v21  ;;  %v963_v26 = vpop.f32.mrf.mxu3  ;;  %v1059_v27 = vsel %vm1056_vm10, %v1058_v22, %v1054_v23  ;;  %v899_v49 = vadd.f32 %v3506_v58, %v864_v33  ;;  %vm1068_vm13 = vmor %vm1066_vm12, %vm1067_vm11  ;;  %v1087_v5 = vand.u32 2147483648, %v3548_v21 }
 0x203   : > { %v964_v28 = vadd.f32 %v3521_v1, %v963_v26  ;;  %v3553_v30 = vmul.f32 %v2887_v25, %v1059_v27  ;;  %v1063_v31 = vsub.f32 1.0, %v1062_v24  ;;  %2892 = vtanh.f32 %v896_v20  ;;  %v1209_v1 = vld [vmem:[%s4301_s9 + $0x18] sm:$0xff] }
 0x204   : > { %1226 = vmatpush.msra.mxu1 %v1209_v1  ;;  %v1085_v55 = vand.u32 2147483647, %v3548_v21  ;;  %vm1081_vm3 = vweird.f32 %v3548_v21  ;;  %v1088_v15 = vor.u32 1.1754944e-38, %v1087_v5  ;;  %v870_v25 = vadd.f32 %v3531_v17, %v869_v18 }
 0x205   : > { %v999_v38 = vadd.f32 %v998_v57, %v964_v28  ;;  %2588 = vmatmul.msk.f32.gmra.mxu0 %vm664_vm0, %v3553_v30  ;;  %v1064_v39 = vmul.f32 %v2885_v19, %v1063_v31 }
 0x206   : > { %1227 = vmatpush.msra.mxu1 %v1208_v42  ;;  %vm1086_vm5 = vcmp.eq.f32.partialorder %v1085_v55, 8.507059e+37  ;;  %v905_v31 = vadd.f32 %v3513_v61, %v870_v25 }
 0x207   : > { %v2889_v43 = vpop.eup %2888  ;;  %v2586_v45 = vmul.f32 -1.442695, %v999_v38  ;;  %v1065_v46 = vadd.f32 %v2885_v19, %v1064_v39 }
 0x208   : > { %v2891_v48 = vpop.eup %2890  ;;  %v1029_v50 = vadd.f32 1.0, %v2889_v43  ;;  %1228 = vmatpush.msra.mxu1 %v1207_v47 }
 0x209   : > { %2894 = vpow2.f32 %v2586_v45  ;;  %v1069_v59 = vsel %vm1068_vm13, %v2885_v19, %v1065_v46  ;;  %v1077_v62 = vmul.f32 %v2891_v48, %v3548_v21  ;;  %v2893_v0 = vpop.eup %2892  ;;  %vm1082_vm15 = vweird.f32 %v2891_v48 }
 0x20a   : > { %2896 = vrcp.f32 %v1029_v50  ;;  %v1074_v2 = vsel %vm1071_vm14, %v1073_v54, %v1069_v59  ;;  %1229 = vmatpush.msra.mxu1 %v1206_v53  ;;  %vm1083_vm4 = vmor %vm1081_vm3, %vm1082_vm15  ;;  %v1102_v26 = vand.u32 2147483648, %v1029_v50  ;;  %v1100_v60 = vand.u32 2147483647, %v1029_v50  ;;  %v2616_v54 = vld [vmem:[%s4296_s4 + $0x128] sm:$0xff]  ;;  %v2642_v53 = vld [vmem:[%s4297_s5 + $0x120] sm:$0xff] }
 0x20b   : > { %v3575_v3 = vmul.f32 %v2893_v0, %v1074_v2  ;;  %v1078_v58 = vsub.f32 1.0, %v1077_v62  ;;  %2898 = vtanh.f32 %v899_v49  ;;  %vm1096_vm7 = vweird.f32 %v1029_v50  ;;  %v2618_v49 = vld [vmem:[%s4296_s4 + $0x138] sm:$0xff]  ;;  %v2643_v59 = vld [vmem:[%s4297_s5 + $0x128] sm:$0xff]  ;;  %v2615_v62 = vld [vmem:[%s4296_s4 + $0x120] sm:$0xff] }
 0x20c   : > { %v1103_v57 = vor.u32 1.1754944e-38, %v1102_v26  ;;  %vm1101_vm9 = vcmp.eq.f32.partialorder %v1100_v60, 8.507059e+37  ;;  %1453 = vmatpush.msra.mxu2 %v2618_v49  ;;  %v2861_v0 = vld [vmem:[%s4302_s10] ss:$0 sm:$0xff]  ;;  %v2641_v49 = vld [vmem:[%s4297_s5 + $0x118] sm:$0xff] }
 0x20d   : > { %2589 = vmatmul.msk.f32.gmra.mxu0 %vm664_vm0, %v3575_v3  ;;  %v1079_v9 = vmul.f32 %v2891_v48, %v1078_v58 }
 0x20e   : > { %1502 = vmatpush.msra.mxu0 %v2641_v49 }
 0x20f   : > { %v2895_v10 = vpop.eup %2894  ;;  %v1080_v11 = vadd.f32 %v2891_v48, %v1079_v9 }
 0x210   : > { %v2897_v12 = vpop.eup %2896  ;;  %v1030_v14 = vadd.f32 1.0, %v2895_v10 }
 0x211   : > { %v1092_v16 = vmul.f32 %v2897_v12, %v1029_v50  ;;  %v1084_v19 = vsel %vm1083_vm4, %v2891_v48, %v1080_v11  ;;  %v2899_v20 = vpop.eup %2898  ;;  %vm1097_vm6 = vweird.f32 %v2897_v12  ;;  %v2644_v50 = vld [vmem:[%s4297_s5 + $0x130] sm:$0xff] }
 0x212   : > { %2900 = vrcp.f32 %v1030_v14  ;;  %v1089_v22 = vsel %vm1086_vm5, %v1088_v15, %v1084_v19  ;;  %vm1098_vm8 = vmor %vm1096_vm7, %vm1097_vm6  ;;  %v1117_v1 = vand.u32 2147483648, %v1030_v14  ;;  %v1115_v43 = vand.u32 2147483647, %v1030_v14 }
 0x213   : > { %v1093_v23 = vsub.f32 1.0, %v1092_v16  ;;  %v1124_v24 = vmul.f32 %v2899_v20, %v1089_v22  ;;  %2902 = vtanh.f32 %v902_v13  ;;  %vm1111_vm11 = vweird.f32 %v1030_v14 }
 0x214   : > { %2904 = vtanh.f32 %v905_v31  ;;  %v1118_v61 = vor.u32 1.1754944e-38, %v1117_v1  ;;  %vm1116_vm13 = vcmp.eq.f32.partialorder %v1115_v43, 8.507059e+37 }
 0x215   : > { %2590 = vmatmul.msk.f32.gmra.mxu0 %vm664_vm0, %v1124_v24  ;;  %v1094_v21 = vmul.f32 %v2897_v12, %v1093_v23 }
 0x217   : > { %v1095_v27 = vadd.f32 %v2897_v12, %v1094_v21 }
 0x218   : > { %v2901_v28 = vpop.eup %2900 }
 0x219   : > { %v1099_v33 = vsel %vm1098_vm8, %v2897_v12, %v1095_v27  ;;  %v1107_v34 = vmul.f32 %v2901_v28, %v1030_v14  ;;  %v2903_v38 = vpop.eup %2902  ;;  %vm1112_vm10 = vweird.f32 %v2901_v28 }
 0x21a   : > { %v1104_v39 = vsel %vm1101_vm9, %v1103_v57, %v1099_v33  ;;  %vm1113_vm12 = vmor %vm1111_vm11, %vm1112_vm10  ;;  %v2905_v46 = vpop.eup %2904 }
 0x21b   : > { %v1125_v41 = vmul.f32 %v2903_v38, %v1104_v39  ;;  %v1108_v17 = vsub.f32 1.0, %v1107_v34 }
 0x21d   : > { %2591 = vmatmul.msk.f32.vlgmr.msrb.gmra.mxu1 %vm664_vm0, %v1125_v41  ;;  %v1109_v42 = vmul.f32 %v2901_v28, %v1108_v17 }
 0x21f   : > { %v1110_v44 = vadd.f32 %v2901_v28, %v1109_v42 }
 0x221   : > { %v1114_v45 = vsel %vm1113_vm12, %v2901_v28, %v1110_v44 }
 0x222   : > { %v1119_v47 = vsel %vm1116_vm13, %v1118_v61, %v1114_v45 }
 0x223   : > { %v1126_v48 = vmul.f32 %v2905_v46, %v1119_v47 }
 0x225   : > { %2592 = vmatmul.msk.f32.gmra.mxu1 %vm664_vm0, %v1126_v48 }
 0x22d   : > { %2593 = vmatmul.msk.f32.vlgmr.msra.gmra.mxu1 %vm664_vm0, %v3542_v7  ;;  %v2645_v7 = vld [vmem:[%s4297_s5 + $0x138] sm:$0xff] }
 0x22e   : > { %1549 = vmatpush.msrb.mxu1 %v2645_v7 }
 0x230   : > { %1550 = vmatpush.msrb.mxu1 %v2644_v50 }
 0x232   : > { %1551 = vmatpush.msrb.mxu1 %v2643_v59 }
 0x234   : > { %1552 = vmatpush.msrb.mxu1 %v2642_v53  ;;  %v2613_v53 = vld [vmem:[%s4296_s4 + $0x110] sm:$0xff] }
 0x235   : > { %2594 = vmatmul.msk.f32.gmra.mxu1 %vm664_vm0, %v3553_v30  ;;  %v2617_v30 = vld [vmem:[%s4296_s4 + $0x130] sm:$0xff] }
 0x236   : > { %1454 = vmatpush.msra.mxu2 %v2617_v30 }
 0x238   : > { %1455 = vmatpush.msra.mxu2 %v2616_v54 }
 0x23a   : > { %1456 = vmatpush.msra.mxu2 %v2615_v62 }
 0x23d   : > { %2595 = vmatmul.msk.f32.gmra.mxu1 %vm664_vm0, %v3575_v3 }
 0x245   : > { %2596 = vmatmul.msk.f32.gmra.mxu1 %vm664_vm0, %v1124_v24 }
 0x24d   : > { %2597 = vmatmul.msk.f32.gmra.mxu1 %vm664_vm0, %v1125_v41 }
 0x255   : > { %2598 = vmatmul.msk.f32.gmra.mxu1 %vm664_vm0, %v1126_v48  ;;  %v2614_v48 = vld [vmem:[%s4296_s4 + $0x118] sm:$0xff] }
 0x256   : > { %1406 = vmatpush.msrb.mxu3 %v2614_v48 }
 0x258   : > { %1407 = vmatpush.msrb.mxu3 %v2613_v53 }
 0x27a   : > { %v1170_v2 = vpop.f32.mrf.mxu0 }
 0x27b   : > { %v1171_v3 = vadd.f32 %v2861_v0, %v1170_v2  ;;  %v2639_v2 = vld [vmem:[%s4297_s5 + $0x108] sm:$0xff] }
 0x27d   : > { %v1188_v58 = vadd.f32 %v1171_v3, %v3290_v32  ;;  %v2612_v3 = vld [vmem:[%s4296_s4 + $0x108] sm:$0xff] }
 0x27e   : > { %1408 = vmatpush.msrb.mxu3 %v2612_v3 }
 0x27f   : > { %v3627_v4 = vmul.f32 %v1188_v58, %v3286_v29  ;;  %v2638_v58 = vld [vmem:[%s4297_s5 + $0x100] sm:$0xff] }
 0x281   : > { %1200 = vst.msk [vmem:[#allocation3 + $0x8] sm:$0xff] %vm664_vm0, %v3627_v4 }
 0x282   : > { %v1173_v5 = vpop.f32.mrf.mxu0 }
 0x283   : > { %v1174_v9 = vadd.f32 %v2861_v0, %v1173_v5  ;;  %v2611_v5 = vld [vmem:[%s4296_s4 + $0x100] sm:$0xff] }
 0x284   : > { %1409 = vmatpush.msrb.mxu3 %v2611_v5 }
 0x285   : > { %v1189_v55 = vadd.f32 %v1174_v9, %v3298_v36  ;;  %v2637_v9 = vld [vmem:[%s4297_s5 + $0xf8] sm:$0xff] }
 0x287   : > { %v3633_v10 = vmul.f32 %v1189_v55, %v3295_v35 }
 0x288   : > { %v1259_v11 = vld [vmem:[#allocation3 + $0x8] sm:$0xff] }
 0x289   : > { %1201 = vst.msk [vmem:[#allocation3 + $0x10] sm:$0xff] %vm664_vm0, %v3633_v10  ;;  %1302 = vrot.lane.b32.xlu1 %v1259_v11, %s4334_s22  ;;  %v1253_v15 = vld [vmem:[#allocation3 + $0x6] sm:$0xff]  ;;  %v2610_v11 = vld [vmem:[%s4296_s4 + $0xf8] sm:$0xff] }
 0x28a   : > { %v1176_v32 = vpop.f32.mrf.mxu0  ;;  %1410 = vmatpush.msrb.mxu3 %v2610_v11  ;;  %v2662_v11 = vld [vmem:[%s4300_s8 + $0x38] sm:$0xff] }
 0x28b   : > { %v1177_v12 = vadd.f32 %v2861_v0, %v1176_v32  ;;  %v2636_v32 = vld [vmem:[%s4297_s5 + $0xf0] sm:$0xff] }
 0x28d   : > { %v1190_v13 = vadd.f32 %v1177_v12, %v3306_v40  ;;  %v2609_v12 = vld [vmem:[%s4296_s4 + $0xf0] sm:$0xff] }
 0x28e   : > { %1411 = vmatpush.msrb.mxu3 %v2609_v12 }
 0x28f   : > { %v3640_v14 = vmul.f32 %v1190_v13, %v3302_v37  ;;  %v2635_v13 = vld [vmem:[%s4297_s5 + $0xe8] sm:$0xff] }
 0x290   : > { %v1265_v16 = vld [vmem:[#allocation3 + $0xa] sm:$0xff] }
 0x291   : > { %v3642_v18 = vld [vmem:[#allocation3 + $0xc] sm:$0xff]  ;;  %1202 = vst.msk [vmem:[#allocation3 + $0x18] sm:$0xff] %vm664_vm0, %v3640_v14  ;;  %1326 = vrot.lane.b32.xlu2 %v1265_v16, %s4335_s19  ;;  %v2634_v16 = vld [vmem:[%s4297_s5 + $0xe0] sm:$0xff] }
 0x292   : > { %v1254_v36 = vld [vmem:[#allocation3 + $0xe] sm:$0xff]  ;;  %2620 = vmatmul.msk.f32.vlgmr.msra.gmra.mxu2 %vm664_vm0, %v3642_v18  ;;  %2647 = vmatmul.msk.f32.vlgmr.msrb.gmra.mxu1 %vm664_vm0, %v3642_v18  ;;  %v1179_v40 = vpop.f32.mrf.mxu0 }
 0x293   : > { %v2848_v19 = vpack.i.bf16 %v1254_v36, %v1253_v15  ;;  %v1180_v20 = vadd.f32 %v2861_v0, %v1179_v40  ;;  %v1260_v21 = vld [vmem:[#allocation3 + $0x10] sm:$0xff]  ;;  %v2608_v15 = vld [vmem:[%s4296_s4 + $0xe8] sm:$0xff]  ;;  %v2607_v36 = vld [vmem:[%s4296_s4 + $0xe0] sm:$0xff] }
 0x294   : > { %1412 = vmatpush.msrb.mxu3 %v2608_v15  ;;  %v2606_v40 = vld [vmem:[%s4296_s4 + $0xd8] sm:$0xff] }
 0x295   : > { %2849 = vrot.lane.b32.xlu0 %v2848_v19, %s4336_s17  ;;  %v1191_v22 = vadd.f32 %v1180_v20, %v3321_v52  ;;  %v2633_v19 = vld [vmem:[%s4297_s5 + $0xd8] sm:$0xff]  ;;  %v2632_v20 = vld [vmem:[%s4297_s5 + $0xd0] sm:$0xff] }
 0x296   : > { %1413 = vmatpush.msrb.mxu3 %v2607_v36 }
 0x297   : > { %v3654_v23 = vmul.f32 %v1191_v22, %v3318_v51  ;;  %v2605_v22 = vld [vmem:[%s4296_s4 + $0xd0] sm:$0xff] }
 0x298   : > { %v1255_v24 = vld [vmem:[#allocation3 + $0x16] sm:$0xff]  ;;  %1414 = vmatpush.msrb.mxu3 %v2606_v40 }
 0x299   : > { %v1266_v25 = vld [vmem:[#allocation3 + $0x12] sm:$0xff]  ;;  %1203 = vst.msk [vmem:[#allocation3 + $0x20] sm:$0xff] %vm664_vm0, %v3654_v23  ;;  %1282 = vrot.lane.b32.xlu2 %v1255_v24, %s4336_s17  ;;  %v2631_v24 = vld [vmem:[%s4297_s5 + $0xc8] sm:$0xff] }
 0x29a   : > { %v3656_v26 = vld [vmem:[#allocation3 + $0x14] sm:$0xff]  ;;  %1328 = vrot.lane.b32.xlu1 %v1266_v25, %s4335_s19  ;;  %v1182_v52 = vpop.f32.mrf.mxu1  ;;  %v2604_v25 = vld [vmem:[%s4296_s4 + $0xc8] sm:$0xff]  ;;  %1415 = vmatpush.msrb.mxu3 %v2605_v22 }
 0x29b   : > { %2621 = vmatmul.msk.f32.gmra.mxu2 %vm664_vm0, %v3656_v26  ;;  %2648 = vmatmul.msk.f32.gmra.mxu1 %vm664_vm0, %v3656_v26  ;;  %v1183_v60 = vadd.f32 %v2861_v0, %v1182_v52  ;;  %v1261_v34 = vld [vmem:[#allocation3 + $0x18] sm:$0xff]  ;;  %v2630_v52 = vld [vmem:[%s4297_s5 + $0xc0] sm:$0xff] }
 0x29c   : > { %1416 = vmatpush.msrb.mxu3 %v2604_v25 }
 0x29d   : > { %1304 = vrot.lane.b32.xlu0 %v1260_v21, %s4334_s22  ;;  %v1192_v27 = vadd.f32 %v1183_v60, %v3344_v63  ;;  %v2603_v21 = vld [vmem:[%s4296_s4 + $0xc0] sm:$0xff]  ;;  %v2629_v60 = vld [vmem:[%s4297_s5 + $0xb8] sm:$0xff] }
 0x29e   : > { %1417 = vmatpush.msrb.mxu3 %v2603_v21 }
 0x29f   : > { %v3669_v28 = vmul.f32 %v1192_v27, %v3330_v56  ;;  %v2602_v27 = vld [vmem:[%s4296_s4 + $0xb8] sm:$0xff] }
 0x2a0   : > { %v1256_v31 = vld [vmem:[#allocation3 + $0x1e] sm:$0xff]  ;;  %1418 = vmatpush.msrb.mxu3 %v2602_v27 }
 0x2a1   : > { %v1267_v57 = vld [vmem:[#allocation3 + $0x1a] sm:$0xff]  ;;  %1204 = vst.msk [vmem:[#allocation3 + $0x28] sm:$0xff] %vm664_vm0, %v3669_v28  ;;  %1284 = vrot.lane.b32.xlu2 %v1256_v31, %s4336_s17  ;;  %v2628_v31 = vld [vmem:[%s4297_s5 + $0xb0] sm:$0xff] }
 0x2a2   : > { %v3671_v33 = vld [vmem:[#allocation3 + $0x1c] sm:$0xff]  ;;  %1330 = vrot.lane.b32.xlu1 %v1267_v57, %s4335_s19  ;;  %v1185_v63 = vpop.f32.mrf.mxu1  ;;  %v2601_v57 = vld [vmem:[%s4296_s4 + $0xb0] sm:$0xff] }
 0x2a3   : > { %2622 = vmatmul.msk.f32.gmra.mxu2 %vm664_vm0, %v3671_v33  ;;  %2649 = vmatmul.msk.f32.gmra.mxu1 %vm664_vm0, %v3671_v33  ;;  %v1186_v38 = vadd.f32 %v2861_v0, %v1185_v63  ;;  %v1262_v43 = vld [vmem:[#allocation3 + $0x20] sm:$0xff]  ;;  %v2640_v0 = vld [vmem:[%s4297_s5 + $0x110] sm:$0xff]  ;;  %v2627_v63 = vld [vmem:[%s4297_s5 + $0xa8] sm:$0xff] }
 0x2a4   : > { %1503 = vmatpush.msra.mxu0 %v2640_v0  ;;  %1419 = vmatpush.msrb.mxu3 %v2601_v57  ;;  %v2673_v27 = vld [vmem:[%s4301_s9 + $0x38] sm:$0xff] }
 0x2a5   : > { %1306 = vrot.lane.b32.xlu0 %v1261_v34, %s4334_s22  ;;  %v1193_v39 = vadd.f32 %v1186_v38, %v3355_v8  ;;  %v2600_v34 = vld [vmem:[%s4296_s4 + $0xa8] sm:$0xff]  ;;  %v2626_v38 = vld [vmem:[%s4297_s5 + $0xa0] sm:$0xff]  ;;  %1801 = vmatpush.msrb.mxu2 %v2673_v27 }
 0x2a6   : > { %1504 = vmatpush.msra.mxu0 %v2639_v2  ;;  %1420 = vmatpush.msrb.mxu3 %v2600_v34  ;;  %v2659_v34 = vld [vmem:[%s4300_s8 + $0x20] sm:$0xff] }
 0x2a7   : > { %v3684_v41 = vmul.f32 %v1193_v39, %v3351_v6  ;;  %v2599_v39 = vld [vmem:[%s4296_s4 + $0xa0] sm:$0xff] }
 0x2a8   : > { %v1257_v17 = vld [vmem:[#allocation3 + $0x26] sm:$0xff]  ;;  %1505 = vmatpush.msra.mxu0 %v2638_v58  ;;  %1421 = vmatpush.msrb.mxu3 %v2599_v39 }
 0x2a9   : > { %v1268_v1 = vld [vmem:[#allocation3 + $0x22] sm:$0xff]  ;;  %1205 = vst.msk [vmem:[#allocation3 + $0x30] sm:$0xff] %vm664_vm0, %v3684_v41  ;;  %1286 = vrot.lane.b32.xlu2 %v1257_v17, %s4336_s17 }
 0x2aa   : > { %v3686_v42 = vld [vmem:[#allocation3 + $0x24] sm:$0xff]  ;;  %1332 = vrot.lane.b32.xlu1 %v1268_v1, %s4335_s19  ;;  %v1231_v8 = vpop.f32.mrf.mxu1  ;;  %1506 = vmatpush.msra.mxu0 %v2637_v9 }
 0x2ab   : > { %2623 = vmatmul.msk.f32.gmra.mxu2 %vm664_vm0, %v3686_v42  ;;  %2650 = vmatmul.msk.f32.gmra.mxu1 %vm664_vm0, %v3686_v42  ;;  %v1263_v47 = vld [vmem:[#allocation3 + $0x28] sm:$0xff] }
 0x2ac   : > { %1507 = vmatpush.msra.mxu0 %v2636_v32  ;;  %v2661_v32 = vld [vmem:[%s4300_s8 + $0x30] sm:$0xff]  ;;  %1738 = vmatpush.msra.mxu3 %v2662_v11 }
 0x2ad   : > { %1308 = vrot.lane.b32.xlu0 %v1262_v43, %s4334_s22 }
 0x2ae   : > { %1508 = vmatpush.msra.mxu0 %v2635_v13  ;;  %1739 = vmatpush.msra.mxu3 %v2661_v32 }
 0x2b0   : > { %v1258_v44 = vld [vmem:[#allocation3 + $0x2e] sm:$0xff]  ;;  %1509 = vmatpush.msra.mxu0 %v2634_v16 }
 0x2b1   : > { %v1269_v61 = vld [vmem:[#allocation3 + $0x2a] sm:$0xff]  ;;  %1288 = vrot.lane.b32.xlu2 %v1258_v44, %s4336_s17  ;;  %v1270_v7 = vld [vmem:[#allocation3 + $0x32] sm:$0xff] }
 0x2b2   : > { %v3697_v45 = vld [vmem:[#allocation3 + $0x2c] sm:$0xff]  ;;  %1334 = vrot.lane.b32.xlu1 %v1269_v61, %s4335_s19  ;;  %v1233_v46 = vpop.f32.mrf.mxu1  ;;  %v1271_v30 = vld [vmem:[#allocation3 + $0x34] sm:$0xff]  ;;  %1510 = vmatpush.msra.mxu0 %v2633_v19  ;;  %v1247_v44 = vld [vmem:[#allocation3 + $0x4] sm:$0xff] }
 0x2b3   : > { %2624 = vmatmul.msk.f32.gmra.mxu2 %vm664_vm0, %v3697_v45  ;;  %2651 = vmatmul.msk.f32.gmra.mxu1 %vm664_vm0, %v3697_v45  ;;  %v1264_v54 = vld [vmem:[#allocation3 + $0x30] sm:$0xff] }
 0x2b4   : > { %1511 = vmatpush.msra.mxu0 %v2632_v20 }
 0x2b5   : > { %1310 = vrot.lane.b32.xlu0 %v1263_v47, %s4334_s22 }
 0x2b6   : > { %1512 = vmatpush.msra.mxu0 %v2631_v24 }
 0x2b8   : > { %1513 = vmatpush.msra.mxu0 %v2630_v52 }
 0x2ba   : > { %1336 = vrot.lane.b32.xlu1 %v1270_v7, %s4335_s19  ;;  %v3715_v50 = vpop.f32.mrf.mxu1  ;;  %1514 = vmatpush.msra.mxu0 %v2629_v60  ;;  %v3842_v60 = vld [vmem:[%s4299_s7 + $0x1] ss:$0 sm:$0xff] }
 0x2bb   : > { %2625 = vmatmul.msk.f32.gmra.mxu2 %vm664_vm0, %v1271_v30  ;;  %2652 = vmatmul.msk.f32.gmra.mxu1 %vm664_vm0, %v1271_v30 }
 0x2bc   : > { %1515 = vmatpush.msra.mxu0 %v2628_v31 }
 0x2bd   : > { %1312 = vrot.lane.b32.xlu0 %v1264_v54, %s4334_s22 }
 0x2be   : > { %1516 = vmatpush.msra.mxu0 %v2627_v63  ;;  %v2660_v63 = vld [vmem:[%s4300_s8 + $0x28] sm:$0xff] }
 0x2bf   : > { %1740 = vmatpush.msra.mxu3 %v2660_v63 }
 0x2c0   : > { %1517 = vmatpush.msra.mxu0 %v2626_v38  ;;  %v2671_v38 = vld [vmem:[%s4301_s9 + $0x28] sm:$0xff] }
 0x2c1   : > { %1741 = vmatpush.msra.mxu3 %v2659_v34 }
 0x2c2   : > { %v3718_v59 = vpop.f32.mrf.mxu1 }
 0x2ca   : > { %v1241_v62 = vpop.f32.mrf.mxu1 }
 0x2d2   : > { %v1243_v55 = vpop.f32.mrf.mxu1 }
 0x2eb   : > { %v1327_v17 = vpop.permute.xlu2 %1326 }
 0x2f3   : > { %v1283_v7 = vpop.permute.xlu2 %1282 }
 0x2f4   : > { %v1346_v3 = vsel %vm664_vm0, %v3656_v26, %v1283_v7 }
 0x2fb   : > { %v1303_v1 = vpop.permute.xlu1 %1302  ;;  %v1285_v58 = vpop.permute.xlu2 %1284 }
 0x2fc   : > { %v1347_v26 = vsel %vm664_vm0, %v3671_v33, %v1285_v58 }
 0x303   : > { %v1287_v13 = vpop.permute.xlu2 %1286 }
 0x304   : > { %v1348_v36 = vsel %vm664_vm0, %v3686_v42, %v1287_v13 }
 0x307   : > { %v2850_v8 = vpop.permute.xlu0 %2849 }
 0x308   : > { %v2851_v43 = vunpack.i.l.bf16 %v2850_v8  ;;  %v2852_v47 = vunpack.i.h.bf16 %v2850_v8 }
 0x30a   : > { %v1344_v61 = vsel %vm664_vm0, %v1247_v44, %v2851_v43  ;;  %v1345_v54 = vsel %vm664_vm0, %v3642_v18, %v2852_v47 }
 0x30b   : > { %v1350_v46 = vsel %vm781_vm1, %v1344_v61, %v1303_v1  ;;  %v1289_v22 = vpop.permute.xlu2 %1288  ;;  %v2670_v1 = vld [vmem:[%s4301_s9 + $0x20] sm:$0xff] }
 0x30c   : > { %v1356_v48 = vsel %vm788_vm2, %v1350_v46, %v1327_v17  ;;  %v1329_v49 = vpop.permute.xlu1 %1328  ;;  %v1349_v24 = vsel %vm664_vm0, %v3697_v45, %v1289_v22  ;;  %v2672_v45 = vld [vmem:[%s4301_s9 + $0x30] sm:$0xff] }
 0x30d   : > { %1422 = vmatmul.f32.vlgmr.msrb.gmra.mxu3 %v1356_v48  ;;  %1518 = vmatmul.f32.vlgmr.msra.gmra.mxu0 %v1356_v48 }
 0x30e   : > { %1802 = vmatpush.msrb.mxu2 %v2672_v45 }
 0x30f   : > { %v1305_v30 = vpop.permute.xlu0 %1304  ;;  %v1554_v42 = vpop.f32.mrf.mxu1 }
 0x310   : > { %v1351_v62 = vsel %vm781_vm1, %v1345_v54, %v1305_v30  ;;  %1803 = vmatpush.msrb.mxu2 %v2671_v38  ;;  %v3867_v54 = vld [vmem:[%s4298_s6 + $0x1] ss:$0 sm:$0xff] }
 0x311   : > { %v1357_v53 = vsel %vm788_vm2, %v1351_v62, %v1329_v49 }
 0x312   : > { %1804 = vmatpush.msrb.mxu2 %v2670_v1 }
 0x314   : > { %v1331_v0 = vpop.permute.xlu1 %1330 }
 0x315   : > { %1425 = vmatmul.f32.gmra.mxu3 %v1357_v53  ;;  %1521 = vmatmul.f32.gmra.mxu0 %v1357_v53  ;;  %v1458_v46 = vpop.f32.mrf.mxu2 }
 0x317   : > { %v1307_v2 = vpop.permute.xlu0 %1306 }
 0x318   : > { %v1352_v5 = vsel %vm781_vm1, %v1346_v3, %v1307_v2  ;;  %v1557_v39 = vpop.f32.mrf.mxu1 }
 0x319   : > { %v1358_v9 = vsel %vm788_vm2, %v1352_v5, %v1331_v0 }
 0x31c   : > { %v1333_v55 = vpop.permute.xlu1 %1332 }
 0x31d   : > { %1428 = vmatmul.f32.gmra.mxu3 %v1358_v9  ;;  %1524 = vmatmul.f32.gmra.mxu0 %v1358_v9 }
 0x31e   : > { %v1461_v5 = vpop.f32.mrf.mxu2 }
 0x31f   : > { %v1309_v18 = vpop.permute.xlu0 %1308 }
 0x320   : > { %v1353_v12 = vsel %vm781_vm1, %v1347_v26, %v1309_v18  ;;  %v1560_v48 = vpop.f32.mrf.mxu1 }
 0x321   : > { %v1359_v15 = vsel %vm788_vm2, %v1353_v12, %v1333_v55 }
 0x324   : > { %v1335_v19 = vpop.permute.xlu1 %1334 }
 0x325   : > { %1431 = vmatmul.f32.gmra.mxu3 %v1359_v15  ;;  %1527 = vmatmul.f32.gmra.mxu0 %v1359_v15 }
 0x326   : > { %v1464_v45 = vpop.f32.mrf.mxu2 }
 0x327   : > { %v1311_v16 = vpop.permute.xlu0 %1310 }
 0x328   : > { %v1354_v40 = vsel %vm781_vm1, %v1348_v36, %v1311_v16  ;;  %v1563_v18 = vpop.f32.mrf.mxu1 }
 0x329   : > { %v1360_v20 = vsel %vm788_vm2, %v1354_v40, %v1335_v19 }
 0x32c   : > { %v1337_v52 = vpop.permute.xlu1 %1336 }
 0x32d   : > { %1434 = vmatmul.f32.gmra.mxu3 %v1360_v20  ;;  %1530 = vmatmul.f32.gmra.mxu0 %v1360_v20 }
 0x32f   : > { %v1313_v33 = vpop.permute.xlu0 %1312 }
 0x330   : > { %v1355_v25 = vsel %vm781_vm1, %v1349_v24, %v1313_v33  ;;  %v1566_v34 = vpop.f32.mrf.mxu1 }
 0x331   : > { %v1361_v21 = vsel %vm788_vm2, %v1355_v25, %v1337_v52 }
 0x335   : > { %1437 = vmatmul.f32.gmra.mxu3 %v1361_v21  ;;  %1533 = vmatmul.f32.gmra.mxu0 %v1361_v21 }
 0x38a   : > { %v1519_v31 = vpop.f32.mrf.mxu0 }
 0x38b   : > { %v1520_v57 = vadd.f32 %v3842_v60, %v1519_v31 }
 0x38d   : > { %v1555_v17 = vadd.f32 %v1554_v42, %v1520_v57 }
 0x38f   : > { %v2653_v8 = vmul.f32 -1.442695, %v1555_v17 }
 0x390   : > { %v1423_v43 = vpop.f32.mrf.mxu3 }
 0x391   : > { %2906 = vpow2.f32 %v2653_v8  ;;  %v1424_v2 = vadd.f32 %v3867_v54, %v1423_v43 }
 0x392   : > { %v1522_v44 = vpop.f32.mrf.mxu0 }
 0x393   : > { %v1523_v61 = vadd.f32 %v3842_v60, %v1522_v44  ;;  %v1459_v11 = vadd.f32 %v1458_v46, %v1424_v2 }
 0x395   : > { %v1558_v47 = vadd.f32 %v1557_v39, %v1523_v61 }
 0x397   : > { %v2907_v49 = vpop.eup %2906  ;;  %v2654_v7 = vmul.f32 -1.442695, %v1558_v47 }
 0x398   : > { %v1596_v30 = vadd.f32 1.0, %v2907_v49  ;;  %v1426_v62 = vpop.f32.mrf.mxu3 }
 0x399   : > { %2908 = vpow2.f32 %v2654_v7  ;;  %v1427_v19 = vadd.f32 %v3867_v54, %v1426_v62 }
 0x39a   : > { %2910 = vrcp.f32 %v1596_v30  ;;  %v1525_v53 = vpop.f32.mrf.mxu0  ;;  %v1613_v36 = vand.u32 2147483648, %v1596_v30  ;;  %v1611_v20 = vand.u32 2147483647, %v1596_v30  ;;  %vm1607_vm15 = vweird.f32 %v1596_v30 }
 0x39b   : > { %v1526_v0 = vadd.f32 %v3842_v60, %v1525_v53  ;;  %v1462_v42 = vadd.f32 %v1461_v5, %v1427_v19 }
 0x39c   : > { %v1614_v21 = vor.u32 1.1754944e-38, %v1613_v36  ;;  %vm1612_vm4 = vcmp.eq.f32.partialorder %v1611_v20, 8.507059e+37 }
 0x39d   : > { %v1561_v3 = vadd.f32 %v1560_v48, %v1526_v0 }
 0x39f   : > { %v2909_v58 = vpop.eup %2908  ;;  %v2655_v9 = vmul.f32 -1.442695, %v1561_v3 }
 0x3a0   : > { %v2911_v55 = vpop.eup %2910  ;;  %v1597_v32 = vadd.f32 1.0, %v2909_v58  ;;  %v1429_v15 = vpop.f32.mrf.mxu3 }
 0x3a1   : > { %v1603_v26 = vmul.f32 %v2911_v55, %v1596_v30  ;;  %2912 = vpow2.f32 %v2655_v9  ;;  %vm1608_vm14 = vweird.f32 %v2911_v55  ;;  %v1430_v43 = vadd.f32 %v3867_v54, %v1429_v15 }
 0x3a2   : > { %2914 = vrcp.f32 %v1597_v32  ;;  %v1528_v12 = vpop.f32.mrf.mxu0  ;;  %vm1609_vm3 = vmor %vm1607_vm15, %vm1608_vm14  ;;  %v1628_v44 = vand.u32 2147483648, %v1597_v32  ;;  %v1626_v48 = vand.u32 2147483647, %v1597_v32  ;;  %vm1622_vm6 = vweird.f32 %v1597_v32 }
 0x3a3   : > { %v1604_v13 = vsub.f32 1.0, %v1603_v26  ;;  %v1529_v16 = vadd.f32 %v3842_v60, %v1528_v12  ;;  %2916 = vtanh.f32 %v1459_v11  ;;  %v1465_v53 = vadd.f32 %v1464_v45, %v1430_v43  ;;  %v1569_v12 = vpop.f32.mrf.mxu1 }
 0x3a4   : > { %v1629_v2 = vor.u32 1.1754944e-38, %v1628_v44  ;;  %vm1627_vm8 = vcmp.eq.f32.partialorder %v1626_v48, 8.507059e+37 }
 0x3a5   : > { %v1605_v40 = vmul.f32 %v2911_v55, %v1604_v13  ;;  %v1564_v22 = vadd.f32 %v1563_v18, %v1529_v16  ;;  %v1467_v18 = vpop.f32.mrf.mxu2 }
 0x3a7   : > { %v2913_v33 = vpop.eup %2912  ;;  %v1606_v24 = vadd.f32 %v2911_v55, %v1605_v40  ;;  %v2656_v25 = vmul.f32 -1.442695, %v1564_v22 }
 0x3a8   : > { %v2915_v52 = vpop.eup %2914  ;;  %v3873_v27 = vadd.f32 1.0, %v2913_v33  ;;  %v1432_v61 = vpop.f32.mrf.mxu3 }
 0x3a9   : > { %v1610_v31 = vsel %vm1609_vm3, %v2911_v55, %v1606_v24  ;;  %2918 = vpow2.f32 %v2656_v25  ;;  %v1618_v57 = vmul.f32 %v2915_v52, %v1597_v32  ;;  %v2917_v63 = vpop.eup %2916  ;;  %vm1623_vm5 = vweird.f32 %v2915_v52 }
 0x3aa   : > { %v1615_v38 = vsel %vm1612_vm4, %v1614_v21, %v1610_v31  ;;  %2920 = vrcp.f32 %v3873_v27  ;;  %v1531_v39 = vpop.f32.mrf.mxu0  ;;  %vm1624_vm7 = vmor %vm1622_vm6, %vm1623_vm5  ;;  %v1433_v13 = vadd.f32 %v3867_v54, %v1432_v61  ;;  %v1643_v15 = vand.u32 2147483648, %v3873_v27 }
 0x3ab   : > { %v1692_v17 = vmul.f32 %v2917_v63, %v1615_v38  ;;  %v1532_v1 = vadd.f32 %v3842_v60, %v1531_v39  ;;  %v1619_v8 = vsub.f32 1.0, %v1618_v57  ;;  %2922 = vtanh.f32 %v1462_v42 }
 0x3ac   : > { %v1641_v19 = vand.u32 2147483647, %v3873_v27  ;;  %vm1637_vm10 = vweird.f32 %v3873_v27  ;;  %v1468_v24 = vadd.f32 %v1467_v18, %v1433_v13 }
 0x3ad   : > { %v1567_v46 = vadd.f32 %v1566_v34, %v1532_v1  ;;  %2664 = vmatmul.msk.f32.vlgmr.msra.gmra.mxu3 %vm664_vm0, %v1692_v17  ;;  %2675 = vmatmul.msk.f32.vlgmr.msrb.gmra.mxu2 %vm664_vm0, %v1692_v17  ;;  %v1620_v47 = vmul.f32 %v2915_v52, %v1619_v8  ;;  %v1470_v38 = vpop.f32.mrf.mxu2 }
 0x3ae   : > { %vm1642_vm12 = vcmp.eq.f32.partialorder %v1641_v19, 8.507059e+37 }
 0x3af   : > { %v2919_v49 = vpop.eup %2918  ;;  %v2657_v7 = vmul.f32 -1.442695, %v1567_v46  ;;  %v1621_v30 = vadd.f32 %v2915_v52, %v1620_v47 }
 0x3b0   : > { %v2921_v62 = vpop.eup %2920  ;;  %v3880_v0 = vadd.f32 1.0, %v2919_v49  ;;  %v1435_v20 = vpop.f32.mrf.mxu3 }
 0x3b1   : > { %2924 = vpow2.f32 %v2657_v7  ;;  %v1625_v3 = vsel %vm1624_vm7, %v2915_v52, %v1621_v30  ;;  %v1633_v58 = vmul.f32 %v2921_v62, %v3873_v27  ;;  %v2923_v5 = vpop.eup %2922  ;;  %vm1638_vm9 = vweird.f32 %v2921_v62 }
 0x3b2   : > { %2926 = vrcp.f32 %v3880_v0  ;;  %v1534_v9 = vpop.f32.mrf.mxu0  ;;  %v1630_v55 = vsel %vm1627_vm8, %v1629_v2, %v1625_v3  ;;  %vm1639_vm11 = vmor %vm1637_vm10, %vm1638_vm9  ;;  %v1644_v52 = vor.u32 1.1754944e-38, %v1643_v15  ;;  %v1436_v34 = vadd.f32 %v3867_v54, %v1435_v20 }
 0x3b3   : > { %v1535_v11 = vadd.f32 %v3842_v60, %v1534_v9  ;;  %v1693_v32 = vmul.f32 %v2923_v5, %v1630_v55  ;;  %v1634_v26 = vsub.f32 1.0, %v1633_v58  ;;  %2928 = vtanh.f32 %v1465_v53 }
 0x3b4   : > { %v1658_v27 = vand.u32 2147483648, %v3880_v0  ;;  %v1656_v17 = vand.u32 2147483647, %v3880_v0  ;;  %vm1652_vm14 = vweird.f32 %v3880_v0  ;;  %v1471_v44 = vadd.f32 %v1470_v38, %v1436_v34  ;;  %v3932_v34 = vld [vmem:[%s4302_s10 + $0x1] ss:$0 sm:$0xff] }
 0x3b5   : > { %v1570_v16 = vadd.f32 %v1569_v12, %v1535_v11  ;;  %2665 = vmatmul.msk.f32.gmra.mxu3 %vm664_vm0, %v1693_v32  ;;  %2676 = vmatmul.msk.f32.gmra.mxu2 %vm664_vm0, %v1693_v32  ;;  %v1635_v36 = vmul.f32 %v2921_v62, %v1634_v26  ;;  %v1473_v5 = vpop.f32.mrf.mxu2 }
 0x3b6   : > { %v1659_v46 = vor.u32 1.1754944e-38, %v1658_v27  ;;  %vm1657_vm3 = vcmp.eq.f32.partialorder %v1656_v17, 8.507059e+37 }
 0x3b7   : > { %v2925_v40 = vpop.eup %2924  ;;  %v2658_v60 = vmul.f32 -1.442695, %v1570_v16  ;;  %v1636_v22 = vadd.f32 %v2921_v62, %v1635_v36 }
 0x3b8   : > { %v2927_v33 = vpop.eup %2926  ;;  %v1600_v25 = vadd.f32 1.0, %v2925_v40  ;;  %v1438_v47 = vpop.f32.mrf.mxu3 }
 0x3b9   : > { %2930 = vpow2.f32 %v2658_v60  ;;  %v1640_v21 = vsel %vm1639_vm11, %v2921_v62, %v1636_v22  ;;  %v1648_v42 = vmul.f32 %v2927_v33, %v3880_v0  ;;  %v2929_v45 = vpop.eup %2928  ;;  %vm1653_vm13 = vweird.f32 %v2927_v33 }
 0x3ba   : > { %2932 = vrcp.f32 %v1600_v25  ;;  %v1645_v31 = vsel %vm1642_vm12, %v1644_v52, %v1640_v21  ;;  %vm1654_vm15 = vmor %vm1652_vm14, %vm1653_vm13  ;;  %v1439_v2 = vadd.f32 %v3867_v54, %v1438_v47  ;;  %v1673_v3 = vand.u32 2147483648, %v1600_v25  ;;  %v2727_v52 = vld [vmem:[%s4297_s5 + $0x1d8] sm:$0xff]  ;;  %v2699_v21 = vld [vmem:[%s4296_s4 + $0x1d0] sm:$0xff] }
 0x3bb   : > { %v1694_v57 = vmul.f32 %v2929_v45, %v1645_v31  ;;  %v1649_v63 = vsub.f32 1.0, %v1648_v42  ;;  %2934 = vtanh.f32 %v1468_v24  ;;  %v1671_v58 = vand.u32 2147483647, %v1600_v25  ;;  %2104 = vmatpush.msra.mxu2 %v2727_v52  ;;  %v2726_v42 = vld [vmem:[%s4297_s5 + $0x1d0] sm:$0xff]  ;;  %v2698_v45 = vld [vmem:[%s4296_s4 + $0x1c8] sm:$0xff] }
 0x3bc   : > { %vm1667_vm5 = vweird.f32 %v1600_v25  ;;  %v1474_v18 = vadd.f32 %v1473_v5, %v1439_v2  ;;  %v1674_v11 = vor.u32 1.1754944e-38, %v1673_v3  ;;  %v2725_v31 = vld [vmem:[%s4297_s5 + $0x1c8] sm:$0xff] }
 0x3bd   : > { %2666 = vmatmul.msk.f32.gmra.mxu3 %vm664_vm0, %v1694_v57  ;;  %2677 = vmatmul.msk.f32.gmra.mxu2 %vm664_vm0, %v1694_v57  ;;  %v1650_v39 = vmul.f32 %v2927_v33, %v1649_v63  ;;  %vm1672_vm7 = vcmp.eq.f32.partialorder %v1671_v58, 8.507059e+37  ;;  %v2697_v57 = vld [vmem:[%s4296_s4 + $0x1c0] sm:$0xff] }
 0x3be   : > { %2105 = vmatpush.msra.mxu2 %v2726_v42  ;;  %v2724_v63 = vld [vmem:[%s4297_s5 + $0x1c0] sm:$0xff]  ;;  %v2718_v42 = vld [vmem:[%s4297_s5 + $0x190] sm:$0xff] }
 0x3bf   : > { %v2931_v1 = vpop.eup %2930  ;;  %v1651_v8 = vadd.f32 %v2927_v33, %v1650_v39 }
 0x3c0   : > { %v2933_v43 = vpop.eup %2932  ;;  %v1601_v61 = vadd.f32 1.0, %v2931_v1  ;;  %2106 = vmatpush.msra.mxu2 %v2725_v31 }
 0x3c1   : > { %v1655_v48 = vsel %vm1654_vm15, %v2927_v33, %v1651_v8  ;;  %v1663_v49 = vmul.f32 %v2933_v43, %v1600_v25  ;;  %v2935_v7 = vpop.eup %2934  ;;  %vm1668_vm4 = vweird.f32 %v2933_v43  ;;  %v2700_v25 = vld [vmem:[%s4296_s4 + $0x1d8] sm:$0xff] }
 0x3c2   : > { %2936 = vrcp.f32 %v1601_v61  ;;  %v1660_v30 = vsel %vm1657_vm3, %v1659_v46, %v1655_v48  ;;  %vm1669_vm6 = vmor %vm1667_vm5, %vm1668_vm4  ;;  %v1688_v16 = vand.u32 2147483648, %v1601_v61  ;;  %v1686_v19 = vand.u32 2147483647, %v1601_v61  ;;  %2008 = vmatpush.msra.mxu1 %v2700_v25  ;;  %2107 = vmatpush.msra.mxu2 %v2724_v63  ;;  %v2862_v46 = vld [vmem:[%s4303_s11] ss:$0 sm:$0xff]  ;;  %v2719_v25 = vld [vmem:[%s4297_s5 + $0x198] sm:$0xff] }
 0x3c3   : > { %v1695_v62 = vmul.f32 %v2935_v7, %v1660_v30  ;;  %v1664_v53 = vsub.f32 1.0, %v1663_v49  ;;  %2938 = vtanh.f32 %v1471_v44  ;;  %vm1682_vm9 = vweird.f32 %v1601_v61 }
 0x3c4   : > { %2940 = vtanh.f32 %v1474_v18  ;;  %v1689_v20 = vor.u32 1.1754944e-38, %v1688_v16  ;;  %vm1687_vm11 = vcmp.eq.f32.partialorder %v1686_v19, 8.507059e+37  ;;  %2009 = vmatpush.msra.mxu1 %v2699_v21  ;;  %v1239_v5 = vadd.f32 %v2862_v46, %v3718_v59  ;;  %v2696_v19 = vld [vmem:[%s4296_s4 + $0x1b8] sm:$0xff]  ;;  %v2693_v21 = vld [vmem:[%s4296_s4 + $0x1a0] sm:$0xff] }
 0x3c5   : > { %2667 = vmatmul.msk.f32.gmra.mxu3 %vm664_vm0, %v1695_v62  ;;  %2678 = vmatmul.msk.f32.gmra.mxu2 %vm664_vm0, %v1695_v62  ;;  %v1665_v0 = vmul.f32 %v2933_v43, %v1664_v53 }
 0x3c6   : > { %2010 = vmatpush.msra.mxu1 %v2698_v45  ;;  %1961 = vmatpush.msrb.mxu0 %v2696_v19 }
 0x3c7   : > { %v1666_v9 = vadd.f32 %v2933_v43, %v1665_v0 }
 0x3c8   : > { %v2937_v55 = vpop.eup %2936  ;;  %2011 = vmatpush.msra.mxu1 %v2697_v57 }
 0x3c9   : > { %v1670_v32 = vsel %vm1669_vm6, %v2933_v43, %v1666_v9  ;;  %v1678_v26 = vmul.f32 %v2937_v55, %v1601_v61  ;;  %v2939_v12 = vpop.eup %2938  ;;  %vm1683_vm8 = vweird.f32 %v2937_v55 }
 0x3ca   : > { %v1675_v54 = vsel %vm1672_vm7, %v1674_v11, %v1670_v32  ;;  %vm1684_vm10 = vmor %vm1682_vm9, %vm1683_vm8  ;;  %v2941_v22 = vpop.eup %2940 }
 0x3cb   : > { %v1696_v13 = vmul.f32 %v2939_v12, %v1675_v54  ;;  %v1679_v15 = vsub.f32 1.0, %v1678_v26 }
 0x3cd   : > { %2668 = vmatmul.msk.f32.gmra.mxu3 %vm664_vm0, %v1696_v13  ;;  %2679 = vmatmul.msk.f32.gmra.mxu2 %vm664_vm0, %v1696_v13  ;;  %v1680_v36 = vmul.f32 %v2937_v55, %v1679_v15  ;;  %v2723_v13 = vld [vmem:[%s4297_s5 + $0x1b8] sm:$0xff]  ;;  %v2722_v15 = vld [vmem:[%s4297_s5 + $0x1b0] sm:$0xff] }
 0x3ce   : > { %2057 = vmatpush.msrb.mxu3 %v2723_v13 }
 0x3cf   : > { %v1681_v40 = vadd.f32 %v2937_v55, %v1680_v36  ;;  %v2721_v36 = vld [vmem:[%s4297_s5 + $0x1a8] sm:$0xff] }
 0x3d0   : > { %2058 = vmatpush.msrb.mxu3 %v2722_v15 }
 0x3d1   : > { %v1685_v60 = vsel %vm1684_vm10, %v2937_v55, %v1681_v40  ;;  %v2695_v40 = vld [vmem:[%s4296_s4 + $0x1b0] sm:$0xff] }
 0x3d2   : > { %v1690_v33 = vsel %vm1687_vm11, %v1689_v20, %v1685_v60  ;;  %2059 = vmatpush.msrb.mxu3 %v2721_v36  ;;  %1962 = vmatpush.msrb.mxu0 %v2695_v40  ;;  %v1836_v40 = vld [vmem:[#allocation3 + $0x38] sm:$0xff] }
 0x3d3   : > { %v1697_v24 = vmul.f32 %v2941_v22, %v1690_v33 }
 0x3d5   : > { %2669 = vmatmul.msk.f32.gmra.mxu3 %vm664_vm0, %v1697_v24  ;;  %2680 = vmatmul.msk.f32.gmra.mxu2 %vm664_vm0, %v1697_v24 }
 0x430   : > { %v1743_v27 = vpop.f32.mrf.mxu3  ;;  %v1806_v38 = vpop.f32.mrf.mxu2 }
 0x431   : > { %v1744_v39 = vadd.f32 %v3932_v34, %v1743_v27 }
 0x433   : > { %v1761_v17 = vadd.f32 %v1744_v39, %v3627_v4  ;;  %v2866_v4 = vld [vmem:[%s4303_s11 + $0x1] ss:$0 sm:$0xff] }
 0x435   : > { %v1767_v1 = vmul.f32 %v1761_v17, %v3286_v29  ;;  %v2692_v17 = vld [vmem:[%s4296_s4 + $0x198] sm:$0xff] }
 0x437   : > { %1773 = vst.msk [vmem:[#allocation3 + $0x8] sm:$0xff] %vm664_vm0, %v1767_v1  ;;  %v2691_v1 = vld [vmem:[%s4296_s4 + $0x190] sm:$0xff] }
 0x438   : > { %v1746_v8 = vpop.f32.mrf.mxu3  ;;  %v1808_v43 = vpop.f32.mrf.mxu2 }
 0x439   : > { %v1747_v44 = vadd.f32 %v3932_v34, %v1746_v8  ;;  %v2714_v8 = vld [vmem:[%s4297_s5 + $0x170] sm:$0xff]  ;;  %v2713_v43 = vld [vmem:[%s4297_s5 + $0x168] sm:$0xff] }
 0x43b   : > { %v1762_v61 = vadd.f32 %v1747_v44, %v3633_v10  ;;  %v1236_v10 = vadd.f32 %v2862_v46, %v3715_v50  ;;  %v2690_v44 = vld [vmem:[%s4296_s4 + $0x188] sm:$0xff]  ;;  %v2688_v46 = vld [vmem:[%s4296_s4 + $0x178] sm:$0xff] }
 0x43d   : > { %v1768_v47 = vmul.f32 %v1762_v61, %v3295_v35  ;;  %v2689_v61 = vld [vmem:[%s4296_s4 + $0x180] sm:$0xff] }
 0x43e   : > { %v3947_v48 = vld [vmem:[#allocation3 + $0x8] sm:$0xff] }
 0x43f   : > { %1774 = vst.msk [vmem:[#allocation3 + $0x10] sm:$0xff] %vm664_vm0, %v1768_v47  ;;  %1867 = vrot.lane.b32.xlu0 %v3947_v48, %s4334_s22  ;;  %v1828_v0 = vld [vmem:[#allocation3 + $0x4] sm:$0xff] }
 0x440   : > { %v1749_v29 = vpop.f32.mrf.mxu3  ;;  %v1810_v49 = vpop.f32.mrf.mxu2  ;;  %v2712_v47 = vld [vmem:[%s4297_s5 + $0x160] sm:$0xff] }
 0x441   : > { %v1750_v7 = vadd.f32 %v3932_v34, %v1749_v29  ;;  %v1811_v30 = vadd.f32 %v2866_v4, %v1810_v49  ;;  %v2711_v29 = vld [vmem:[%s4297_s5 + $0x158] sm:$0xff]  ;;  %v2686_v49 = vld [vmem:[%s4296_s4 + $0x168] sm:$0xff] }
 0x443   : > { %v1763_v35 = vadd.f32 %v1750_v7, %v3640_v14  ;;  %v3955_v62 = vadd.f32 %v1811_v30, %v1236_v10  ;;  %v2685_v10 = vld [vmem:[%s4296_s4 + $0x160] sm:$0xff]  ;;  %v2710_v7 = vld [vmem:[%s4297_s5 + $0x150] sm:$0xff]  ;;  %v2684_v30 = vld [vmem:[%s4296_s4 + $0x158] sm:$0xff] }
 0x445   : > { %v1769_v53 = vmul.f32 %v1763_v35, %v3302_v37  ;;  %v2709_v35 = vld [vmem:[%s4297_s5 + $0x148] sm:$0xff] }
 0x446   : > { %v3958_v2 = vld [vmem:[#allocation3 + $0x10] sm:$0xff] }
 0x447   : > { %v1829_v3 = vld [vmem:[#allocation3 + $0xc] sm:$0xff]  ;;  %1775 = vst.msk [vmem:[#allocation3 + $0x18] sm:$0xff] %vm664_vm0, %v1769_v53  ;;  %2702 = vmatmul.msk.f32.vlgmr.msra.gmra.mxu1 %vm664_vm0, %v3958_v2  ;;  %2729 = vmatmul.msk.f32.vlgmr.msra.gmra.mxu2 %vm664_vm0, %v3958_v2 }
 0x448   : > { %v2853_v50 = vpack.i.bf16 %v1829_v3, %v1828_v0  ;;  %1886 = vrot.lane.b32.xlu1 %v1829_v3, %s4335_s19  ;;  %v1752_v14 = vpop.f32.mrf.mxu3  ;;  %v1813_v58 = vpop.f32.mrf.mxu2  ;;  %v2683_v53 = vld [vmem:[%s4296_s4 + $0x150] sm:$0xff]  ;;  %v2708_v3 = vld [vmem:[%s4297_s5 + $0x140] sm:$0xff]  ;;  %v2682_v0 = vld [vmem:[%s4296_s4 + $0x148] sm:$0xff] }
 0x449   : > { %v1753_v9 = vadd.f32 %v3932_v34, %v1752_v14  ;;  %v1814_v55 = vadd.f32 %v2866_v4, %v1813_v58  ;;  %v2687_v4 = vld [vmem:[%s4296_s4 + $0x170] sm:$0xff] }
 0x44a   : > { %2854 = vrot.lane.b32.xlu2 %v2853_v50, %s4336_s17  ;;  %v2681_v50 = vld [vmem:[%s4296_s4 + $0x140] sm:$0xff] }
 0x44b   : > { %v1764_v18 = vadd.f32 %v1753_v9, %v3654_v23  ;;  %v3970_v11 = vadd.f32 %v1814_v55, %v1239_v5  ;;  %v1822_v5 = vld [vmem:[#allocation3] sm:$0xff] }
 0x44d   : > { %v1770_v32 = vmul.f32 %v1764_v18, %v3318_v51 }
 0x44e   : > { %v3973_v26 = vld [vmem:[#allocation3 + $0x18] sm:$0xff] }
 0x44f   : > { %v1830_v12 = vld [vmem:[#allocation3 + $0x14] sm:$0xff]  ;;  %1776 = vst.msk [vmem:[#allocation3 + $0x20] sm:$0xff] %vm664_vm0, %v1770_v32  ;;  %2703 = vmatmul.msk.f32.gmra.mxu1 %vm664_vm0, %v3973_v26  ;;  %2730 = vmatmul.msk.f32.gmra.mxu2 %vm664_vm0, %v3973_v26 }
 0x450   : > { %1847 = vrot.lane.b32.xlu1 %v1830_v12, %s4336_s17  ;;  %1888 = vrot.lane.b32.xlu0 %v1830_v12, %s4335_s19  ;;  %v1755_v23 = vpop.f32.mrf.mxu3  ;;  %v1816_v59 = vpop.f32.mrf.mxu2 }
 0x451   : > { %v1756_v54 = vadd.f32 %v3932_v34, %v1755_v23 }
 0x452   : > { %1869 = vrot.lane.b32.xlu2 %v3958_v2, %s4334_s22 }
 0x453   : > { %v1765_v16 = vadd.f32 %v1756_v54, %v3669_v28  ;;  %v2720_v28 = vld [vmem:[%s4297_s5 + $0x1a0] sm:$0xff] }
 0x454   : > { %2060 = vmatpush.msrb.mxu3 %v2720_v28 }
 0x455   : > { %v1771_v20 = vmul.f32 %v1765_v16, %v3330_v56  ;;  %v2694_v56 = vld [vmem:[%s4296_s4 + $0x1a8] sm:$0xff] }
 0x456   : > { %v4002_v60 = vld [vmem:[#allocation3 + $0x20] sm:$0xff]  ;;  %1963 = vmatpush.msrb.mxu0 %v2694_v56  ;;  %2061 = vmatpush.msrb.mxu3 %v2719_v25 }
 0x457   : > { %v1831_v22 = vld [vmem:[#allocation3 + $0x1c] sm:$0xff]  ;;  %1777 = vst.msk [vmem:[#allocation3 + $0x28] sm:$0xff] %vm664_vm0, %v1771_v20  ;;  %2704 = vmatmul.msk.f32.gmra.mxu1 %vm664_vm0, %v4002_v60  ;;  %2731 = vmatmul.msk.f32.gmra.mxu2 %vm664_vm0, %v4002_v60 }
 0x458   : > { %1849 = vrot.lane.b32.xlu1 %v1831_v22, %s4336_s17  ;;  %1890 = vrot.lane.b32.xlu0 %v1831_v22, %s4335_s19  ;;  %v1758_v33 = vpop.f32.mrf.mxu3  ;;  %v1818_v24 = vpop.f32.mrf.mxu2 }
 0x459   : > { %v1759_v52 = vadd.f32 %v3932_v34, %v1758_v33  ;;  %1964 = vmatpush.msrb.mxu0 %v2693_v21  ;;  %2062 = vmatpush.msrb.mxu3 %v2718_v42  ;;  %v2717_v34 = vld [vmem:[%s4297_s5 + $0x188] sm:$0xff]  ;;  %v2744_v33 = vld [vmem:[%s4301_s9 + $0x58] sm:$0xff] }
 0x45a   : > { %1871 = vrot.lane.b32.xlu2 %v3973_v26, %s4334_s22 }
 0x45b   : > { %v1766_v45 = vadd.f32 %v1759_v52, %v3684_v41  ;;  %2063 = vmatpush.msrb.mxu3 %v2717_v34  ;;  %v2715_v41 = vld [vmem:[%s4297_s5 + $0x178] sm:$0xff]  ;;  %1965 = vmatpush.msrb.mxu0 %v2692_v17 }
 0x45d   : > { %v1772_v31 = vmul.f32 %v1766_v45, %v3351_v6  ;;  %v2716_v6 = vld [vmem:[%s4297_s5 + $0x180] sm:$0xff]  ;;  %1966 = vmatpush.msrb.mxu0 %v2691_v1 }
 0x45e   : > { %v4031_v57 = vld [vmem:[#allocation3 + $0x28] sm:$0xff]  ;;  %2064 = vmatpush.msrb.mxu3 %v2716_v6 }
 0x45f   : > { %v1832_v63 = vld [vmem:[#allocation3 + $0x24] sm:$0xff]  ;;  %1778 = vst.msk [vmem:[#allocation3 + $0x30] sm:$0xff] %vm664_vm0, %v1772_v31  ;;  %2705 = vmatmul.msk.f32.gmra.mxu1 %vm664_vm0, %v4031_v57  ;;  %2732 = vmatmul.msk.f32.gmra.mxu2 %vm664_vm0, %v4031_v57 }
 0x460   : > { %1851 = vrot.lane.b32.xlu1 %v1832_v63, %s4336_s17  ;;  %1892 = vrot.lane.b32.xlu0 %v1832_v63, %s4335_s19 }
 0x461   : > { %2065 = vmatpush.msrb.mxu3 %v2715_v41  ;;  %1967 = vmatpush.msrb.mxu0 %v2690_v44 }
 0x462   : > { %1873 = vrot.lane.b32.xlu2 %v4002_v60, %s4334_s22 }
 0x463   : > { %2066 = vmatpush.msrb.mxu3 %v2714_v8  ;;  %1968 = vmatpush.msrb.mxu0 %v2689_v61  ;;  %v2742_v8 = vld [vmem:[%s4301_s9 + $0x48] sm:$0xff] }
 0x465   : > { %2067 = vmatpush.msrb.mxu3 %v2713_v43  ;;  %1969 = vmatpush.msrb.mxu0 %v2688_v46 }
 0x466   : > { %v1834_v27 = vld [vmem:[#allocation3 + $0x30] sm:$0xff] }
 0x467   : > { %v1833_v38 = vld [vmem:[#allocation3 + $0x2c] sm:$0xff]  ;;  %2706 = vmatmul.msk.f32.gmra.mxu1 %vm664_vm0, %v1834_v27  ;;  %2733 = vmatmul.msk.f32.gmra.mxu2 %vm664_vm0, %v1834_v27  ;;  %v1835_v39 = vld [vmem:[#allocation3 + $0x34] sm:$0xff] }
 0x468   : > { %1853 = vrot.lane.b32.xlu1 %v1833_v38, %s4336_s17  ;;  %1894 = vrot.lane.b32.xlu0 %v1833_v38, %s4335_s19  ;;  %s4337_s17 = smul.u32 48, %s3054_s16  ;;  %s4338_s16 = sand.u32 1, %s3046_s30  }
 0x469   : > { %2068 = vmatpush.msrb.mxu3 %v2712_v47  ;;  %1970 = vmatpush.msrb.mxu0 %v2687_v4  ;;  %v2741_v47 = vld [vmem:[%s4301_s9 + $0x40] sm:$0xff]  ;;  %s2415_s1 = scalar_lea.sflag [#allocation6], %s4338_s16 }
 0x46a   : > { %1875 = vrot.lane.b32.xlu2 %v4031_v57, %s4334_s22 }
 0x46b   : > { %2069 = vmatpush.msrb.mxu3 %v2711_v29  ;;  %1971 = vmatpush.msrb.mxu0 %v2686_v49 }
 0x46d   : > { %1972 = vmatpush.msrb.mxu0 %v2685_v10  ;;  %2070 = vmatpush.msrb.mxu3 %v2710_v7 }
 0x46f   : > { %1973 = vmatpush.msrb.mxu0 %v2684_v30  ;;  %2071 = vmatpush.msrb.mxu3 %v2709_v35 }
 0x470   : > { %1896 = vrot.lane.b32.xlu0 %v1835_v39, %s4335_s19  ;;  %2707 = vmatmul.msk.f32.gmra.mxu1 %vm664_vm0, %v1836_v40  ;;  %s2429_s19 = scalar_lea.hbm %s4306_s14, %s4337_s17 }
 0x471   : > { %1974 = vmatpush.msrb.mxu0 %v2683_v53  ;;  %2072 = vmatpush.msrb.mxu3 %v2708_v3  ;;  %s2432_s20 = sshll.u32 %s2429_s19, 4  ;;  %s2433_s20 = int_to_ptr.hbm [resolvable:$true] %s2432_s20 }
 0x472   : > { %1877 = vrot.lane.b32.xlu2 %v1834_v27, %s4334_s22  ;;  %2734 = vmatmul.msk.f32.gmra.mxu2 %vm664_vm0, %v1836_v40  ;;  %s2430_s22 = sshll.u32 %s3217_s27, 4  ;;  %s2996_s2 = sshra.s32 %s2433_s20, 4  ;;  %s2431_s22 = int_to_ptr.vmem [resolvable:$true] %s2430_s22  ;;  %s2997_s2 = int_to_ptr.hbm [resolvable:$true] %s2996_s2 }
 0x473   : > { %1975 = vmatpush.msrb.mxu0 %v2682_v0  ;;  %v4163_v0 = vld [vmem:[%s4298_s6 + $0x2] ss:$0 sm:$0xff]  ;;  %p3003_p1 = scmp.lt.s32.totalorder %s2997_s2, %s4306_s14 }
 0x475   : > { %1976 = vmatpush.msrb.mxu0 %v2681_v50 }
 0x477   : > { %2293 = vmatpush.msra.mxu0 %v2744_v33 }
 0x4a4   : > { %v2855_v14 = vpop.permute.xlu2 %2854 }
 0x4a5   : > { %v2856_v58 = vunpack.i.l.bf16 %v2855_v14  ;;  %v2857_v59 = vunpack.i.h.bf16 %v2855_v14 }
 0x4a7   : > { %v1904_v18 = vsel %vm664_vm0, %v1822_v5, %v2856_v58  ;;  %v1905_v54 = vsel %vm664_vm0, %v3947_v48, %v2857_v59 }
 0x4ac   : > { %v1870_v55 = vpop.permute.xlu2 %1869 }
 0x4ad   : > { %v1911_v13 = vsel %vm781_vm1, %v1905_v54, %v1870_v55 }
 0x4b1   : > { %v1868_v9 = vpop.permute.xlu0 %1867 }
 0x4b2   : > { %v1910_v32 = vsel %vm781_vm1, %v1904_v18, %v1868_v9 }
 0x4b4   : > { %v1872_v36 = vpop.permute.xlu2 %1871 }
 0x4ba   : > { %v1887_v12 = vpop.permute.xlu1 %1886 }
 0x4bb   : > { %v1916_v23 = vsel %vm788_vm2, %v1910_v32, %v1887_v12 }
 0x4bc   : > { %1977 = vmatmul.f32.vlgmr.msrb.gmra.mxu0 %v1916_v23  ;;  %2073 = vmatmul.f32.vlgmr.msrb.gmra.mxu3 %v1916_v23  ;;  %v1874_v24 = vpop.permute.xlu2 %1873 }
 0x4c2   : > { %v1848_v15 = vpop.permute.xlu1 %1847  ;;  %v1889_v16 = vpop.permute.xlu0 %1888 }
 0x4c3   : > { %v1917_v19 = vsel %vm788_vm2, %v1911_v13, %v1889_v16  ;;  %v1906_v20 = vsel %vm664_vm0, %v3958_v2, %v1848_v15 }
 0x4c4   : > { %1980 = vmatmul.f32.gmra.mxu0 %v1917_v19  ;;  %2076 = vmatmul.f32.gmra.mxu3 %v1917_v19  ;;  %v1912_v48 = vsel %vm781_vm1, %v1906_v20, %v1872_v36  ;;  %v1876_v45 = vpop.permute.xlu2 %1875  ;;  %v2013_v7 = vpop.f32.mrf.mxu1 }
 0x4ca   : > { %v1850_v22 = vpop.permute.xlu1 %1849  ;;  %v1891_v28 = vpop.permute.xlu0 %1890 }
 0x4cb   : > { %v1918_v56 = vsel %vm788_vm2, %v1912_v48, %v1891_v28  ;;  %v1907_v25 = vsel %vm664_vm0, %v3973_v26, %v1850_v22  ;;  %v2109_v1 = vpop.f32.mrf.mxu2 }
 0x4cc   : > { %1983 = vmatmul.f32.gmra.mxu0 %v1918_v56  ;;  %2079 = vmatmul.f32.gmra.mxu3 %v1918_v56  ;;  %v1913_v2 = vsel %vm781_vm1, %v1907_v25, %v1874_v24  ;;  %v1878_v27 = vpop.permute.xlu2 %1877  ;;  %v2016_v32 = vpop.f32.mrf.mxu1 }
 0x4d2   : > { %v1852_v52 = vpop.permute.xlu1 %1851  ;;  %v1893_v21 = vpop.permute.xlu0 %1892 }
 0x4d3   : > { %v1919_v42 = vsel %vm788_vm2, %v1913_v2, %v1893_v21  ;;  %v1908_v31 = vsel %vm664_vm0, %v4002_v60, %v1852_v52  ;;  %v2743_v60 = vld [vmem:[%s4301_s9 + $0x50] sm:$0xff]  ;;  %v2112_v61 = vpop.f32.mrf.mxu2 }
 0x4d4   : > { %1986 = vmatmul.f32.gmra.mxu0 %v1919_v42  ;;  %2082 = vmatmul.f32.gmra.mxu3 %v1919_v42  ;;  %v1914_v34 = vsel %vm781_vm1, %v1908_v31, %v1876_v45  ;;  %v2019_v45 = vpop.f32.mrf.mxu1 }
 0x4d5   : > { %2294 = vmatpush.msra.mxu0 %v2743_v60 }
 0x4d7   : > { %2295 = vmatpush.msra.mxu0 %v2742_v8 }
 0x4d9   : > { %2296 = vmatpush.msra.mxu0 %v2741_v47 }
 0x4da   : > { %v1895_v63 = vpop.permute.xlu0 %1894  ;;  %v1854_v41 = vpop.permute.xlu1 %1853 }
 0x4db   : > { %v1920_v6 = vsel %vm788_vm2, %v1914_v34, %v1895_v63  ;;  %v1909_v26 = vsel %vm664_vm0, %v4031_v57, %v1854_v41  ;;  %v4153_v57 = vld [vmem:[%s4299_s7 + $0x2] ss:$0 sm:$0xff]  ;;  %v2115_v35 = vpop.f32.mrf.mxu2 }
 0x4dc   : > { %1989 = vmatmul.f32.gmra.mxu0 %v1920_v6  ;;  %2085 = vmatmul.f32.gmra.mxu3 %v1920_v6  ;;  %v1915_v39 = vsel %vm781_vm1, %v1909_v26, %v1878_v27 }
 0x4e2   : > { %v1897_v38 = vpop.permute.xlu0 %1896 }
 0x4e3   : > { %v1921_v17 = vsel %vm788_vm2, %v1915_v39, %v1897_v38  ;;  %v2118_v59 = vpop.f32.mrf.mxu2 }
 0x4e4   : > { %1992 = vmatmul.f32.gmra.mxu0 %v1921_v17  ;;  %2088 = vmatmul.f32.gmra.mxu3 %v1921_v17 }
 0x4eb   : > { %v2121_v6 = vpop.f32.mrf.mxu2 }
 0x539   : > { %v1978_v4 = vpop.f32.mrf.mxu0 }
 0x53a   : > { %v1979_v9 = vadd.f32 %v4163_v0, %v1978_v4 }
 0x53c   : > { %v2014_v54 = vadd.f32 %v2013_v7, %v1979_v9 }
 0x53f   : > { %v2074_v43 = vpop.f32.mrf.mxu3 }
 0x540   : > { %v2075_v44 = vadd.f32 %v4153_v57, %v2074_v43 }
 0x541   : > { %v1981_v14 = vpop.f32.mrf.mxu0 }
 0x542   : > { %v2110_v46 = vadd.f32 %v2109_v1, %v2075_v44  ;;  %v1982_v22 = vadd.f32 %v4163_v0, %v1981_v14  ;;  %v2022_v14 = vpop.f32.mrf.mxu1 }
 0x544   : > { %v2735_v29 = vmul.f32 -1.442695, %v2110_v46  ;;  %v2017_v21 = vadd.f32 %v2016_v32, %v1982_v22 }
 0x546   : > { %2942 = vpow2.f32 %v2735_v29 }
 0x547   : > { %v2077_v49 = vpop.f32.mrf.mxu3 }
 0x548   : > { %v2078_v10 = vadd.f32 %v4153_v57, %v2077_v49 }
 0x549   : > { %v1984_v19 = vpop.f32.mrf.mxu0 }
 0x54a   : > { %v2113_v30 = vadd.f32 %v2112_v61, %v2078_v10  ;;  %v1985_v17 = vadd.f32 %v4163_v0, %v1984_v19  ;;  %v2319_v19 = vld [vmem:[%s4304_s12 + $0x18] sm:$0xff] }
 0x54c   : > { %v2943_v53 = vpop.eup %2942  ;;  %v2736_v3 = vmul.f32 -1.442695, %v2113_v30  ;;  %v2020_v29 = vadd.f32 %v2019_v45, %v1985_v17 }
 0x54d   : > { %v2151_v50 = vadd.f32 1.0, %v2943_v53 }
 0x54e   : > { %2944 = vpow2.f32 %v2736_v3  ;;  %v2124_v3 = vpop.f32.mrf.mxu2 }
 0x54f   : > { %2946 = vrcp.f32 %v2151_v50  ;;  %v2080_v58 = vpop.f32.mrf.mxu3  ;;  %v2168_v20 = vand.u32 2147483648, %v2151_v50  ;;  %v2166_v56 = vand.u32 2147483647, %v2151_v50  ;;  %vm2162_vm2 = vweird.f32 %v2151_v50 }
 0x550   : > { %v2081_v5 = vadd.f32 %v4153_v57, %v2080_v58 }
 0x551   : > { %v2169_v42 = vor.u32 1.1754944e-38, %v2168_v20  ;;  %vm2167_vm13 = vcmp.eq.f32.partialorder %v2166_v56, 8.507059e+37  ;;  %v1987_v1 = vpop.f32.mrf.mxu0 }
 0x552   : > { %v2116_v55 = vadd.f32 %v2115_v35, %v2081_v5 }
 0x554   : > { %v2945_v18 = vpop.eup %2944  ;;  %v2737_v12 = vmul.f32 -1.442695, %v2116_v55  ;;  %v1988_v55 = vadd.f32 %v4163_v0, %v1987_v1 }
 0x555   : > { %v2947_v23 = vpop.eup %2946  ;;  %v2152_v13 = vadd.f32 1.0, %v2945_v18 }
 0x556   : > { %v2158_v15 = vmul.f32 %v2947_v23, %v2151_v50  ;;  %2948 = vpow2.f32 %v2737_v12  ;;  %vm2163_vm1 = vweird.f32 %v2947_v23  ;;  %v2023_v20 = vadd.f32 %v2022_v14, %v1988_v55 }
 0x557   : > { %2950 = vrcp.f32 %v2152_v13  ;;  %v2083_v16 = vpop.f32.mrf.mxu3  ;;  %vm2164_vm12 = vmor %vm2162_vm2, %vm2163_vm1  ;;  %v2183_v60 = vand.u32 2147483648, %v2152_v13  ;;  %v2181_v44 = vand.u32 2147483647, %v2152_v13  ;;  %vm2177_vm15 = vweird.f32 %v2152_v13 }
 0x558   : > { %v2159_v36 = vsub.f32 1.0, %v2158_v15  ;;  %v2084_v40 = vadd.f32 %v4153_v57, %v2083_v16  ;;  %2952 = vtanh.f32 %v2014_v54  ;;  %v2322_v54 = vld [vmem:[%s4304_s12 + $0x30] sm:$0xff] }
 0x559   : > { %v2184_v10 = vor.u32 1.1754944e-38, %v2183_v60  ;;  %vm2182_vm4 = vcmp.eq.f32.partialorder %v2181_v44, 8.507059e+37  ;;  %2348 = vmatpush.msrb.mxu1 %v2322_v54  ;;  %v1990_v15 = vpop.f32.mrf.mxu0  ;;  %v2318_v54 = vld [vmem:[%s4304_s12 + $0x10] sm:$0xff] }
 0x55a   : > { %v2160_v28 = vmul.f32 %v2947_v23, %v2159_v36  ;;  %v2119_v48 = vadd.f32 %v2118_v59, %v2084_v40  ;;  %v2323_v59 = vld [vmem:[%s4304_s12 + $0x38] sm:$0xff] }
 0x55b   : > { %2371 = vmatpush.msra.mxu3 %v2323_v59  ;;  %v2320_v59 = vld [vmem:[%s4304_s12 + $0x20] sm:$0xff] }
 0x55c   : > { %v2949_v33 = vpop.eup %2948  ;;  %v2738_v24 = vmul.f32 -1.442695, %v2119_v48  ;;  %v2161_v25 = vadd.f32 %v2947_v23, %v2160_v28  ;;  %2349 = vmatpush.msrb.mxu1 %v2320_v59 }
 0x55d   : > { %v2951_v52 = vpop.eup %2950  ;;  %v4169_v2 = vadd.f32 1.0, %v2949_v33 }
 0x55e   : > { %2954 = vpow2.f32 %v2738_v24  ;;  %v2165_v31 = vsel %vm2164_vm12, %v2947_v23, %v2161_v25  ;;  %v2173_v63 = vmul.f32 %v2951_v52, %v2152_v13  ;;  %v2953_v34 = vpop.eup %2952  ;;  %vm2178_vm14 = vweird.f32 %v2951_v52  ;;  %2350 = vmatpush.msrb.mxu1 %v2318_v54 }
 0x55f   : > { %2956 = vrcp.f32 %v4169_v2  ;;  %v2086_v41 = vpop.f32.mrf.mxu3  ;;  %v2170_v26 = vsel %vm2167_vm13, %v2169_v42, %v2165_v31  ;;  %vm2179_vm3 = vmor %vm2177_vm15, %vm2178_vm14  ;;  %v2198_v18 = vand.u32 2147483648, %v4169_v2  ;;  %v2196_v23 = vand.u32 2147483647, %v4169_v2  ;;  %v2025_v42 = vpop.f32.mrf.mxu1 }
 0x560   : > { %v2087_v27 = vadd.f32 %v4153_v57, %v2086_v41  ;;  %v2247_v38 = vmul.f32 %v2953_v34, %v2170_v26  ;;  %v2174_v39 = vsub.f32 1.0, %v2173_v63  ;;  %2958 = vtanh.f32 %v2017_v21 }
 0x561   : > { %vm2192_vm6 = vweird.f32 %v4169_v2  ;;  %v2199_v28 = vor.u32 1.1754944e-38, %v2198_v18  ;;  %vm2197_vm8 = vcmp.eq.f32.partialorder %v2196_v23, 8.507059e+37  ;;  %v1991_v21 = vadd.f32 %v4163_v0, %v1990_v15 }
 0x562   : > { %v2122_v8 = vadd.f32 %v2121_v6, %v2087_v27  ;;  %2746 = vmatmul.msk.f32.vlgmr.msra.gmra.mxu0 %vm664_vm0, %v2247_v38  ;;  %v2175_v43 = vmul.f32 %v2951_v52, %v2174_v39  ;;  %v1993_v39 = vpop.f32.mrf.mxu0 }
 0x563   : > { %v2026_v41 = vadd.f32 %v2025_v42, %v1991_v21  ;;  %v1994_v44 = vadd.f32 %v4163_v0, %v1993_v39 }
 0x564   : > { %v2955_v61 = vpop.eup %2954  ;;  %v2739_v46 = vmul.f32 -1.442695, %v2122_v8  ;;  %v2176_v47 = vadd.f32 %v2951_v52, %v2175_v43 }
 0x565   : > { %v2957_v4 = vpop.eup %2956  ;;  %v4175_v49 = vadd.f32 1.0, %v2955_v61 }
 0x566   : > { %v2188_v7 = vmul.f32 %v2957_v4, %v4169_v2  ;;  %2960 = vpow2.f32 %v2739_v46  ;;  %v2180_v30 = vsel %vm2179_vm3, %v2951_v52, %v2176_v47  ;;  %v2959_v35 = vpop.eup %2958  ;;  %vm2193_vm5 = vweird.f32 %v2957_v4 }
 0x567   : > { %2962 = vrcp.f32 %v4175_v49  ;;  %v2089_v53 = vpop.f32.mrf.mxu3  ;;  %v2185_v50 = vsel %vm2182_vm4, %v2184_v10, %v2180_v30  ;;  %vm2194_vm7 = vmor %vm2192_vm6, %vm2193_vm5  ;;  %v2213_v2 = vand.u32 2147483648, %v4175_v49  ;;  %v2211_v31 = vand.u32 2147483647, %v4175_v49  ;;  %v2028_v46 = vpop.f32.mrf.mxu1 }
 0x568   : > { %v2189_v58 = vsub.f32 1.0, %v2188_v7  ;;  %v2090_v5 = vadd.f32 %v4153_v57, %v2089_v53  ;;  %v2248_v9 = vmul.f32 %v2959_v35, %v2185_v50  ;;  %2964 = vtanh.f32 %v2020_v29  ;;  %v2321_v57 = vld [vmem:[%s4304_s12 + $0x28] sm:$0xff] }
 0x569   : > { %2372 = vmatpush.msra.mxu3 %v2321_v57  ;;  %vm2207_vm10 = vweird.f32 %v4175_v49  ;;  %v2214_v27 = vor.u32 1.1754944e-38, %v2213_v2  ;;  %vm2212_vm1 = vcmp.eq.f32.partialorder %v2211_v31, 8.507059e+37  ;;  %v2029_v10 = vadd.f32 %v2028_v46, %v1994_v44  ;;  %v2317_v57 = vld [vmem:[%s4304_s12 + $0x8] sm:$0xff] }
 0x56a   : > { %v2125_v32 = vadd.f32 %v2124_v3, %v2090_v5  ;;  %2747 = vmatmul.msk.f32.gmra.mxu0 %vm664_vm0, %v2248_v9  ;;  %v2190_v12 = vmul.f32 %v2957_v4, %v2189_v58 }
 0x56b   : > { %2373 = vmatpush.msra.mxu3 %v2319_v19 }
 0x56c   : > { %v2961_v13 = vpop.eup %2960  ;;  %v2740_v16 = vmul.f32 -1.442695, %v2125_v32  ;;  %v2191_v36 = vadd.f32 %v2957_v4, %v2190_v12 }
 0x56d   : > { %v2963_v40 = vpop.eup %2962  ;;  %v2155_v22 = vadd.f32 1.0, %v2961_v13  ;;  %2374 = vmatpush.msra.mxu3 %v2317_v57  ;;  %v2316_v13 = vld [vmem:[%s4304_s12] sm:$0xff] }
 0x56e   : > { %v2203_v48 = vmul.f32 %v2963_v40, %v4175_v49  ;;  %2966 = vpow2.f32 %v2740_v16  ;;  %v2195_v56 = vsel %vm2194_vm7, %v2957_v4, %v2191_v36  ;;  %v2965_v33 = vpop.eup %2964  ;;  %vm2208_vm9 = vweird.f32 %v2963_v40  ;;  %2351 = vmatpush.msrb.mxu1 %v2316_v13  ;;  %v2869_v36 = vld [vmem:[%s4303_s11 + $0x2] ss:$0 sm:$0xff] }
 0x56f   : > { %2968 = vrcp.f32 %v2155_v22  ;;  %v2200_v24 = vsel %vm2197_vm8, %v2199_v28, %v2195_v56  ;;  %vm2209_vm11 = vmor %vm2207_vm10, %vm2208_vm9  ;;  %v2228_v61 = vand.u32 2147483648, %v2155_v22  ;;  %v2226_v4 = vand.u32 2147483647, %v2155_v22 }
 0x570   : > { %v2204_v25 = vsub.f32 1.0, %v2203_v48  ;;  %v2249_v52 = vmul.f32 %v2965_v33, %v2200_v24  ;;  %2970 = vtanh.f32 %v2023_v20  ;;  %vm2222_vm12 = vweird.f32 %v2155_v22 }
 0x571   : > { %v2229_v7 = vor.u32 1.1754944e-38, %v2228_v61  ;;  %vm2227_vm14 = vcmp.eq.f32.partialorder %v2226_v4, 8.507059e+37 }
 0x572   : > { %2748 = vmatmul.msk.f32.gmra.mxu0 %vm664_vm0, %v2249_v52  ;;  %v2205_v45 = vmul.f32 %v2963_v40, %v2204_v25  ;;  %v2324_v25 = vld [vmem:[%s4305_s13] sm:$0x3] }
 0x573   : > { %v2327_v52 = vperm.slane %v2324_v25, 1 }
 0x574   : > { %v2967_v63 = vpop.eup %2966  ;;  %v2206_v34 = vadd.f32 %v2963_v40, %v2205_v45 }
 0x575   : > { %v2969_v6 = vpop.eup %2968  ;;  %v2156_v26 = vadd.f32 1.0, %v2967_v63 }
 0x576   : > { %v2218_v38 = vmul.f32 %v2969_v6, %v2155_v22  ;;  %v2210_v17 = vsel %vm2209_vm11, %v2963_v40, %v2206_v34  ;;  %v2971_v60 = vpop.eup %2970  ;;  %vm2223_vm2 = vweird.f32 %v2969_v6  ;;  %v2326_v34 = vperm.slane %v2324_v25, 0 }
 0x577   : > { %2972 = vrcp.f32 %v2156_v26  ;;  %v2215_v1 = vsel %vm2212_vm1, %v2214_v27, %v2210_v17  ;;  %vm2224_vm13 = vmor %vm2222_vm12, %vm2223_vm2  ;;  %v2243_v14 = vand.u32 2147483648, %v2156_v26  ;;  %v2241_v5 = vand.u32 2147483647, %v2156_v26  ;;  %v2386_v17 = vld [vmem:[%s3215_s25] sm:$0xff] }
 0x578   : > { %v2219_v8 = vsub.f32 1.0, %v2218_v38  ;;  %v2250_v43 = vmul.f32 %v2971_v60, %v2215_v1  ;;  %2974 = vtanh.f32 %v2026_v41  ;;  %vm2237_vm3 = vweird.f32 %v2156_v26  ;;  %v2388_v60 = vld [vmem:[%s3215_s25 + $0x8] sm:$0xff] }
 0x579   : > { %2976 = vtanh.f32 %v2029_v10  ;;  %v2244_v55 = vor.u32 1.1754944e-38, %v2243_v14  ;;  %vm2242_vm5 = vcmp.eq.f32.partialorder %v2241_v5, 8.507059e+37 }
 0x57a   : > { %2749 = vmatmul.msk.f32.gmra.mxu0 %vm664_vm0, %v2250_v43  ;;  %v2220_v47 = vmul.f32 %v2969_v6, %v2219_v8 }
 0x57c   : > { %v2221_v29 = vadd.f32 %v2969_v6, %v2220_v47 }
 0x57d   : > { %v2973_v49 = vpop.eup %2972 }
 0x57e   : > { %v2233_v30 = vmul.f32 %v2973_v49, %v2156_v26  ;;  %v2225_v35 = vsel %vm2224_vm13, %v2969_v6, %v2221_v29  ;;  %v2975_v53 = vpop.eup %2974  ;;  %vm2238_vm15 = vweird.f32 %v2973_v49  ;;  %v2391_v26 = vld [vmem:[%s3215_s25 + $0x28] sm:$0xff] }
 0x57f   : > { %v2230_v3 = vsel %vm2227_vm14, %v2229_v7, %v2225_v35  ;;  %vm2239_vm4 = vmor %vm2237_vm3, %vm2238_vm15  ;;  %v2977_v32 = vpop.eup %2976  ;;  %v2387_v7 = vld [vmem:[%s3215_s25 + $0x18] sm:$0xff] }
 0x580   : > { %v2234_v50 = vsub.f32 1.0, %v2233_v30  ;;  %v2251_v0 = vmul.f32 %v2975_v53, %v2230_v3  ;;  %v2389_v30 = vld [vmem:[%s3215_s25 + $0x20] sm:$0xff] }
 0x582   : > { %2750 = vmatmul.msk.f32.gmra.mxu0 %vm664_vm0, %v2251_v0  ;;  %v2235_v58 = vmul.f32 %v2973_v49, %v2234_v50 }
 0x584   : > { %v2236_v9 = vadd.f32 %v2973_v49, %v2235_v58 }
 0x586   : > { %v2240_v18 = vsel %vm2239_vm4, %v2973_v49, %v2236_v9 }
 0x587   : > { %v2245_v12 = vsel %vm2242_vm5, %v2244_v55, %v2240_v18 }
 0x588   : > { %v2252_v23 = vmul.f32 %v2977_v32, %v2245_v12 }
 0x58a   : > { %2751 = vmatmul.msk.f32.gmra.mxu0 %vm664_vm0, %v2252_v23 }
 0x5df   : > { %v2298_v15 = vpop.f32.mrf.mxu0 }
 0x5e7   : > { %v2300_v16 = vpop.f32.mrf.mxu0 }
 0x5ef   : > { %v2302_v19 = vpop.f32.mrf.mxu0 }
 0x5f0   : > { %v2303_v40 = vadd.f32 %v2869_v36, %v2302_v19 }
 0x5f2   : > { %v2312_v20 = vadd.f32 %v2303_v40, %v3955_v62 }
 0x5f4   : > { %v2314_v22 = vmul.f32 %v2312_v20, %v3302_v37 }
 0x5f6   : > { %2752 = vmatmul.msk.f32.vlgmr.msrb.gmra.mxu1 %vm664_vm0, %v2314_v22  ;;  %2754 = vmatmul.msk.f32.vlgmr.msra.gmra.mxu3 %vm664_vm0, %v2314_v22 }
 0x5f7   : > { %v2305_v28 = vpop.f32.mrf.mxu0 }
 0x5f8   : > { %v2306_v48 = vadd.f32 %v2869_v36, %v2305_v28 }
 0x5fa   : > { %v2313_v56 = vadd.f32 %v2306_v48, %v3970_v11  ;;  %v2390_v11 = vld [vmem:[%s3215_s25 + $0x10] sm:$0xff]  ;;  %s2998_s25 = scalar_lea.hbm %s2997_s2, 48 }
 0x5fb   : > { %p2999_p12 = scmp.ne.s32.totalorder %s2997_s2, %s2998_s25  ;;  %p3004_p2 = scmp.lt.s32.totalorder %s3002_s28, %s2998_s25 }
 0x5fc   : > { %v2315_v33 = vmul.f32 %v2313_v56, %v3318_v51 }
 0x5fd   : > { %p3000_p13 = pnand %p2999_p12, %p3186_p4  ;;  %p3005_p3 = por %p3004_p2, %p3003_p1 }
 0x5fe   : > { %2753 = vmatmul.msk.f32.gmra.mxu1 %vm664_vm0, %v2315_v33  ;;  %2755 = vmatmul.msk.f32.gmra.mxu3 %vm664_vm0, %v2315_v33 }
 0x5ff   : > { %v2308_v24 = vpop.f32.mrf.mxu0  ;;  %p3001_p0 = pneg %p3000_p13 }
 0x601   : > { %p3006_p5 = pnand %p3005_p3, %p3001_p0 }
 0x607   : > { %v2310_v62 = vpop.f32.mrf.mxu0 }
 0x673   : > { %v2353_v63 = vpop.f32.mrf.mxu1 }
 0x674   : > { %v2354_v38 = vadd.f32 %v2353_v63, %v2326_v34 }
 0x676   : > { %v2382_v44 = vmul.f32 %v2354_v38, %v3302_v37 }
 0x679   : > { %v2376_v21 = vpop.f32.mrf.mxu3 }
 0x67a   : > { %v2377_v2 = vadd.f32 %v2376_v21, %v2327_v52 }
 0x67b   : > { %v2356_v47 = vpop.f32.mrf.mxu1 }
 0x67c   : > { %v2384_v42 = vmul.f32 %v2377_v2, %v3302_v37  ;;  %v2357_v49 = vadd.f32 %v2356_v47, %v2326_v34 }
 0x67e   : > { %v2392_v45 = vmul.f32 1.442695, %v2384_v42  ;;  %v2410_v31 = vadd.f32 %v2390_v11, %v2384_v42  ;;  %v2383_v35 = vmul.f32 %v2357_v49, %v3318_v51 }
 0x680   : > { %2978 = vpow2.f32 %v2392_v45  ;;  %2412 = vst [vmem:[%s3217_s27 + $0x10] sm:$0xff] %v2410_v31 }
 0x681   : > { %v2379_v6 = vpop.f32.mrf.mxu3 }
 0x682   : > { %v2380_v41 = vadd.f32 %v2379_v6, %v2327_v52 }
 0x684   : > { %v2385_v27 = vmul.f32 %v2380_v41, %v3318_v51 }
 0x686   : > { %v2979_v39 = vpop.eup %2978  ;;  %v2394_v1 = vmul.f32 1.442695, %v2385_v27  ;;  %v2411_v8 = vadd.f32 %v2391_v26, %v2385_v27 }
 0x687   : > { %v2396_v43 = vmul.f32 %v2979_v39, %v3302_v37 }
 0x688   : > { %2980 = vpow2.f32 %v2394_v1  ;;  %2413 = vst [vmem:[%s3217_s27 + $0x28] sm:$0xff] %v2411_v8 }
 0x689   : > { %v2398_v61 = vmul.f32 %v2396_v43, %v2386_v17  ;;  %v2404_v46 = vmul.f32 %v2396_v43, %v2388_v60 }
 0x68b   : > { %v2400_v4 = vadd.f32 %v2398_v61, %v2382_v44  ;;  %v2406_v29 = vadd.f32 %v2404_v46, %v2382_v44 }
 0x68d   : > { %2402 = vst [vmem:[%s3217_s27] sm:$0xff] %v2400_v4 }
 0x68e   : > { %v2981_v10 = vpop.eup %2980  ;;  %2408 = vst [vmem:[%s3217_s27 + $0x8] sm:$0xff] %v2406_v29 }
 0x68f   : > { %v2397_v37 = vmul.f32 %v2981_v10, %v3318_v51 }
 0x691   : > { %v2399_v53 = vmul.f32 %v2397_v37, %v2387_v7  ;;  %v2405_v3 = vmul.f32 %v2397_v37, %v2389_v30 }
 0x693   : > { %v2401_v50 = vadd.f32 %v2399_v53, %v2383_v35  ;;  %v2407_v0 = vadd.f32 %v2405_v3, %v2383_v35 }
 0x695   : > { %2403 = vst [vmem:[%s3217_s27 + $0x18] sm:$0xff] %v2401_v50 }
 0x696   : > { %2409 = vst [vmem:[%s3217_s27 + $0x20] sm:$0xff] %v2407_v0 }
 0x697   : > { %3009 = shalt.err (!%p3006_p5)
}
 0x698   : > { %s3069_s27 = smov 384   ;;  %s3070_s17 = smov 24  }
 0x699   : > { %2768 = dma.vmem_to_hbm [thread:$0]  (%p3186_p4), %s2431_s22, 768, %s2433_s20, %s2415_s1, %s3069_s27, %s3069_s27, %s3070_s17  }
 0x69a PF: > { %s4339_s21 = sld [smem:[#allocation11_spill]]  ;;  %p2774_p6 = scmp.ge.s32.totalorder %s3062_s18, 2 }
 0x69c   : > { %p2771_p7 = pnand %p2774_p6, %p3193_p8 }
 0x69e   : > { %p2772_p9 = pneg %p2771_p7 }
 0x6a0   : > { %s2447_s19 = sand.u32 1, %s4339_s21  }
 0x6a1   : > { %s2448_s16 = scalar_lea.sflag [#allocation6], %s2447_s19 }
 0x6a2   : > { %3037 = dma.done.wait (%p2772_p9), %s2448_s16, 768  }
 0x6a3   : > { %3039 = vsyncadd (%p2772_p9), %s2448_s16, 4294966528  ;;  %s27_s18 = sadd.s32 1, %s3062_s18   ;;  %s4341_s2 = sld [smem:[#allocation12_spill]] }
 0x6a4   : > { %p24_p10 = scmp.ge.s32.totalorder %s27_s18, 4   ;;  %s4342_s15 = sld [smem:[#allocation16_spill]] }
 0x6a5   : > { %s4343_s16 = sld [smem:[#allocation13_spill]]  ;;  %s4345_s29 = smov %s3046_s30 }
 0x6a6   : > { %s4344_s17 = sld [smem:[#allocation14_spill]]  ;;  %26 = sbr.rel (!%p24_p10) target bundleno = 8 (0x8), region = 182 }
 0x6a9   : > { %s4346_s30 = smov %s4341_s2 }
 0x6ab   :  { %2454 = vsyncpa [#allocation6], 1 }
 0x6ac   :  { %2456 = vsyncpa [#allocation6 + $0x1], 1 }
 0x6ad   :  { %2457 = vsyncmov [#allocation4] }
 0x6b0   :  { %s2458_s23 = vpop.sfrf %2457 }
 0x6b1   :  { %p2759_p4 = scmp.ne.s32.totalorder %s2458_s23, 0 }
 0x6b3   :  { %2462 = shalt.err (%p2759_p4)  }
 0x6b4   :  { %2464 = vsyncmov [#allocation4 + $0x1] }
 0x6b7   :  { %s2465_s22 = vpop.sfrf %2464 }
 0x6b8   :  { %p2760_p8 = scmp.ne.s32.totalorder %s2465_s22, 0 }
 0x6ba   :  { %2469 = shalt.err (%p2760_p8)  }

</bundles_post_ra>
